<compile_context>
chip_gen: v7x
topology: tpu7x:2x2x1
jax: 0.10.0
libtpu: 0.0.40
codegen_flags: <defaults>
</compile_context>

<pallas_src>
import functools

import jax
import jax.numpy as jnp
from jax.experimental import pallas as pl
from jax.experimental.pallas import tpu as pltpu


# Column layout of the packed per-channel parameter array (NB, C_conv, 8).
_COL_B1, _COL_G1W, _COL_G1B, _COL_DWB, _COL_G2W, _COL_G2B = range(6)


def _build_fused_stacked_tcn_call(*, B, C_in, C_conv, T, ks, num_blocks,
                                  eps=1e-5, matmul_dtype=jnp.bfloat16):
    NB = num_blocks
    dilations = [2 ** b for b in range(NB)]           # speaker block d=1, then 2, 4, ...
    pads = [d * (ks - 1) // 2 for d in dilations]
    pad_max = max(pads)
    n = C_conv * T
    inv_n = 1.0 / n
    inv_nm1 = 1.0 / max(n - 1, 1)                      # torch.std default: unbiased (Bessel)

    def gln(x, w, b):
        # GlobalLayerNorm over (C, T): two-pass mean / unbiased std, matching the reference
        # (x - mean) / (std + eps) * w + b. Tensor-wide work is a subtract and a multiply;
        # the division / sqrt stay scalar.
        mean = jnp.sum(x) * inv_n
        d = x - mean
        var = jnp.sum(d * d) * inv_nm1
        inv_std = 1.0 / (jnp.sqrt(var) + eps)
        return w * (d * inv_std) + b

    def kernel(x_ref, auxc_ref, w1x_ref, pcc_ref, prelu_ref, dww_ref,
               w2_ref, b2_ref, out_ref, pad_ref):
        # Zero halos of the padded depthwise-conv scratch (unconditional: see header note).
        if pad_max > 0:
            zeros_halo = jnp.zeros((C_conv, pad_max), jnp.float32)
            pad_ref[:, :pad_max] = zeros_halo
            pad_ref[:, pad_max + T:] = zeros_halo

        y = x_ref[0]            # (C_in, T) f32: current activation / residual, VMEM resident
        aux_c = auxc_ref[0]     # (C_conv, 1) precomputed speaker-embedding contribution
        kc = (ks - 1) // 2      # center tap index ('same' conv, odd kernel)

        for blk in range(NB):   # unrolled: dilation / slice offsets are static per block
            dil = dilations[blk]
            base = pad_max - pads[blk]
            res = y

            pp = pcc_ref[blk]                        # (C_conv, 8) packed per-channel params
            b1 = pp[:, _COL_B1:_COL_B1 + 1]
            g1w = pp[:, _COL_G1W:_COL_G1W + 1]
            g1b = pp[:, _COL_G1B:_COL_G1B + 1]
            dwb = pp[:, _COL_DWB:_COL_DWB + 1]
            g2w = pp[:, _COL_G2W:_COL_G2W + 1]
            g2b = pp[:, _COL_G2B:_COL_G2B + 1]

            # --- 1x1 conv in (MXU, bf16 operands / f32 accumulate) ---
            h = jnp.dot(w1x_ref[blk], y.astype(matmul_dtype),
                        preferred_element_type=jnp.float32) + b1
            if blk == 0:
                # Speaker block: channel-concat with aux folded into a (C_conv, 1) vector.
                h = h + aux_c

            # --- PReLU 1 + GLN 1 ---
            a1 = prelu_ref[2 * blk]
            h = jnp.where(h >= 0, h, a1 * h)
            h = gln(h, g1w, g1b)

            # --- dilated depthwise conv ('same', zero pad): halo scratch + static slices ---
            dw = dww_ref[blk]                        # (C_conv, ks)
            acc = dw[:, kc:kc + 1] * h + dwb         # center tap straight from vregs
            if ks > 1:
                pad_ref[:, pad_max:pad_max + T] = h  # shifted taps read the haloed copy
                for k in range(ks):
                    if k == kc:
                        continue
                    off = base + k * dil
                    acc = acc + dw[:, k:k + 1] * pad_ref[:, off:off + T]

            # --- PReLU 2 + GLN 2 ---
            a2 = prelu_ref[2 * blk + 1]
            z = jnp.where(acc >= 0, acc, a2 * acc)
            z = gln(z, g2w, g2b)

            # --- 1x1 conv out (MXU) + residual ---
            y = jnp.dot(w2_ref[blk], z.astype(matmul_dtype),
                        preferred_element_type=jnp.float32) + b2_ref[blk] + res

        out_ref[0] = y

    const3 = lambda b: (0, 0, 0)
    buf1 = pl.Buffered(1)  # constant-index blocks: double-buffering is pure VMEM waste
    in_specs = [
        pl.BlockSpec((1, C_in, T), lambda b: (b, 0, 0)),                 # x (also residual)
        pl.BlockSpec((1, C_conv, 1), lambda b: (b, 0, 0)),               # aux_c = aux @ w1aux^T
        pl.BlockSpec((NB, C_conv, C_in), const3, pipeline_mode=buf1),    # w1 x-part (bf16)
        pl.BlockSpec((NB, C_conv, 8), const3, pipeline_mode=buf1),       # packed per-channel
        pl.BlockSpec(memory_space=pltpu.MemorySpace.SMEM),               # PReLU scalars (2*NB,)
        pl.BlockSpec((NB, C_conv, ks), const3, pipeline_mode=buf1),      # depthwise weight
        pl.BlockSpec((NB, C_in, C_conv), const3, pipeline_mode=buf1),    # w2 (bf16)
        pl.BlockSpec((NB, C_in, 1), const3, pipeline_mode=buf1),         # b2
    ]
    out_specs = pl.BlockSpec((1, C_in, T), lambda b: (b, 0, 0))

    # TODO(synk): at production SpEx+ sizes (C_conv~512, NB=8, long T) on v7x (64 MiB VMEM),
    # switch to a (B, NB) grid with the activation carried in VMEM scratch (or T-tiling with a
    # two-pass GLN) instead of this fully unrolled, fully co-resident layout.
    return pl.pallas_call(
        kernel,
        grid=(B,),
        in_specs=in_specs,
        out_specs=out_specs,
        out_shape=jax.ShapeDtypeStruct((B, C_in, T), jnp.float32),
        scratch_shapes=[pltpu.VMEM((C_conv, T + 2 * pad_max), jnp.float32)],
        compiler_params=pltpu.CompilerParams(
            dimension_semantics=("parallel",),        # megacore batch sharding on v7x
            vmem_limit_bytes=32 * 1024 * 1024,        # safe on v5e/v6e/v7x at these shapes
        ),
    )


def stacked_tcns_forward(x, aux, params, *, in_channels, embedd_dim, conv_channels,
                         kernel_size, num_blocks, eps=1e-5, matmul_dtype=jnp.bfloat16):
    B, C_in, T = x.shape
    assert C_in == in_channels
    assert kernel_size % 2 == 1, "'same' residual alignment requires an odd kernel_size"
    del embedd_dim  # only shapes w1aux in init_params

    call = _build_fused_stacked_tcn_call(
        B=B, C_in=in_channels, C_conv=conv_channels, T=T, ks=kernel_size,
        num_blocks=num_blocks, eps=eps, matmul_dtype=matmul_dtype)

    # Speaker-block aux contribution: tiny (B, E) x (E, C_conv) matmul done outside the
    # kernel; no (B, E, T) time broadcast and no channel concat are ever materialized.
    aux_c = jnp.dot(aux, params["w1aux"].T)[:, :, None].astype(jnp.float32)  # (B, C_conv, 1)

    return call(x.astype(jnp.float32), aux_c,
                params["w1x"].astype(matmul_dtype),
                params["pcc"], params["prelu"], params["dww"],
                params["w2"].astype(matmul_dtype), params["b2"])


def init_params(key, *, in_channels, embedd_dim, conv_channels, kernel_size, num_blocks):
    NB = num_blocks
    keys = jax.random.split(key, 7)

    def rnd(k, shape, scale=0.1):
        return jax.random.normal(k, shape, jnp.float32) * scale

    b1 = rnd(keys[2], (NB, conv_channels, 1), 0.01)
    dwb = rnd(keys[4], (NB, conv_channels, 1), 0.01)
    ones = jnp.ones((NB, conv_channels, 1), jnp.float32)
    zeros = jnp.zeros((NB, conv_channels, 1), jnp.float32)
    # Packed per-channel params, columns: [b1, gln1_w, gln1_b, dw_bias, gln2_w, gln2_b, 0, 0].
    pcc = jnp.concatenate([b1, ones, zeros, dwb, ones, zeros, zeros, zeros], axis=-1)

    return {
        # w1 split into x-part (all blocks) and aux-part (speaker block only); the column
        # ordering matches torch's concat([x, aux], dim=1) weight layout.
        "w1x": rnd(keys[0], (NB, conv_channels, in_channels)),
        "w1aux": rnd(keys[1], (conv_channels, embedd_dim)),
        "pcc": pcc,
        "prelu": jnp.full((2 * NB,), 0.25, jnp.float32),   # [2b] = PReLU1, [2b+1] = PReLU2
        "dww": rnd(keys[3], (NB, conv_channels, kernel_size)),
        "w2": rnd(keys[5], (NB, in_channels, conv_channels)),
        "b2": rnd(keys[6], (NB, in_channels, 1), 0.01),
    }


if __name__ == "__main__":
    # Small shapes consistent with the module's forward; T chosen lane-dense (multiple of 128).
    B = 2
    in_channels = 16
    embedd_dim = 8
    conv_channels = 32
    kernel_size = 3
    num_blocks = 4
    T = 128

    key = jax.random.PRNGKey(0)
    kx, ka, kp = jax.random.split(key, 3)
    x = jax.random.normal(kx, (B, in_channels, T), jnp.float32)
    aux = jax.random.normal(ka, (B, embedd_dim), jnp.float32)
    params = init_params(kp, in_channels=in_channels, embedd_dim=embedd_dim,
                         conv_channels=conv_channels, kernel_size=kernel_size,
                         num_blocks=num_blocks)

    fwd = jax.jit(functools.partial(
        stacked_tcns_forward, in_channels=in_channels, embedd_dim=embedd_dim,
        conv_channels=conv_channels, kernel_size=kernel_size, num_blocks=num_blocks))

    out = jax.block_until_ready(fwd(x, aux, params))
    assert out.shape == (B, in_channels, T)
    assert bool(jnp.all(jnp.isfinite(out)))
    print("KERNEL_OK")
</pallas_src>

<mosaic_0001>
module attributes {stable_mosaic.version = 11 : i64} {
  func.func @kernel(%arg0: i32, %arg1: memref<1x16x128xf32, #tpu.memory_space<vmem>>, %arg2: memref<1x32x1xf32, #tpu.memory_space<vmem>>, %arg3: memref<4x32x16xbf16, #tpu.memory_space<vmem>>, %arg4: memref<4x32x8xf32, #tpu.memory_space<vmem>>, %arg5: memref<8xf32, #tpu.memory_space<smem>>, %arg6: memref<4x32x3xf32, #tpu.memory_space<vmem>>, %arg7: memref<4x16x32xbf16, #tpu.memory_space<vmem>>, %arg8: memref<4x16x1xf32, #tpu.memory_space<vmem>>, %arg9: memref<1x16x128xf32, #tpu.memory_space<vmem>>, %arg10: memref<32x144xf32, #tpu.memory_space<vmem>>) attributes {dimension_semantics = [#tpu.dimension_semantics<parallel>], iteration_bounds = array<i64: 2>, scalar_prefetch = 0 : i64, scratch_operands = 1 : i64, tpu.core_type = #tpu.core_type<tc>, window_params = [{transform_indices = @transform_0, window_bounds = array<i64: 1, 16, 128>}, {transform_indices = @transform_1, window_bounds = array<i64: 1, 32, 1>}, {pipeline_mode = #tpu.pipeline_mode<synchronous>, transform_indices = @transform_2, window_bounds = array<i64: 4, 32, 16>}, {pipeline_mode = #tpu.pipeline_mode<synchronous>, transform_indices = @transform_3, window_bounds = array<i64: 4, 32, 8>}, {transform_indices = @transform_4, window_bounds = array<i64: 8>}, {pipeline_mode = #tpu.pipeline_mode<synchronous>, transform_indices = @transform_5, window_bounds = array<i64: 4, 32, 3>}, {pipeline_mode = #tpu.pipeline_mode<synchronous>, transform_indices = @transform_6, window_bounds = array<i64: 4, 16, 32>}, {pipeline_mode = #tpu.pipeline_mode<synchronous>, transform_indices = @transform_7, window_bounds = array<i64: 4, 16, 1>}, {transform_indices = @transform_8, window_bounds = array<i64: 1, 16, 128>}]} {
    %cst = arith.constant 0.000000e+00 : f32
    %0 = vector.broadcast %cst : f32 to vector<32x8xf32>
    %c0 = arith.constant 0 : index
    %c0_0 = arith.constant 0 : index
    %1 = vector.load %arg10[%c0, %c0_0] : memref<32x144xf32, #tpu.memory_space<vmem>>, vector<32x8xf32>
    tpu.vector_store %arg10[%c0, %c0_0], %0 {strides = array<i32>} : memref<32x144xf32, #tpu.memory_space<vmem>>, vector<32x8xf32>,
    %c0_1 = arith.constant 0 : index
    %c136 = arith.constant 136 : index
    %2 = vector.load %arg10[%c0_1, %c136] : memref<32x144xf32, #tpu.memory_space<vmem>>, vector<32x8xf32>
    tpu.vector_store %arg10[%c0_1, %c136], %0 {strides = array<i32>} : memref<32x144xf32, #tpu.memory_space<vmem>>, vector<32x8xf32>,
    %c0_2 = arith.constant 0 : index
    %c0_3 = arith.constant 0 : index
    %c0_4 = arith.constant 0 : index
    %3 = vector.load %arg1[%c0_2, %c0_3, %c0_4] : memref<1x16x128xf32, #tpu.memory_space<vmem>>, vector<1x16x128xf32>
    %4 = vector.shape_cast %3 : vector<1x16x128xf32> to vector<16x128xf32>
    %c0_5 = arith.constant 0 : index
    %c0_6 = arith.constant 0 : index
    %c0_7 = arith.constant 0 : index
    %5 = vector.load %arg2[%c0_5, %c0_6, %c0_7] : memref<1x32x1xf32, #tpu.memory_space<vmem>>, vector<1x32x1xf32>
    %6 = vector.shape_cast %5 : vector<1x32x1xf32> to vector<32x1xf32>
    %c0_8 = arith.constant 0 : index
    %c0_9 = arith.constant 0 : index
    %c0_10 = arith.constant 0 : index
    %7 = vector.load %arg4[%c0_8, %c0_9, %c0_10] : memref<4x32x8xf32, #tpu.memory_space<vmem>>, vector<1x32x8xf32>
    %8 = vector.shape_cast %7 : vector<1x32x8xf32> to vector<32x8xf32>
    %9 = vector.extract_strided_slice %8 {offsets = [0, 0], sizes = [32, 1], strides = [1, 1]} : vector<32x8xf32> to vector<32x1xf32>
    %10 = vector.extract_strided_slice %8 {offsets = [0, 1], sizes = [32, 1], strides = [1, 1]} : vector<32x8xf32> to vector<32x1xf32>
    %11 = vector.extract_strided_slice %8 {offsets = [0, 2], sizes = [32, 1], strides = [1, 1]} : vector<32x8xf32> to vector<32x1xf32>
    %12 = vector.extract_strided_slice %8 {offsets = [0, 3], sizes = [32, 1], strides = [1, 1]} : vector<32x8xf32> to vector<32x1xf32>
    %13 = vector.extract_strided_slice %8 {offsets = [0, 4], sizes = [32, 1], strides = [1, 1]} : vector<32x8xf32> to vector<32x1xf32>
    %14 = vector.extract_strided_slice %8 {offsets = [0, 5], sizes = [32, 1], strides = [1, 1]} : vector<32x8xf32> to vector<32x1xf32>
    %c0_11 = arith.constant 0 : index
    %c0_12 = arith.constant 0 : index
    %c0_13 = arith.constant 0 : index
    %15 = vector.load %arg3[%c0_11, %c0_12, %c0_13] : memref<4x32x16xbf16, #tpu.memory_space<vmem>>, vector<1x32x16xbf16>
    %16 = vector.shape_cast %15 : vector<1x32x16xbf16> to vector<32x16xbf16>
    %17 = arith.truncf %4 : vector<16x128xf32> to vector<16x128xbf16>
    %cst_14 = arith.constant dense<0.000000e+00> : vector<32x128xf32>
    %18 = tpu.matmul %16, %17, %cst_14 {dimension_numbers = #tpu.dot_dimension_numbers<[1], [0], [0], [1], [0, 0, 1, 1], [], []>} : vector<32x16xbf16>, vector<16x128xbf16>, vector<32x128xf32> -> vector<32x128xf32>
    %19 = vector.broadcast %9 : vector<32x1xf32> to vector<32x128xf32>
    %20 = arith.addf %18, %19 : vector<32x128xf32>
    %21 = vector.broadcast %6 : vector<32x1xf32> to vector<32x128xf32>
    %22 = arith.addf %20, %21 : vector<32x128xf32>
    %c0_15 = arith.constant 0 : index
    %23 = memref.load %arg5[%c0_15] : memref<8xf32, #tpu.memory_space<smem>>
    %cst_16 = arith.constant 0.000000e+00 : f32
    %24 = vector.broadcast %cst_16 : f32 to vector<32x128xf32>
    %25 = arith.cmpf oge, %22, %24 : vector<32x128xf32>
    %26 = vector.broadcast %23 : f32 to vector<32x128xf32>
    %27 = arith.mulf %26, %22 : vector<32x128xf32>
    %28 = arith.select %25, %22, %27 : vector<32x128xi1>, vector<32x128xf32>
    %29 = vector.shape_cast %28 : vector<32x128xf32> to vector<1x32x128xf32>
    %cst_17 = arith.constant dense<0.000000e+00> : vector<1xf32>
    %30 = vector.multi_reduction <add>, %29, %cst_17 [1, 2] : vector<1x32x128xf32> to vector<1xf32>
    %31 = vector.shape_cast %30 : vector<1xf32> to vector<1x1x1xf32>
    %32 = vector.extract %31[0, 0, 0] : f32 from vector<1x1x1xf32>
    %cst_18 = arith.constant 2.44140625E-4 : f32
    %33 = arith.mulf %32, %cst_18 : f32
    %34 = vector.broadcast %33 : f32 to vector<32x128xf32>
    %35 = arith.subf %28, %34 : vector<32x128xf32>
    %36 = arith.mulf %35, %35 : vector<32x128xf32>
    %37 = vector.shape_cast %36 : vector<32x128xf32> to vector<1x32x128xf32>
    %cst_19 = arith.constant dense<0.000000e+00> : vector<1xf32>
    %38 = vector.multi_reduction <add>, %37, %cst_19 [1, 2] : vector<1x32x128xf32> to vector<1xf32>
    %39 = vector.shape_cast %38 : vector<1xf32> to vector<1x1x1xf32>
    %40 = vector.extract %39[0, 0, 0] : f32 from vector<1x1x1xf32>
    %cst_20 = arith.constant 2.44200259E-4 : f32
    %41 = arith.mulf %40, %cst_20 : f32
    %42 = math.sqrt %41 : f32
    %cst_21 = arith.constant 9.99999974E-6 : f32
    %43 = arith.addf %42, %cst_21 : f32
    %cst_22 = arith.constant 1.000000e+00 : f32
    %44 = arith.divf %cst_22, %43 : f32
    %45 = vector.broadcast %44 : f32 to vector<32x128xf32>
    %46 = arith.mulf %35, %45 : vector<32x128xf32>
    %47 = vector.broadcast %10 : vector<32x1xf32> to vector<32x128xf32>
    %48 = arith.mulf %47, %46 : vector<32x128xf32>
    %49 = vector.broadcast %11 : vector<32x1xf32> to vector<32x128xf32>
    %50 = arith.addf %48, %49 : vector<32x128xf32>
    %c0_23 = arith.constant 0 : index
    %c0_24 = arith.constant 0 : index
    %c0_25 = arith.constant 0 : index
    %51 = vector.load %arg6[%c0_23, %c0_24, %c0_25] : memref<4x32x3xf32, #tpu.memory_space<vmem>>, vector<1x32x3xf32>
    %52 = vector.shape_cast %51 : vector<1x32x3xf32> to vector<32x3xf32>
    %53 = vector.extract_strided_slice %52 {offsets = [0, 1], sizes = [32, 1], strides = [1, 1]} : vector<32x3xf32> to vector<32x1xf32>
    %54 = vector.broadcast %53 : vector<32x1xf32> to vector<32x128xf32>
    %55 = arith.mulf %54, %50 : vector<32x128xf32>
    %56 = vector.broadcast %12 : vector<32x1xf32> to vector<32x128xf32>
    %57 = arith.addf %55, %56 : vector<32x128xf32>
    %c0_26 = arith.constant 0 : index
    %c8 = arith.constant 8 : index
    %58 = vector.load %arg10[%c0_26, %c8] : memref<32x144xf32, #tpu.memory_space<vmem>>, vector<32x128xf32>
    tpu.vector_store %arg10[%c0_26, %c8], %50 {strides = array<i32>} : memref<32x144xf32, #tpu.memory_space<vmem>>, vector<32x128xf32>,
    %59 = vector.extract_strided_slice %52 {offsets = [0, 0], sizes = [32, 1], strides = [1, 1]} : vector<32x3xf32> to vector<32x1xf32>
    %c0_27 = arith.constant 0 : index
    %c7 = arith.constant 7 : index
    %60 = vector.load %arg10[%c0_27, %c7] : memref<32x144xf32, #tpu.memory_space<vmem>>, vector<32x128xf32>
    %61 = vector.broadcast %59 : vector<32x1xf32> to vector<32x128xf32>
    %62 = arith.mulf %61, %60 : vector<32x128xf32>
    %63 = arith.addf %57, %62 : vector<32x128xf32>
    %64 = vector.extract_strided_slice %52 {offsets = [0, 2], sizes = [32, 1], strides = [1, 1]} : vector<32x3xf32> to vector<32x1xf32>
    %c0_28 = arith.constant 0 : index
    %c9 = arith.constant 9 : index
    %65 = vector.load %arg10[%c0_28, %c9] : memref<32x144xf32, #tpu.memory_space<vmem>>, vector<32x128xf32>
    %66 = vector.broadcast %64 : vector<32x1xf32> to vector<32x128xf32>
    %67 = arith.mulf %66, %65 : vector<32x128xf32>
    %68 = arith.addf %63, %67 : vector<32x128xf32>
    %c1 = arith.constant 1 : index
    %69 = memref.load %arg5[%c1] : memref<8xf32, #tpu.memory_space<smem>>
    %cst_29 = arith.constant 0.000000e+00 : f32
    %70 = vector.broadcast %cst_29 : f32 to vector<32x128xf32>
    %71 = arith.cmpf oge, %68, %70 : vector<32x128xf32>
    %72 = vector.broadcast %69 : f32 to vector<32x128xf32>
    %73 = arith.mulf %72, %68 : vector<32x128xf32>
    %74 = arith.select %71, %68, %73 : vector<32x128xi1>, vector<32x128xf32>
    %75 = vector.shape_cast %74 : vector<32x128xf32> to vector<1x32x128xf32>
    %cst_30 = arith.constant dense<0.000000e+00> : vector<1xf32>
    %76 = vector.multi_reduction <add>, %75, %cst_30 [1, 2] : vector<1x32x128xf32> to vector<1xf32>
    %77 = vector.shape_cast %76 : vector<1xf32> to vector<1x1x1xf32>
    %78 = vector.extract %77[0, 0, 0] : f32 from vector<1x1x1xf32>
    %cst_31 = arith.constant 2.44140625E-4 : f32
    %79 = arith.mulf %78, %cst_31 : f32
    %80 = vector.broadcast %79 : f32 to vector<32x128xf32>
    %81 = arith.subf %74, %80 : vector<32x128xf32>
    %82 = arith.mulf %81, %81 : vector<32x128xf32>
    %83 = vector.shape_cast %82 : vector<32x128xf32> to vector<1x32x128xf32>
    %cst_32 = arith.constant dense<0.000000e+00> : vector<1xf32>
    %84 = vector.multi_reduction <add>, %83, %cst_32 [1, 2] : vector<1x32x128xf32> to vector<1xf32>
    %85 = vector.shape_cast %84 : vector<1xf32> to vector<1x1x1xf32>
    %86 = vector.extract %85[0, 0, 0] : f32 from vector<1x1x1xf32>
    %cst_33 = arith.constant 2.44200259E-4 : f32
    %87 = arith.mulf %86, %cst_33 : f32
    %88 = math.sqrt %87 : f32
    %cst_34 = arith.constant 9.99999974E-6 : f32
    %89 = arith.addf %88, %cst_34 : f32
    %cst_35 = arith.constant 1.000000e+00 : f32
    %90 = arith.divf %cst_35, %89 : f32
    %91 = vector.broadcast %90 : f32 to vector<32x128xf32>
    %92 = arith.mulf %81, %91 : vector<32x128xf32>
    %93 = vector.broadcast %13 : vector<32x1xf32> to vector<32x128xf32>
    %94 = arith.mulf %93, %92 : vector<32x128xf32>
    %95 = vector.broadcast %14 : vector<32x1xf32> to vector<32x128xf32>
    %96 = arith.addf %94, %95 : vector<32x128xf32>
    %c0_36 = arith.constant 0 : index
    %c0_37 = arith.constant 0 : index
    %c0_38 = arith.constant 0 : index
    %97 = vector.load %arg7[%c0_36, %c0_37, %c0_38] : memref<4x16x32xbf16, #tpu.memory_space<vmem>>, vector<1x16x32xbf16>
    %98 = vector.shape_cast %97 : vector<1x16x32xbf16> to vector<16x32xbf16>
    %99 = arith.truncf %96 : vector<32x128xf32> to vector<32x128xbf16>
    %cst_39 = arith.constant dense<0.000000e+00> : vector<16x128xf32>
    %100 = tpu.matmul %98, %99, %cst_39 {dimension_numbers = #tpu.dot_dimension_numbers<[1], [0], [0], [1], [0, 0, 1, 1], [], []>} : vector<16x32xbf16>, vector<32x128xbf16>, vector<16x128xf32> -> vector<16x128xf32>
    %c0_40 = arith.constant 0 : index
    %c0_41 = arith.constant 0 : index
    %c0_42 = arith.constant 0 : index
    %101 = vector.load %arg8[%c0_40, %c0_41, %c0_42] : memref<4x16x1xf32, #tpu.memory_space<vmem>>, vector<1x16x1xf32>
    %102 = vector.shape_cast %101 : vector<1x16x1xf32> to vector<16x1xf32>
    %103 = vector.broadcast %102 : vector<16x1xf32> to vector<16x128xf32>
    %104 = arith.addf %100, %103 : vector<16x128xf32>
    %105 = arith.addf %104, %4 : vector<16x128xf32>
    %c1_43 = arith.constant 1 : index
    %c0_44 = arith.constant 0 : index
    %c0_45 = arith.constant 0 : index
    %106 = vector.load %arg4[%c1_43, %c0_44, %c0_45] : memref<4x32x8xf32, #tpu.memory_space<vmem>>, vector<1x32x8xf32>
    %107 = vector.shape_cast %106 : vector<1x32x8xf32> to vector<32x8xf32>
    %108 = vector.extract_strided_slice %107 {offsets = [0, 0], sizes = [32, 1], strides = [1, 1]} : vector<32x8xf32> to vector<32x1xf32>
    %109 = vector.extract_strided_slice %107 {offsets = [0, 1], sizes = [32, 1], strides = [1, 1]} : vector<32x8xf32> to vector<32x1xf32>
    %110 = vector.extract_strided_slice %107 {offsets = [0, 2], sizes = [32, 1], strides = [1, 1]} : vector<32x8xf32> to vector<32x1xf32>
    %111 = vector.extract_strided_slice %107 {offsets = [0, 3], sizes = [32, 1], strides = [1, 1]} : vector<32x8xf32> to vector<32x1xf32>
    %112 = vector.extract_strided_slice %107 {offsets = [0, 4], sizes = [32, 1], strides = [1, 1]} : vector<32x8xf32> to vector<32x1xf32>
    %113 = vector.extract_strided_slice %107 {offsets = [0, 5], sizes = [32, 1], strides = [1, 1]} : vector<32x8xf32> to vector<32x1xf32>
    %c1_46 = arith.constant 1 : index
    %c0_47 = arith.constant 0 : index
    %c0_48 = arith.constant 0 : index
    %114 = vector.load %arg3[%c1_46, %c0_47, %c0_48] : memref<4x32x16xbf16, #tpu.memory_space<vmem>>, vector<1x32x16xbf16>
    %115 = vector.shape_cast %114 : vector<1x32x16xbf16> to vector<32x16xbf16>
    %116 = arith.truncf %105 : vector<16x128xf32> to vector<16x128xbf16>
    %cst_49 = arith.constant dense<0.000000e+00> : vector<32x128xf32>
    %117 = tpu.matmul %115, %116, %cst_49 {dimension_numbers = #tpu.dot_dimension_numbers<[1], [0], [0], [1], [0, 0, 1, 1], [], []>} : vector<32x16xbf16>, vector<16x128xbf16>, vector<32x128xf32> -> vector<32x128xf32>
    %118 = vector.broadcast %108 : vector<32x1xf32> to vector<32x128xf32>
    %119 = arith.addf %117, %118 : vector<32x128xf32>
    %c2 = arith.constant 2 : index
    %120 = memref.load %arg5[%c2] : memref<8xf32, #tpu.memory_space<smem>>
    %cst_50 = arith.constant 0.000000e+00 : f32
    %121 = vector.broadcast %cst_50 : f32 to vector<32x128xf32>
    %122 = arith.cmpf oge, %119, %121 : vector<32x128xf32>
    %123 = vector.broadcast %120 : f32 to vector<32x128xf32>
    %124 = arith.mulf %123, %119 : vector<32x128xf32>
    %125 = arith.select %122, %119, %124 : vector<32x128xi1>, vector<32x128xf32>
    %126 = vector.shape_cast %125 : vector<32x128xf32> to vector<1x32x128xf32>
    %cst_51 = arith.constant dense<0.000000e+00> : vector<1xf32>
    %127 = vector.multi_reduction <add>, %126, %cst_51 [1, 2] : vector<1x32x128xf32> to vector<1xf32>
    %128 = vector.shape_cast %127 : vector<1xf32> to vector<1x1x1xf32>
    %129 = vector.extract %128[0, 0, 0] : f32 from vector<1x1x1xf32>
    %cst_52 = arith.constant 2.44140625E-4 : f32
    %130 = arith.mulf %129, %cst_52 : f32
    %131 = vector.broadcast %130 : f32 to vector<32x128xf32>
    %132 = arith.subf %125, %131 : vector<32x128xf32>
    %133 = arith.mulf %132, %132 : vector<32x128xf32>
    %134 = vector.shape_cast %133 : vector<32x128xf32> to vector<1x32x128xf32>
    %cst_53 = arith.constant dense<0.000000e+00> : vector<1xf32>
    %135 = vector.multi_reduction <add>, %134, %cst_53 [1, 2] : vector<1x32x128xf32> to vector<1xf32>
    %136 = vector.shape_cast %135 : vector<1xf32> to vector<1x1x1xf32>
    %137 = vector.extract %136[0, 0, 0] : f32 from vector<1x1x1xf32>
    %cst_54 = arith.constant 2.44200259E-4 : f32
    %138 = arith.mulf %137, %cst_54 : f32
    %139 = math.sqrt %138 : f32
    %cst_55 = arith.constant 9.99999974E-6 : f32
    %140 = arith.addf %139, %cst_55 : f32
    %cst_56 = arith.constant 1.000000e+00 : f32
    %141 = arith.divf %cst_56, %140 : f32
    %142 = vector.broadcast %141 : f32 to vector<32x128xf32>
    %143 = arith.mulf %132, %142 : vector<32x128xf32>
    %144 = vector.broadcast %109 : vector<32x1xf32> to vector<32x128xf32>
    %145 = arith.mulf %144, %143 : vector<32x128xf32>
    %146 = vector.broadcast %110 : vector<32x1xf32> to vector<32x128xf32>
    %147 = arith.addf %145, %146 : vector<32x128xf32>
    %c1_57 = arith.constant 1 : index
    %c0_58 = arith.constant 0 : index
    %c0_59 = arith.constant 0 : index
    %148 = vector.load %arg6[%c1_57, %c0_58, %c0_59] : memref<4x32x3xf32, #tpu.memory_space<vmem>>, vector<1x32x3xf32>
    %149 = vector.shape_cast %148 : vector<1x32x3xf32> to vector<32x3xf32>
    %150 = vector.extract_strided_slice %149 {offsets = [0, 1], sizes = [32, 1], strides = [1, 1]} : vector<32x3xf32> to vector<32x1xf32>
    %151 = vector.broadcast %150 : vector<32x1xf32> to vector<32x128xf32>
    %152 = arith.mulf %151, %147 : vector<32x128xf32>
    %153 = vector.broadcast %111 : vector<32x1xf32> to vector<32x128xf32>
    %154 = arith.addf %152, %153 : vector<32x128xf32>
    %c0_60 = arith.constant 0 : index
    %c8_61 = arith.constant 8 : index
    %155 = vector.load %arg10[%c0_60, %c8_61] : memref<32x144xf32, #tpu.memory_space<vmem>>, vector<32x128xf32>
    tpu.vector_store %arg10[%c0_60, %c8_61], %147 {strides = array<i32>} : memref<32x144xf32, #tpu.memory_space<vmem>>, vector<32x128xf32>,
    %156 = vector.extract_strided_slice %149 {offsets = [0, 0], sizes = [32, 1], strides = [1, 1]} : vector<32x3xf32> to vector<32x1xf32>
    %c0_62 = arith.constant 0 : index
    %c6 = arith.constant 6 : index
    %157 = vector.load %arg10[%c0_62, %c6] : memref<32x144xf32, #tpu.memory_space<vmem>>, vector<32x128xf32>
    %158 = vector.broadcast %156 : vector<32x1xf32> to vector<32x128xf32>
    %159 = arith.mulf %158, %157 : vector<32x128xf32>
    %160 = arith.addf %154, %159 : vector<32x128xf32>
    %161 = vector.extract_strided_slice %149 {offsets = [0, 2], sizes = [32, 1], strides = [1, 1]} : vector<32x3xf32> to vector<32x1xf32>
    %c0_63 = arith.constant 0 : index
    %c10 = arith.constant 10 : index
    %162 = vector.load %arg10[%c0_63, %c10] : memref<32x144xf32, #tpu.memory_space<vmem>>, vector<32x128xf32>
    %163 = vector.broadcast %161 : vector<32x1xf32> to vector<32x128xf32>
    %164 = arith.mulf %163, %162 : vector<32x128xf32>
    %165 = arith.addf %160, %164 : vector<32x128xf32>
    %c3 = arith.constant 3 : index
    %166 = memref.load %arg5[%c3] : memref<8xf32, #tpu.memory_space<smem>>
    %cst_64 = arith.constant 0.000000e+00 : f32
    %167 = vector.broadcast %cst_64 : f32 to vector<32x128xf32>
    %168 = arith.cmpf oge, %165, %167 : vector<32x128xf32>
    %169 = vector.broadcast %166 : f32 to vector<32x128xf32>
    %170 = arith.mulf %169, %165 : vector<32x128xf32>
    %171 = arith.select %168, %165, %170 : vector<32x128xi1>, vector<32x128xf32>
    %172 = vector.shape_cast %171 : vector<32x128xf32> to vector<1x32x128xf32>
    %cst_65 = arith.constant dense<0.000000e+00> : vector<1xf32>
    %173 = vector.multi_reduction <add>, %172, %cst_65 [1, 2] : vector<1x32x128xf32> to vector<1xf32>
    %174 = vector.shape_cast %173 : vector<1xf32> to vector<1x1x1xf32>
    %175 = vector.extract %174[0, 0, 0] : f32 from vector<1x1x1xf32>
    %cst_66 = arith.constant 2.44140625E-4 : f32
    %176 = arith.mulf %175, %cst_66 : f32
    %177 = vector.broadcast %176 : f32 to vector<32x128xf32>
    %178 = arith.subf %171, %177 : vector<32x128xf32>
    %179 = arith.mulf %178, %178 : vector<32x128xf32>
    %180 = vector.shape_cast %179 : vector<32x128xf32> to vector<1x32x128xf32>
    %cst_67 = arith.constant dense<0.000000e+00> : vector<1xf32>
    %181 = vector.multi_reduction <add>, %180, %cst_67 [1, 2] : vector<1x32x128xf32> to vector<1xf32>
    %182 = vector.shape_cast %181 : vector<1xf32> to vector<1x1x1xf32>
    %183 = vector.extract %182[0, 0, 0] : f32 from vector<1x1x1xf32>
    %cst_68 = arith.constant 2.44200259E-4 : f32
    %184 = arith.mulf %183, %cst_68 : f32
    %185 = math.sqrt %184 : f32
    %cst_69 = arith.constant 9.99999974E-6 : f32
    %186 = arith.addf %185, %cst_69 : f32
    %cst_70 = arith.constant 1.000000e+00 : f32
    %187 = arith.divf %cst_70, %186 : f32
    %188 = vector.broadcast %187 : f32 to vector<32x128xf32>
    %189 = arith.mulf %178, %188 : vector<32x128xf32>
    %190 = vector.broadcast %112 : vector<32x1xf32> to vector<32x128xf32>
    %191 = arith.mulf %190, %189 : vector<32x128xf32>
    %192 = vector.broadcast %113 : vector<32x1xf32> to vector<32x128xf32>
    %193 = arith.addf %191, %192 : vector<32x128xf32>
    %c1_71 = arith.constant 1 : index
    %c0_72 = arith.constant 0 : index
    %c0_73 = arith.constant 0 : index
    %194 = vector.load %arg7[%c1_71, %c0_72, %c0_73] : memref<4x16x32xbf16, #tpu.memory_space<vmem>>, vector<1x16x32xbf16>
    %195 = vector.shape_cast %194 : vector<1x16x32xbf16> to vector<16x32xbf16>
    %196 = arith.truncf %193 : vector<32x128xf32> to vector<32x128xbf16>
    %cst_74 = arith.constant dense<0.000000e+00> : vector<16x128xf32>
    %197 = tpu.matmul %195, %196, %cst_74 {dimension_numbers = #tpu.dot_dimension_numbers<[1], [0], [0], [1], [0, 0, 1, 1], [], []>} : vector<16x32xbf16>, vector<32x128xbf16>, vector<16x128xf32> -> vector<16x128xf32>
    %c1_75 = arith.constant 1 : index
    %c0_76 = arith.constant 0 : index
    %c0_77 = arith.constant 0 : index
    %198 = vector.load %arg8[%c1_75, %c0_76, %c0_77] : memref<4x16x1xf32, #tpu.memory_space<vmem>>, vector<1x16x1xf32>
    %199 = vector.shape_cast %198 : vector<1x16x1xf32> to vector<16x1xf32>
    %200 = vector.broadcast %199 : vector<16x1xf32> to vector<16x128xf32>
    %201 = arith.addf %197, %200 : vector<16x128xf32>
    %202 = arith.addf %201, %105 : vector<16x128xf32>
    %c2_78 = arith.constant 2 : index
    %c0_79 = arith.constant 0 : index
    %c0_80 = arith.constant 0 : index
    %203 = vector.load %arg4[%c2_78, %c0_79, %c0_80] : memref<4x32x8xf32, #tpu.memory_space<vmem>>, vector<1x32x8xf32>
    %204 = vector.shape_cast %203 : vector<1x32x8xf32> to vector<32x8xf32>
    %205 = vector.extract_strided_slice %204 {offsets = [0, 0], sizes = [32, 1], strides = [1, 1]} : vector<32x8xf32> to vector<32x1xf32>
    %206 = vector.extract_strided_slice %204 {offsets = [0, 1], sizes = [32, 1], strides = [1, 1]} : vector<32x8xf32> to vector<32x1xf32>
    %207 = vector.extract_strided_slice %204 {offsets = [0, 2], sizes = [32, 1], strides = [1, 1]} : vector<32x8xf32> to vector<32x1xf32>
    %208 = vector.extract_strided_slice %204 {offsets = [0, 3], sizes = [32, 1], strides = [1, 1]} : vector<32x8xf32> to vector<32x1xf32>
    %209 = vector.extract_strided_slice %204 {offsets = [0, 4], sizes = [32, 1], strides = [1, 1]} : vector<32x8xf32> to vector<32x1xf32>
    %210 = vector.extract_strided_slice %204 {offsets = [0, 5], sizes = [32, 1], strides = [1, 1]} : vector<32x8xf32> to vector<32x1xf32>
    %c2_81 = arith.constant 2 : index
    %c0_82 = arith.constant 0 : index
    %c0_83 = arith.constant 0 : index
    %211 = vector.load %arg3[%c2_81, %c0_82, %c0_83] : memref<4x32x16xbf16, #tpu.memory_space<vmem>>, vector<1x32x16xbf16>
    %212 = vector.shape_cast %211 : vector<1x32x16xbf16> to vector<32x16xbf16>
    %213 = arith.truncf %202 : vector<16x128xf32> to vector<16x128xbf16>
    %cst_84 = arith.constant dense<0.000000e+00> : vector<32x128xf32>
    %214 = tpu.matmul %212, %213, %cst_84 {dimension_numbers = #tpu.dot_dimension_numbers<[1], [0], [0], [1], [0, 0, 1, 1], [], []>} : vector<32x16xbf16>, vector<16x128xbf16>, vector<32x128xf32> -> vector<32x128xf32>
    %215 = vector.broadcast %205 : vector<32x1xf32> to vector<32x128xf32>
    %216 = arith.addf %214, %215 : vector<32x128xf32>
    %c4 = arith.constant 4 : index
    %217 = memref.load %arg5[%c4] : memref<8xf32, #tpu.memory_space<smem>>
    %cst_85 = arith.constant 0.000000e+00 : f32
    %218 = vector.broadcast %cst_85 : f32 to vector<32x128xf32>
    %219 = arith.cmpf oge, %216, %218 : vector<32x128xf32>
    %220 = vector.broadcast %217 : f32 to vector<32x128xf32>
    %221 = arith.mulf %220, %216 : vector<32x128xf32>
    %222 = arith.select %219, %216, %221 : vector<32x128xi1>, vector<32x128xf32>
    %223 = vector.shape_cast %222 : vector<32x128xf32> to vector<1x32x128xf32>
    %cst_86 = arith.constant dense<0.000000e+00> : vector<1xf32>
    %224 = vector.multi_reduction <add>, %223, %cst_86 [1, 2] : vector<1x32x128xf32> to vector<1xf32>
    %225 = vector.shape_cast %224 : vector<1xf32> to vector<1x1x1xf32>
    %226 = vector.extract %225[0, 0, 0] : f32 from vector<1x1x1xf32>
    %cst_87 = arith.constant 2.44140625E-4 : f32
    %227 = arith.mulf %226, %cst_87 : f32
    %228 = vector.broadcast %227 : f32 to vector<32x128xf32>
    %229 = arith.subf %222, %228 : vector<32x128xf32>
    %230 = arith.mulf %229, %229 : vector<32x128xf32>
    %231 = vector.shape_cast %230 : vector<32x128xf32> to vector<1x32x128xf32>
    %cst_88 = arith.constant dense<0.000000e+00> : vector<1xf32>
    %232 = vector.multi_reduction <add>, %231, %cst_88 [1, 2] : vector<1x32x128xf32> to vector<1xf32>
    %233 = vector.shape_cast %232 : vector<1xf32> to vector<1x1x1xf32>
    %234 = vector.extract %233[0, 0, 0] : f32 from vector<1x1x1xf32>
    %cst_89 = arith.constant 2.44200259E-4 : f32
    %235 = arith.mulf %234, %cst_89 : f32
    %236 = math.sqrt %235 : f32
    %cst_90 = arith.constant 9.99999974E-6 : f32
    %237 = arith.addf %236, %cst_90 : f32
    %cst_91 = arith.constant 1.000000e+00 : f32
    %238 = arith.divf %cst_91, %237 : f32
    %239 = vector.broadcast %238 : f32 to vector<32x128xf32>
    %240 = arith.mulf %229, %239 : vector<32x128xf32>
    %241 = vector.broadcast %206 : vector<32x1xf32> to vector<32x128xf32>
    %242 = arith.mulf %241, %240 : vector<32x128xf32>
    %243 = vector.broadcast %207 : vector<32x1xf32> to vector<32x128xf32>
    %244 = arith.addf %242, %243 : vector<32x128xf32>
    %c2_92 = arith.constant 2 : index
    %c0_93 = arith.constant 0 : index
    %c0_94 = arith.constant 0 : index
    %245 = vector.load %arg6[%c2_92, %c0_93, %c0_94] : memref<4x32x3xf32, #tpu.memory_space<vmem>>, vector<1x32x3xf32>
    %246 = vector.shape_cast %245 : vector<1x32x3xf32> to vector<32x3xf32>
    %247 = vector.extract_strided_slice %246 {offsets = [0, 1], sizes = [32, 1], strides = [1, 1]} : vector<32x3xf32> to vector<32x1xf32>
    %248 = vector.broadcast %247 : vector<32x1xf32> to vector<32x128xf32>
    %249 = arith.mulf %248, %244 : vector<32x128xf32>
    %250 = vector.broadcast %208 : vector<32x1xf32> to vector<32x128xf32>
    %251 = arith.addf %249, %250 : vector<32x128xf32>
    %c0_95 = arith.constant 0 : index
    %c8_96 = arith.constant 8 : index
    %252 = vector.load %arg10[%c0_95, %c8_96] : memref<32x144xf32, #tpu.memory_space<vmem>>, vector<32x128xf32>
    tpu.vector_store %arg10[%c0_95, %c8_96], %244 {strides = array<i32>} : memref<32x144xf32, #tpu.memory_space<vmem>>, vector<32x128xf32>,
    %253 = vector.extract_strided_slice %246 {offsets = [0, 0], sizes = [32, 1], strides = [1, 1]} : vector<32x3xf32> to vector<32x1xf32>
    %c0_97 = arith.constant 0 : index
    %c4_98 = arith.constant 4 : index
    %254 = vector.load %arg10[%c0_97, %c4_98] : memref<32x144xf32, #tpu.memory_space<vmem>>, vector<32x128xf32>
    %255 = vector.broadcast %253 : vector<32x1xf32> to vector<32x128xf32>
    %256 = arith.mulf %255, %254 : vector<32x128xf32>
    %257 = arith.addf %251, %256 : vector<32x128xf32>
    %258 = vector.extract_strided_slice %246 {offsets = [0, 2], sizes = [32, 1], strides = [1, 1]} : vector<32x3xf32> to vector<32x1xf32>
    %c0_99 = arith.constant 0 : index
    %c12 = arith.constant 12 : index
    %259 = vector.load %arg10[%c0_99, %c12] : memref<32x144xf32, #tpu.memory_space<vmem>>, vector<32x128xf32>
    %260 = vector.broadcast %258 : vector<32x1xf32> to vector<32x128xf32>
    %261 = arith.mulf %260, %259 : vector<32x128xf32>
    %262 = arith.addf %257, %261 : vector<32x128xf32>
    %c5 = arith.constant 5 : index
    %263 = memref.load %arg5[%c5] : memref<8xf32, #tpu.memory_space<smem>>
    %cst_100 = arith.constant 0.000000e+00 : f32
    %264 = vector.broadcast %cst_100 : f32 to vector<32x128xf32>
    %265 = arith.cmpf oge, %262, %264 : vector<32x128xf32>
    %266 = vector.broadcast %263 : f32 to vector<32x128xf32>
    %267 = arith.mulf %266, %262 : vector<32x128xf32>
    %268 = arith.select %265, %262, %267 : vector<32x128xi1>, vector<32x128xf32>
    %269 = vector.shape_cast %268 : vector<32x128xf32> to vector<1x32x128xf32>
    %cst_101 = arith.constant dense<0.000000e+00> : vector<1xf32>
    %270 = vector.multi_reduction <add>, %269, %cst_101 [1, 2] : vector<1x32x128xf32> to vector<1xf32>
    %271 = vector.shape_cast %270 : vector<1xf32> to vector<1x1x1xf32>
    %272 = vector.extract %271[0, 0, 0] : f32 from vector<1x1x1xf32>
    %cst_102 = arith.constant 2.44140625E-4 : f32
    %273 = arith.mulf %272, %cst_102 : f32
    %274 = vector.broadcast %273 : f32 to vector<32x128xf32>
    %275 = arith.subf %268, %274 : vector<32x128xf32>
    %276 = arith.mulf %275, %275 : vector<32x128xf32>
    %277 = vector.shape_cast %276 : vector<32x128xf32> to vector<1x32x128xf32>
    %cst_103 = arith.constant dense<0.000000e+00> : vector<1xf32>
    %278 = vector.multi_reduction <add>, %277, %cst_103 [1, 2] : vector<1x32x128xf32> to vector<1xf32>
    %279 = vector.shape_cast %278 : vector<1xf32> to vector<1x1x1xf32>
    %280 = vector.extract %279[0, 0, 0] : f32 from vector<1x1x1xf32>
    %cst_104 = arith.constant 2.44200259E-4 : f32
    %281 = arith.mulf %280, %cst_104 : f32
    %282 = math.sqrt %281 : f32
    %cst_105 = arith.constant 9.99999974E-6 : f32
    %283 = arith.addf %282, %cst_105 : f32
    %cst_106 = arith.constant 1.000000e+00 : f32
    %284 = arith.divf %cst_106, %283 : f32
    %285 = vector.broadcast %284 : f32 to vector<32x128xf32>
    %286 = arith.mulf %275, %285 : vector<32x128xf32>
    %287 = vector.broadcast %209 : vector<32x1xf32> to vector<32x128xf32>
    %288 = arith.mulf %287, %286 : vector<32x128xf32>
    %289 = vector.broadcast %210 : vector<32x1xf32> to vector<32x128xf32>
    %290 = arith.addf %288, %289 : vector<32x128xf32>
    %c2_107 = arith.constant 2 : index
    %c0_108 = arith.constant 0 : index
    %c0_109 = arith.constant 0 : index
    %291 = vector.load %arg7[%c2_107, %c0_108, %c0_109] : memref<4x16x32xbf16, #tpu.memory_space<vmem>>, vector<1x16x32xbf16>
    %292 = vector.shape_cast %291 : vector<1x16x32xbf16> to vector<16x32xbf16>
    %293 = arith.truncf %290 : vector<32x128xf32> to vector<32x128xbf16>
    %cst_110 = arith.constant dense<0.000000e+00> : vector<16x128xf32>
    %294 = tpu.matmul %292, %293, %cst_110 {dimension_numbers = #tpu.dot_dimension_numbers<[1], [0], [0], [1], [0, 0, 1, 1], [], []>} : vector<16x32xbf16>, vector<32x128xbf16>, vector<16x128xf32> -> vector<16x128xf32>
    %c2_111 = arith.constant 2 : index
    %c0_112 = arith.constant 0 : index
    %c0_113 = arith.constant 0 : index
    %295 = vector.load %arg8[%c2_111, %c0_112, %c0_113] : memref<4x16x1xf32, #tpu.memory_space<vmem>>, vector<1x16x1xf32>
    %296 = vector.shape_cast %295 : vector<1x16x1xf32> to vector<16x1xf32>
    %297 = vector.broadcast %296 : vector<16x1xf32> to vector<16x128xf32>
    %298 = arith.addf %294, %297 : vector<16x128xf32>
    %299 = arith.addf %298, %202 : vector<16x128xf32>
    %c3_114 = arith.constant 3 : index
    %c0_115 = arith.constant 0 : index
    %c0_116 = arith.constant 0 : index
    %300 = vector.load %arg4[%c3_114, %c0_115, %c0_116] : memref<4x32x8xf32, #tpu.memory_space<vmem>>, vector<1x32x8xf32>
    %301 = vector.shape_cast %300 : vector<1x32x8xf32> to vector<32x8xf32>
    %302 = vector.extract_strided_slice %301 {offsets = [0, 0], sizes = [32, 1], strides = [1, 1]} : vector<32x8xf32> to vector<32x1xf32>
    %303 = vector.extract_strided_slice %301 {offsets = [0, 1], sizes = [32, 1], strides = [1, 1]} : vector<32x8xf32> to vector<32x1xf32>
    %304 = vector.extract_strided_slice %301 {offsets = [0, 2], sizes = [32, 1], strides = [1, 1]} : vector<32x8xf32> to vector<32x1xf32>
    %305 = vector.extract_strided_slice %301 {offsets = [0, 3], sizes = [32, 1], strides = [1, 1]} : vector<32x8xf32> to vector<32x1xf32>
    %306 = vector.extract_strided_slice %301 {offsets = [0, 4], sizes = [32, 1], strides = [1, 1]} : vector<32x8xf32> to vector<32x1xf32>
    %307 = vector.extract_strided_slice %301 {offsets = [0, 5], sizes = [32, 1], strides = [1, 1]} : vector<32x8xf32> to vector<32x1xf32>
    %c3_117 = arith.constant 3 : index
    %c0_118 = arith.constant 0 : index
    %c0_119 = arith.constant 0 : index
    %308 = vector.load %arg3[%c3_117, %c0_118, %c0_119] : memref<4x32x16xbf16, #tpu.memory_space<vmem>>, vector<1x32x16xbf16>
    %309 = vector.shape_cast %308 : vector<1x32x16xbf16> to vector<32x16xbf16>
    %310 = arith.truncf %299 : vector<16x128xf32> to vector<16x128xbf16>
    %cst_120 = arith.constant dense<0.000000e+00> : vector<32x128xf32>
    %311 = tpu.matmul %309, %310, %cst_120 {dimension_numbers = #tpu.dot_dimension_numbers<[1], [0], [0], [1], [0, 0, 1, 1], [], []>} : vector<32x16xbf16>, vector<16x128xbf16>, vector<32x128xf32> -> vector<32x128xf32>
    %312 = vector.broadcast %302 : vector<32x1xf32> to vector<32x128xf32>
    %313 = arith.addf %311, %312 : vector<32x128xf32>
    %c6_121 = arith.constant 6 : index
    %314 = memref.load %arg5[%c6_121] : memref<8xf32, #tpu.memory_space<smem>>
    %cst_122 = arith.constant 0.000000e+00 : f32
    %315 = vector.broadcast %cst_122 : f32 to vector<32x128xf32>
    %316 = arith.cmpf oge, %313, %315 : vector<32x128xf32>
    %317 = vector.broadcast %314 : f32 to vector<32x128xf32>
    %318 = arith.mulf %317, %313 : vector<32x128xf32>
    %319 = arith.select %316, %313, %318 : vector<32x128xi1>, vector<32x128xf32>
    %320 = vector.shape_cast %319 : vector<32x128xf32> to vector<1x32x128xf32>
    %cst_123 = arith.constant dense<0.000000e+00> : vector<1xf32>
    %321 = vector.multi_reduction <add>, %320, %cst_123 [1, 2] : vector<1x32x128xf32> to vector<1xf32>
    %322 = vector.shape_cast %321 : vector<1xf32> to vector<1x1x1xf32>
    %323 = vector.extract %322[0, 0, 0] : f32 from vector<1x1x1xf32>
    %cst_124 = arith.constant 2.44140625E-4 : f32
    %324 = arith.mulf %323, %cst_124 : f32
    %325 = vector.broadcast %324 : f32 to vector<32x128xf32>
    %326 = arith.subf %319, %325 : vector<32x128xf32>
    %327 = arith.mulf %326, %326 : vector<32x128xf32>
    %328 = vector.shape_cast %327 : vector<32x128xf32> to vector<1x32x128xf32>
    %cst_125 = arith.constant dense<0.000000e+00> : vector<1xf32>
    %329 = vector.multi_reduction <add>, %328, %cst_125 [1, 2] : vector<1x32x128xf32> to vector<1xf32>
    %330 = vector.shape_cast %329 : vector<1xf32> to vector<1x1x1xf32>
    %331 = vector.extract %330[0, 0, 0] : f32 from vector<1x1x1xf32>
    %cst_126 = arith.constant 2.44200259E-4 : f32
    %332 = arith.mulf %331, %cst_126 : f32
    %333 = math.sqrt %332 : f32
    %cst_127 = arith.constant 9.99999974E-6 : f32
    %334 = arith.addf %333, %cst_127 : f32
    %cst_128 = arith.constant 1.000000e+00 : f32
    %335 = arith.divf %cst_128, %334 : f32
    %336 = vector.broadcast %335 : f32 to vector<32x128xf32>
    %337 = arith.mulf %326, %336 : vector<32x128xf32>
    %338 = vector.broadcast %303 : vector<32x1xf32> to vector<32x128xf32>
    %339 = arith.mulf %338, %337 : vector<32x128xf32>
    %340 = vector.broadcast %304 : vector<32x1xf32> to vector<32x128xf32>
    %341 = arith.addf %339, %340 : vector<32x128xf32>
    %c3_129 = arith.constant 3 : index
    %c0_130 = arith.constant 0 : index
    %c0_131 = arith.constant 0 : index
    %342 = vector.load %arg6[%c3_129, %c0_130, %c0_131] : memref<4x32x3xf32, #tpu.memory_space<vmem>>, vector<1x32x3xf32>
    %343 = vector.shape_cast %342 : vector<1x32x3xf32> to vector<32x3xf32>
    %344 = vector.extract_strided_slice %343 {offsets = [0, 1], sizes = [32, 1], strides = [1, 1]} : vector<32x3xf32> to vector<32x1xf32>
    %345 = vector.broadcast %344 : vector<32x1xf32> to vector<32x128xf32>
    %346 = arith.mulf %345, %341 : vector<32x128xf32>
    %347 = vector.broadcast %305 : vector<32x1xf32> to vector<32x128xf32>
    %348 = arith.addf %346, %347 : vector<32x128xf32>
    %c0_132 = arith.constant 0 : index
    %c8_133 = arith.constant 8 : index
    %349 = vector.load %arg10[%c0_132, %c8_133] : memref<32x144xf32, #tpu.memory_space<vmem>>, vector<32x128xf32>
    tpu.vector_store %arg10[%c0_132, %c8_133], %341 {strides = array<i32>} : memref<32x144xf32, #tpu.memory_space<vmem>>, vector<32x128xf32>,
    %350 = vector.extract_strided_slice %343 {offsets = [0, 0], sizes = [32, 1], strides = [1, 1]} : vector<32x3xf32> to vector<32x1xf32>
    %c0_134 = arith.constant 0 : index
    %c0_135 = arith.constant 0 : index
    %351 = vector.load %arg10[%c0_134, %c0_135] : memref<32x144xf32, #tpu.memory_space<vmem>>, vector<32x128xf32>
    %352 = vector.broadcast %350 : vector<32x1xf32> to vector<32x128xf32>
    %353 = arith.mulf %352, %351 : vector<32x128xf32>
    %354 = arith.addf %348, %353 : vector<32x128xf32>
    %355 = vector.extract_strided_slice %343 {offsets = [0, 2], sizes = [32, 1], strides = [1, 1]} : vector<32x3xf32> to vector<32x1xf32>
    %c0_136 = arith.constant 0 : index
    %c16 = arith.constant 16 : index
    %356 = vector.load %arg10[%c0_136, %c16] : memref<32x144xf32, #tpu.memory_space<vmem>>, vector<32x128xf32>
    %357 = vector.broadcast %355 : vector<32x1xf32> to vector<32x128xf32>
    %358 = arith.mulf %357, %356 : vector<32x128xf32>
    %359 = arith.addf %354, %358 : vector<32x128xf32>
    %c7_137 = arith.constant 7 : index
    %360 = memref.load %arg5[%c7_137] : memref<8xf32, #tpu.memory_space<smem>>
    %cst_138 = arith.constant 0.000000e+00 : f32
    %361 = vector.broadcast %cst_138 : f32 to vector<32x128xf32>
    %362 = arith.cmpf oge, %359, %361 : vector<32x128xf32>
    %363 = vector.broadcast %360 : f32 to vector<32x128xf32>
    %364 = arith.mulf %363, %359 : vector<32x128xf32>
    %365 = arith.select %362, %359, %364 : vector<32x128xi1>, vector<32x128xf32>
    %366 = vector.shape_cast %365 : vector<32x128xf32> to vector<1x32x128xf32>
    %cst_139 = arith.constant dense<0.000000e+00> : vector<1xf32>
    %367 = vector.multi_reduction <add>, %366, %cst_139 [1, 2] : vector<1x32x128xf32> to vector<1xf32>
    %368 = vector.shape_cast %367 : vector<1xf32> to vector<1x1x1xf32>
    %369 = vector.extract %368[0, 0, 0] : f32 from vector<1x1x1xf32>
    %cst_140 = arith.constant 2.44140625E-4 : f32
    %370 = arith.mulf %369, %cst_140 : f32
    %371 = vector.broadcast %370 : f32 to vector<32x128xf32>
    %372 = arith.subf %365, %371 : vector<32x128xf32>
    %373 = arith.mulf %372, %372 : vector<32x128xf32>
    %374 = vector.shape_cast %373 : vector<32x128xf32> to vector<1x32x128xf32>
    %cst_141 = arith.constant dense<0.000000e+00> : vector<1xf32>
    %375 = vector.multi_reduction <add>, %374, %cst_141 [1, 2] : vector<1x32x128xf32> to vector<1xf32>
    %376 = vector.shape_cast %375 : vector<1xf32> to vector<1x1x1xf32>
    %377 = vector.extract %376[0, 0, 0] : f32 from vector<1x1x1xf32>
    %cst_142 = arith.constant 2.44200259E-4 : f32
    %378 = arith.mulf %377, %cst_142 : f32
    %379 = math.sqrt %378 : f32
    %cst_143 = arith.constant 9.99999974E-6 : f32
    %380 = arith.addf %379, %cst_143 : f32
    %cst_144 = arith.constant 1.000000e+00 : f32
    %381 = arith.divf %cst_144, %380 : f32
    %382 = vector.broadcast %381 : f32 to vector<32x128xf32>
    %383 = arith.mulf %372, %382 : vector<32x128xf32>
    %384 = vector.broadcast %306 : vector<32x1xf32> to vector<32x128xf32>
    %385 = arith.mulf %384, %383 : vector<32x128xf32>
    %386 = vector.broadcast %307 : vector<32x1xf32> to vector<32x128xf32>
    %387 = arith.addf %385, %386 : vector<32x128xf32>
    %c3_145 = arith.constant 3 : index
    %c0_146 = arith.constant 0 : index
    %c0_147 = arith.constant 0 : index
    %388 = vector.load %arg7[%c3_145, %c0_146, %c0_147] : memref<4x16x32xbf16, #tpu.memory_space<vmem>>, vector<1x16x32xbf16>
    %389 = vector.shape_cast %388 : vector<1x16x32xbf16> to vector<16x32xbf16>
    %390 = arith.truncf %387 : vector<32x128xf32> to vector<32x128xbf16>
    %cst_148 = arith.constant dense<0.000000e+00> : vector<16x128xf32>
    %391 = tpu.matmul %389, %390, %cst_148 {dimension_numbers = #tpu.dot_dimension_numbers<[1], [0], [0], [1], [0, 0, 1, 1], [], []>} : vector<16x32xbf16>, vector<32x128xbf16>, vector<16x128xf32> -> vector<16x128xf32>
    %c3_149 = arith.constant 3 : index
    %c0_150 = arith.constant 0 : index
    %c0_151 = arith.constant 0 : index
    %392 = vector.load %arg8[%c3_149, %c0_150, %c0_151] : memref<4x16x1xf32, #tpu.memory_space<vmem>>, vector<1x16x1xf32>
    %393 = vector.shape_cast %392 : vector<1x16x1xf32> to vector<16x1xf32>
    %394 = vector.broadcast %393 : vector<16x1xf32> to vector<16x128xf32>
    %395 = arith.addf %391, %394 : vector<16x128xf32>
    %396 = arith.addf %395, %299 : vector<16x128xf32>
    %c0_152 = arith.constant 0 : index
    %c0_153 = arith.constant 0 : index
    %c0_154 = arith.constant 0 : index
    %397 = vector.load %arg9[%c0_152, %c0_153, %c0_154] : memref<1x16x128xf32, #tpu.memory_space<vmem>>, vector<1x16x128xf32>
    %398 = vector.shape_cast %397 : vector<1x16x128xf32> to vector<16x128xf32>
    %399 = vector.shape_cast %396 : vector<16x128xf32> to vector<1x16x128xf32>
    tpu.vector_store %arg9[%c0_152, %c0_153, %c0_154], %399 {strides = array<i32>} : memref<1x16x128xf32, #tpu.memory_space<vmem>>, vector<1x16x128xf32>,
    return
  }
  func.func @transform_0(%arg0: i32) -> (i32, i32, i32) {
    %c0_i32 = arith.constant 0 : i32
    %c0_i32_0 = arith.constant 0 : i32
    %c0_i32_1 = arith.constant 0 : i32
    return %arg0, %c0_i32, %c0_i32_0 : i32, i32, i32
  }
  func.func @transform_1(%arg0: i32) -> (i32, i32, i32) {
    %c0_i32 = arith.constant 0 : i32
    %c0_i32_0 = arith.constant 0 : i32
    %c0_i32_1 = arith.constant 0 : i32
    return %arg0, %c0_i32, %c0_i32_0 : i32, i32, i32
  }
  func.func @transform_2(%arg0: i32) -> (i32, i32, i32) {
    %c0_i32 = arith.constant 0 : i32
    %c0_i32_0 = arith.constant 0 : i32
    %c0_i32_1 = arith.constant 0 : i32
    %c0_i32_2 = arith.constant 0 : i32
    return %c0_i32, %c0_i32_0, %c0_i32_1 : i32, i32, i32
  }
  func.func @transform_3(%arg0: i32) -> (i32, i32, i32) {
    %c0_i32 = arith.constant 0 : i32
    %c0_i32_0 = arith.constant 0 : i32
    %c0_i32_1 = arith.constant 0 : i32
    %c0_i32_2 = arith.constant 0 : i32
    return %c0_i32, %c0_i32_0, %c0_i32_1 : i32, i32, i32
  }
  func.func @transform_4(%arg0: i32) -> i32 {
    %c0_i32 = arith.constant 0 : i32
    %c0_i32_0 = arith.constant 0 : i32
    return %c0_i32 : i32
  }
  func.func @transform_5(%arg0: i32) -> (i32, i32, i32) {
    %c0_i32 = arith.constant 0 : i32
    %c0_i32_0 = arith.constant 0 : i32
    %c0_i32_1 = arith.constant 0 : i32
    %c0_i32_2 = arith.constant 0 : i32
    return %c0_i32, %c0_i32_0, %c0_i32_1 : i32, i32, i32
  }
  func.func @transform_6(%arg0: i32) -> (i32, i32, i32) {
    %c0_i32 = arith.constant 0 : i32
    %c0_i32_0 = arith.constant 0 : i32
    %c0_i32_1 = arith.constant 0 : i32
    %c0_i32_2 = arith.constant 0 : i32
    return %c0_i32, %c0_i32_0, %c0_i32_1 : i32, i32, i32
  }
  func.func @transform_7(%arg0: i32) -> (i32, i32, i32) {
    %c0_i32 = arith.constant 0 : i32
    %c0_i32_0 = arith.constant 0 : i32
    %c0_i32_1 = arith.constant 0 : i32
    %c0_i32_2 = arith.constant 0 : i32
    return %c0_i32, %c0_i32_0, %c0_i32_1 : i32, i32, i32
  }
  func.func @transform_8(%arg0: i32) -> (i32, i32, i32) {
    %c0_i32 = arith.constant 0 : i32
    %c0_i32_0 = arith.constant 0 : i32
    %c0_i32_1 = arith.constant 0 : i32
    return %arg0, %c0_i32, %c0_i32_0 : i32, i32, i32
  }
}

</mosaic_0001>

<bundles_post_ra>
// kernel: stacked_tcns_forward.1
= control target key start
LH: loop header
LB: loop body
LE: loop exit
PB: predicated region body
PF: predicated region fallthrough
CT: control target
= control target key end

     0   :  { %13 = vsyncpa [#allocation5], 0  ;;  %s4219_s0 = inlined_call_operand.vmem [shape: f32[2,16,128], index: 0, kind: input, shape index: {}]   ;;  %s4220_s1 = inlined_call_operand.vmem [shape: f32[2,32,1], index: 1, kind: input, shape index: {}]   ;;  %s4221_s2 = inlined_call_operand.vmem [shape: bf16[4,32,16], index: 2, kind: input, shape index: {}]   ;;  %s4222_s3 = inlined_call_operand.vmem [shape: f32[4,32,8], index: 3, kind: input, shape index: {}]   ;;  %s4223_s4 = inlined_call_operand.vmem [shape: f32[8], index: 4, kind: input, shape index: {}]   ;;  %s4224_s5 = inlined_call_operand.vmem [shape: f32[4,32,3], index: 5, kind: input, shape index: {}]   ;;  %s4225_s6 = inlined_call_operand.vmem [shape: bf16[4,16,32], index: 6, kind: input, shape index: {}]   ;;  %s4226_s7 = inlined_call_operand.vmem [shape: f32[4,16,1], index: 7, kind: input, shape index: {}]   ;;  %s4227_s8 = inlined_call_operand.hbm [shape: f32[2,16,128], index: 8, kind: output, shape index: {}]  }
   0x1   :  { %14 = vsyncpa [#allocation4], 0 }
   0x2   :  { %16 = vsyncpa [#allocation4 + $0x1], 0  ;;  %s3368_s27 = smov 0   ;;  %s3370_s28 = smov 0  }
   0x3   :  { %s3372_s29 = smov 0   ;;  %s3374_s30 = smov 0  }
   0x4 LB: > { %s3389_s9 = sadd.s32 4294967295, %s3302_s30   ;;  %s2774_s10 = sadd.s32 4294967294, %s3302_s30   ;;  %s3302_s30 = sphi %s3374_s30, %s4234_s30   ;;  %s3298_s29 = sphi %s3372_s29, %s4233_s29   ;;  %s3294_s28 = sphi %s3370_s28, %s4232_s28   ;;  %s3290_s27 = sphi %s3368_s27, %s4231_s27  }
   0x5   : > { %s3393_s11 = sadd.s32 1, %s3302_s30   ;;  %s207_s12 = sadd.s32 1, %s3298_s29 }
   0x6   : > { %s204_s13 = ssub.s32 %s3302_s30, %s3393_s11  ;;  %p217_p0 = scmp.ne.s32.totalorder %s3298_s29, %s3294_s28 }
   0x7   : > { %p205_p1 = scmp.eq.s32.totalorder %s204_s13, 0  ;;  %p218_p2 = scmp.eq.s32.totalorder %s3389_s9, 1 }
   0x8   : > { %p223_p3 = scmp.ne.s32.totalorder %s3294_s28, %s3290_s27  ;;  %p224_p4 = scmp.eq.s32.totalorder %s2774_s10, 1 }
   0x9   : > { %s3404_s14 = scalar_select %p205_p1, %s3298_s29, %s207_s12  }
   0xa   : > { %p3406_p5 = por %p218_p2, %p217_p0  ;;  %p3410_p6 = por %p224_p4, %p223_p3 }
   0xb   : > { %p2775_p7 = scmp.ge.s32.totalorder %s3302_s30, 1  ;;  %p231_p8 = scmp.lt.s32.totalorder %s3302_s30, 3 }
   0xc   : > { %p3030_p9 = scmp.eq.s32.totalorder %s3389_s9, 0  ;;  %s250_s20 = sshll.u32 %s4223_s4, 4  ;;  %s251_s20 = int_to_ptr.vmem [resolvable:$true] %s250_s20 }
   0xd   : > { %p3417_p10 = pnand %p2775_p7, %p231_p8  ;;  %s3221_s21 = scalar_lea.vmem %s251_s20, 16 }
   0xe   : > { %p3222_p13 = scmp.ne.s32.totalorder %s251_s20, %s3221_s21  ;;  %p3229_p3 = scmp.lt.s32.totalorder %s251_s20, %s251_s20 }
   0xf   : > { %p3022_p11 = pneg %p3417_p10  ;;  %p3230_p4 = scmp.lt.s32.totalorder %s3221_s21, %s3221_s21 }
  0x11   : > { %p3023_p12 = pnand %p3030_p9, %p3022_p11  ;;  %p3231_p7 = por %p3230_p4, %p3229_p3 }
  0x13   : > { %p3223_p0 = pneg %p3023_p12 }
  0x15   : > { %p3224_p1 = pnand %p3223_p0, %p3222_p13 }
  0x17   : > { %p3225_p2 = pneg %p3224_p1 }
  0x19   : > { %p3232_p8 = pnand %p3231_p7, %p3225_p2 }
  0x1b   : > { %3235 = shalt.err (!%p3232_p8)
}
  0x1c   : > { %s3304_s22 = smov [#allocation3]   ;;  %288 = sbr.rel (%p3417_p10) target bundleno = 7504 (0x1d50), region = 52 }
  0x1d   : > { %3025 = dma.vmem_to_smem (!%p3023_p12), %s251_s20, 16, %s3304_s22, [#allocation5]  }
  0x23   : > { %3281 = dma.done.wait (%p3030_p9), [#allocation5], 16  }
  0x24   : > { %3283 = vsyncadd (%p3030_p9), [#allocation5], 4294967280 }
  0x25   : > { %294 = sfence }
  0x26   : > { %p328_p11 = scmp.lt.s32.totalorder %s3389_s9, 1  ;;  %v3177_v0 = vld [vmem:[%s4221_s2] sm:$0xff]   ;;  %vm394_vm0 = vcmask 130048   ;;  %v3448_v2 = vld [vmem:[%s4222_s3 + $0x10] sm:$0xff]  ;;  %v3305_v3 = vmov 0   ;;  %v3455_v4 = vld [vmem:[%s4222_s3 + $0x8] sm:$0xff] }
  0x27   : > { %2898 = vmatprep.mubr.msk.bf16.mxu0 %vm394_vm0, %v3177_v0  ;;  %v3443_v1 = vld [vmem:[%s4222_s3] sm:$0xff]  ;;  %3083 = vset.pattern.permute.xlu0 %v3305_v3  ;;  %v3178_v9 = vld [vmem:[%s4221_s2 + $0x8] sm:$0xff]   ;;  %v3477_v11 = vld [vmem:[%s4222_s3 + $0x18] sm:$0xff]  ;;  %s474_s18 = sld [smem:[#allocation3]]  ;;  %vm339_vm7 = vcmask 64512   ;;  %vm344_vm8 = vcmask 130112  }
  0x28   : > { %s329_s25 = scalar_select %p328_p11, %s3389_s9, 1  ;;  %3084 = vset.pattern.permute.xlu1 %v3305_v3  ;;  %366 = vperm.xlu0 %3083, %v3443_v1   ;;  %vm645_vm9 = vcmask 1047616   ;;  %vm710_vm10 = vcmask 990208   ;;  %vm771_vm11 = vcmask 973824  }
  0x29   : > { %376 = vperm.xlu1 %3084, %v3448_v2   ;;  %s3309_s21 = smov 8   ;;  %s3311_s22 = smov 121  }
  0x2a   : > { %s2869_s19 = sshll.u32 %s329_s25, 4  ;;  %s2870_s20 = sshll.u32 %s329_s25, 5 }
  0x2b   : > { %s332_s23 = scalar_lea.vmem %s4219_s0, %s2869_s19  ;;  %s337_s10 = scalar_lea.vmem %s4220_s1, %s2870_s20 }
  0x2c   : > { %v3465_v5 = vld [vmem:[%s332_s23] sm:$0xff]  ;;  %v3467_v6 = vld [vmem:[%s332_s23 + $0x8] sm:$0xff]  ;;  %371 = vperm.xlu0 %3083, %v3455_v4   ;;  %v353_v12 = vld [vmem:[%s337_s10 + $0x10] sm:$0xff]  ;;  %s3312_s23 = smov 119   ;;  %s2789_s24 = sld [smem:[#allocation3 + $0x1]] }
  0x2d   : > { %v351_v7 = vld [vmem:[%s337_s10] sm:$0xff]  ;;  %v363_v8 = vpack.c.bf16 %v3467_v6, %v3465_v5  ;;  %v352_v10 = vld [vmem:[%s337_s10 + $0x8] sm:$0xff]  ;;  %v354_v13 = vld [vmem:[%s337_s10 + $0x18] sm:$0xff]  ;;  %v479_v26 = vstv %s474_s18 }
  0x2e   : > { %452 = vperm.xlu1 %3084, %v351_v7   ;;  %v3306_v7 = vmov 1  }
  0x2f   : > { %2896 = vmatprep.subr.bf16.mxu0 %v363_v8 }
  0x30   : > { %2897 = vmatpush3.bf16.msra.mxu0 %v363_v8  ;;  %457 = vperm.xlu0 %3083, %v352_v10   ;;  %v3307_v8 = vmov 2  }
  0x32   : > { %381 = vperm.xlu1 %3084, %v3477_v11  }
  0x33   : > { %2899 = vmatmul.mubr.msk.bf16.vlgmr.msra.gmra.mrb[0].mxu0 %vm394_vm0, %v3178_v9 }
  0x34   : > { %462 = vperm.xlu0 %3083, %v353_v12  }
  0x36   : > { %467 = vperm.xlu1 %3084, %v354_v13  }
  0x38   : > { %3085 = vset.pattern.permute.xlu0 %v3306_v7 }
  0x3a   : > { %3086 = vset.pattern.permute.xlu1 %v3306_v7 }
  0xa7   : > { %v367_v14 = vpop.permute.xlu0 %366 }
  0xa8   : > { %v377_v15 = vpop.permute.xlu1 %376 }
  0xab   : > { %v372_v16 = vpop.permute.xlu0 %371 }
  0xad   : > { %v453_v17 = vpop.permute.xlu1 %452 }
  0xaf   : > { %v458_v18 = vpop.permute.xlu0 %457 }
  0xb1   : > { %v382_v19 = vpop.permute.xlu1 %381 }
  0xb3   : > { %v463_v25 = vpop.permute.xlu0 %462 }
  0xb5   : > { %v468_v32 = vpop.permute.xlu1 %467 }
 0x106   : > { %v2900_v20 = vpop.f32.mrb[0].mxu0 }
 0x107   : > { %v444_v21 = vadd.f32 %v2900_v20, %v377_v15  ;;  %v435_v22 = vpop.f32.mrb[1].mxu0  ;;  %v3536_v20 = vld [vmem:[%s4224_s5 + $0x18] sm:$0xff] }
 0x108   : > { %v436_v23 = vadd.f32 %v435_v22, %v367_v14  ;;  %v2901_v24 = vpop.f32.mrb[2].mxu0 }
 0x109   : > { %v447_v27 = vadd.f32 %v2901_v24, %v382_v19  ;;  %v438_v28 = vpop.f32.mrb[3].mxu0  ;;  %v472_v29 = vadd.f32 %v463_v25, %v444_v21  ;;  %v3528_v19 = vld [vmem:[%s4224_s5 + $0x10] sm:$0xff] }
 0x10a   : > { %v470_v30 = vadd.f32 %v453_v17, %v436_v23  ;;  %v439_v31 = vadd.f32 %v438_v28, %v372_v16  ;;  %v3516_v17 = vld [vmem:[%s4224_s5 + $0x8] sm:$0xff] }
 0x10b   : > { %v473_v34 = vadd.f32 %v468_v32, %v447_v27  ;;  %v482_v36 = vmul.f32 %v479_v26, %v472_v29  ;;  %vm477_vm3 = vcmp.ge.f32.partialorder %v472_v29, 0.0  ;;  %v3308_v27 = vmov 0.0  }
 0x10c   : > { %v480_v33 = vmul.f32 %v479_v26, %v470_v30  ;;  %v471_v35 = vadd.f32 %v458_v18, %v439_v31  ;;  %vm475_vm1 = vcmp.ge.f32.partialorder %v470_v30, 0.0  ;;  %v3521_v18 = vld [vmem:[%s4224_s5] sm:$0xff]  ;;  %341 = vst.msk [vmem:[#allocation2 + $0x10] sm:$0xff] %vm339_vm7, %v3308_v27  ;;  %340 = vst.msk [vmem:[#allocation2] sm:$0xff] %vm339_vm7, %v3308_v27  ;;  %2902 = vmatprep.subr.bf16.mxu1 %v3308_v27 }
 0x10d   : > { %v483_v38 = vmul.f32 %v479_v26, %v473_v34  ;;  %vm478_vm4 = vcmp.ge.f32.partialorder %v473_v34, 0.0  ;;  %v486_v42 = vsel %vm477_vm3, %v472_v29, %v482_v36  ;;  %346 = vst.msk [vmem:[#allocation2 + $0x18] sm:$0xff] %vm344_vm8, %v3308_v27  ;;  %345 = vst.msk [vmem:[#allocation2 + $0x8] sm:$0xff] %vm344_vm8, %v3308_v27  ;;  %vm3315_vm3 = vmmov 0  }
 0x10e   : > { %vm476_vm2 = vcmp.ge.f32.partialorder %v471_v35, 0.0  ;;  %v481_v37 = vmul.f32 %v479_v26, %v471_v35  ;;  %v484_v39 = vsel %vm475_vm1, %v470_v30, %v480_v33  ;;  %342 = vst.msk [vmem:[#allocation2 + $0x20] sm:$0xff] %vm339_vm7, %v3308_v27  ;;  %343 = vst.msk [vmem:[#allocation2 + $0x30] sm:$0xff] %vm339_vm7, %v3308_v27  ;;  %2906 = vmatprep.mubr.msk.bf16.mxu1 %vm3315_vm3, %v3308_v27 }
 0x10f   : > { %v487_v44 = vsel %vm478_vm4, %v473_v34, %v483_v38  ;;  %347 = vst.msk [vmem:[#allocation2 + $0x28] sm:$0xff] %vm344_vm8, %v3308_v27  ;;  %348 = vst.msk [vmem:[#allocation2 + $0x38] sm:$0xff] %vm344_vm8, %v3308_v27  ;;  %vm912_vm4 = vcmask 261120  }
 0x110   : > { %v485_v40 = vsel %vm476_vm2, %v471_v35, %v481_v37 }
 0x111   : > { %v488_v41 = vadd.f32 %v485_v40, %v484_v39 }
 0x113   : > { %v489_v43 = vadd.f32 %v488_v41, %v486_v42 }
 0x115   : > { %v490_v45 = vadd.f32 %v489_v43, %v487_v44 }
 0x117   : > { %491 = vadd.xlane.f32.xlu0 %v490_v45 }
 0x12d   : > { %542 = vperm.xlu0 %3085, %v3443_v1  }
 0x131   : > { %3090 = vset.pattern.permute.xlu0 %v3305_v3 }
 0x132   : > { %663 = vperm.xlu0 %3090, %v3521_v18  }
 0x136   : > { %671 = vperm.xlu0 %3090, %v3528_v19  }
 0x13a   : > { %3093 = vset.pattern.permute.xlu0 %v3307_v8 }
 0x1a4   : > { %v492_v46 = vpop.xlane.xlu0 %491 }
 0x1a5   : > { %v493_v47 = vrot.slane %v492_v46, 4 }
 0x1a7   : > { %v494_v48 = vadd.f32 %v493_v47, %v492_v46 }
 0x1a9   : > { %v495_v49 = vrot.slane %v494_v48, 2 }
 0x1ab   : > { %v496_v50 = vadd.f32 %v495_v49, %v494_v48 }
 0x1ac   : > { %v543_v36 = vpop.permute.xlu0 %542 }
 0x1ad   : > { %v497_v51 = vrot.slane %v496_v50, 1 }
 0x1af   : > { %v498_v52 = vadd.f32 %v497_v51, %v496_v50  ;;  %v3310_v51 = vmov 3  }
 0x1b1   : > { %2952 = vpush %v498_v52 }
 0x1e2   : > { %s2953_s19 = spop %2952 }
 0x1e3   : > { %s500_s20 = smul.f32 0.00024414063, %s2953_s19 }
 0x1e5   : > { %v501_v53 = vstv %s500_s20 }
 0x1e6   : > { %v3482_v54 = vsub.f32 %v484_v39, %v501_v53  ;;  %v3484_v55 = vsub.f32 %v485_v40, %v501_v53  ;;  %v3486_v56 = vsub.f32 %v486_v42, %v501_v53  ;;  %v3488_v57 = vsub.f32 %v487_v44, %v501_v53 }
 0x1e8   : > { %v506_v58 = vmul.f32 %v3482_v54, %v3482_v54  ;;  %v507_v59 = vmul.f32 %v3484_v55, %v3484_v55  ;;  %v508_v60 = vmul.f32 %v3486_v56, %v3486_v56  ;;  %v509_v62 = vmul.f32 %v3488_v57, %v3488_v57 }
 0x1ea   : > { %v510_v61 = vadd.f32 %v507_v59, %v506_v58 }
 0x1ec   : > { %v511_v63 = vadd.f32 %v510_v61, %v508_v60 }
 0x1ee   : > { %v512_v0 = vadd.f32 %v511_v63, %v509_v62 }
 0x1f0   : > { %513 = vadd.xlane.f32.xlu1 %v512_v0 }
 0x201   : > { %546 = vperm.xlu1 %3086, %v3455_v4  }
 0x205   : > { %550 = vperm.xlu1 %3086, %v3448_v2  }
 0x209   : > { %3087 = vset.pattern.permute.xlu1 %v3307_v8 }
 0x20a   : > { %562 = vperm.xlu1 %3087, %v3443_v1  }
 0x20e   : > { %566 = vperm.xlu1 %3087, %v3455_v4  }
 0x212   : > { %3088 = vset.pattern.permute.xlu1 %v3306_v7 }
 0x213   : > { %554 = vperm.xlu1 %3088, %v3477_v11  }
 0x217   : > { %3089 = vset.pattern.permute.xlu1 %v3307_v8 }
 0x218   : > { %570 = vperm.xlu1 %3089, %v3448_v2  }
 0x21c   : > { %574 = vperm.xlu1 %3089, %v3477_v11  }
 0x220   : > { %3091 = vset.pattern.permute.xlu1 %v3305_v3 }
 0x221   : > { %667 = vperm.xlu1 %3091, %v3516_v17  }
 0x225   : > { %3092 = vset.pattern.permute.xlu1 %v3307_v8 }
 0x226   : > { %724 = vperm.xlu1 %3092, %v3521_v18  }
 0x22a   : > { %3094 = vset.pattern.permute.xlu1 %v3305_v3 }
 0x22b   : > { %675 = vperm.xlu1 %3094, %v3536_v20  }
 0x22f   : > { %3095 = vset.pattern.permute.xlu1 %v3307_v8 }
 0x27d   : > { %v514_v9 = vpop.xlane.xlu1 %513 }
 0x27e   : > { %v515_v10 = vrot.slane %v514_v9, 4 }
 0x280   : > { %v516_v12 = vadd.f32 %v515_v10, %v514_v9 }
 0x281   : > { %v547_v30 = vpop.permute.xlu1 %546 }
 0x282   : > { %v517_v13 = vrot.slane %v516_v12, 2 }
 0x284   : > { %v518_v14 = vadd.f32 %v517_v13, %v516_v12 }
 0x285   : > { %v551_v31 = vpop.permute.xlu1 %550 }
 0x286   : > { %v519_v15 = vrot.slane %v518_v14, 1 }
 0x288   : > { %v520_v16 = vadd.f32 %v519_v15, %v518_v14 }
 0x289   : > { %v563_v32 = vpop.permute.xlu1 %562 }
 0x28a   : > { %2954 = vpush %v520_v16 }
 0x28d   : > { %v567_v33 = vpop.permute.xlu1 %566 }
 0x292   : > { %v555_v34 = vpop.permute.xlu1 %554 }
 0x297   : > { %v571_v42 = vpop.permute.xlu1 %570 }
 0x29b   : > { %v575_v49 = vpop.permute.xlu1 %574 }
 0x2a0   : > { %v668_v52 = vpop.permute.xlu1 %667 }
 0x2a5   : > { %v725_v53 = vpop.permute.xlu1 %724 }
 0x2bb   : > { %s2955_s25 = spop %2954 }
 0x2bc   : > { %s522_s17 = smul.f32 0.00024420026, %s2955_s25 }
 0x2be   : > { %v523_v21 = vstv %s522_s17  ;;  %s3316_s17 = smov 122  }
 0x2bf   : > { %3189 = vrsqrt.f32 %v523_v21  ;;  %vm526_vm5 = vcmp.eq.f32.partialorder %v523_v21, inf  ;;  %v529_v24 = vand.u32 2147483648, %v523_v21  ;;  %vm528_vm6 = vcmp.eq.f32.partialorder %v523_v21, 0.0 }
 0x2c9   : > { %v3190_v22 = vpop.eup %3189 }
 0x2ca   : > { %v525_v23 = vmul.f32 %v3190_v22, %v523_v21 }
 0x2cc   : > { %v527_v25 = vsel %vm526_vm5, %v523_v21, %v525_v23 }
 0x2cd   : > { %v530_v26 = vsel %vm528_vm6, %v529_v24, %v527_v25 }
 0x2ce   : > { %2956 = vpush %v530_v26 }
 0x2ff   : > { %s2957_s18 = spop %2956 }
 0x300   : > { %s532_s19 = sadd.f32 1e-05, %s2957_s18  ;;  %s3317_s18 = smov 118  }
 0x302   : > { %v533_v28 = vstv %s532_s19  ;;  %s2809_s19 = sld [smem:[#allocation3 + $0x3]] }
 0x303   : > { %3191 = vrcp.f32 %v533_v28 }
 0x30d   : > { %v3192_v29 = vpop.eup %3191 }
 0x30e   : > { %2958 = vpush %v3192_v29 }
 0x33f   : > { %s2959_s20 = spop %2958 }
 0x340   : > { %v536_v35 = vstv %s2959_s20 }
 0x341   : > { %v538_v37 = vmul.f32 %v536_v35, %v3484_v55  ;;  %v539_v38 = vmul.f32 %v536_v35, %v3486_v56  ;;  %v537_v39 = vmul.f32 %v536_v35, %v3482_v54  ;;  %v540_v43 = vmul.f32 %v536_v35, %v3488_v57  ;;  %v664_v54 = vpop.permute.xlu0 %663  ;;  %v676_v55 = vpop.permute.xlu1 %675 }
 0x343   : > { %v557_v40 = vmul.f32 %v543_v36, %v537_v39  ;;  %v558_v41 = vmul.f32 %v547_v30, %v538_v37  ;;  %v559_v44 = vmul.f32 %v551_v31, %v539_v38  ;;  %v560_v48 = vmul.f32 %v555_v34, %v540_v43 }
 0x345   : > { %v3559_v45 = vadd.f32 %v563_v32, %v557_v40  ;;  %v3561_v46 = vadd.f32 %v567_v33, %v558_v41  ;;  %v3567_v47 = vadd.f32 %v571_v42, %v559_v44  ;;  %v3572_v50 = vadd.f32 %v575_v49, %v560_v48  ;;  %v672_v56 = vpop.permute.xlu0 %671 }
 0x347   : > { %635 = vrot.lane.b32.xlu1 %v3561_v46, %s3309_s21  ;;  %633 = vrot.lane.b32.xlu0 %v3559_v45, %s3309_s21 }
 0x34b   : > { %637 = vrot.lane.b32.xlu1 %v3567_v47, %s3309_s21  ;;  %728 = vperm.xlu0 %3093, %v3516_v17  }
 0x34f   : > { %639 = vrot.lane.b32.xlu1 %v3572_v50, %s3309_s21  ;;  %732 = vperm.xlu0 %3093, %v3528_v19  }
 0x353   : > { %736 = vperm.xlu1 %3095, %v3536_v20   ;;  %3096 = vset.pattern.permute.xlu0 %v3306_v7 }
 0x354   : > { %587 = vperm.xlu0 %3096, %v3521_v18  }
 0x357   : > { %3097 = vset.pattern.permute.xlu1 %v3306_v7 }
 0x358   : > { %592 = vperm.xlu1 %3097, %v3516_v17   ;;  %3098 = vset.pattern.permute.xlu0 %v3310_v51 }
 0x359   : > { %610 = vperm.xlu0 %3098, %v3443_v1  }
 0x35c   : > { %597 = vperm.xlu1 %3097, %v3528_v19  }
 0x35d   : > { %618 = vperm.xlu0 %3098, %v3448_v2  }
 0x360   : > { %3099 = vset.pattern.permute.xlu1 %v3310_v51 }
 0x361   : > { %614 = vperm.xlu1 %3099, %v3455_v4  }
 0x365   : > { %3100 = vset.pattern.permute.xlu1 %v3306_v7 }
 0x366   : > { %602 = vperm.xlu1 %3100, %v3536_v20  }
 0x36a   : > { %3101 = vset.pattern.permute.xlu1 %v3310_v51 }
 0x36b   : > { %622 = vperm.xlu1 %3101, %v3477_v11  }
 0x3b9   : > { %v636_v57 = vpop.permute.xlu1 %635  ;;  %v634_v58 = vpop.permute.xlu0 %633 }
 0x3ba   : > { %648 = vst.msk [vmem:[#allocation2 + $0x10] sm:$0xff] %vm645_vm9, %v636_v57  ;;  %646 = vst.msk [vmem:[#allocation2] sm:$0xff] %vm645_vm9, %v634_v58 }
 0x3bb   : > { %649 = vst.msk [vmem:[#allocation2 + $0x18] sm:$0xff] %vm339_vm7, %v636_v57  ;;  %647 = vst.msk [vmem:[#allocation2 + $0x8] sm:$0xff] %vm339_vm7, %v634_v58 }
 0x3bd   : > { %v638_v59 = vpop.permute.xlu1 %637 }
 0x3be   : > { %650 = vst.msk [vmem:[#allocation2 + $0x20] sm:$0xff] %vm645_vm9, %v638_v59 }
 0x3bf   : > { %651 = vst.msk [vmem:[#allocation2 + $0x28] sm:$0xff] %vm339_vm7, %v638_v59 }
 0x3c1   : > { %v640_v60 = vpop.permute.xlu1 %639  ;;  %v654_v62 = vld [vmem:[#allocation2] sm:$0xff]  ;;  %v656_v10 = vld [vmem:[#allocation2 + $0x10] sm:$0xff] }
 0x3c2   : > { %v655_v61 = vld [vmem:[#allocation2 + $0x8] sm:$0xff]  ;;  %652 = vst.msk [vmem:[#allocation2 + $0x30] sm:$0xff] %vm645_vm9, %v640_v60  ;;  %v678_v0 = vmul.f32 %v664_v54, %v654_v62  ;;  %v657_v9 = vld [vmem:[#allocation2 + $0x18] sm:$0xff]  ;;  %v680_v13 = vmul.f32 %v668_v52, %v656_v10  ;;  %v739_v19 = vmul.f32 %v725_v53, %v654_v62 }
 0x3c3   : > { %653 = vst.msk [vmem:[#allocation2 + $0x38] sm:$0xff] %vm339_vm7, %v640_v60  ;;  %v679_v63 = vmul.f32 %v664_v54, %v655_v61  ;;  %v681_v12 = vmul.f32 %v668_v52, %v657_v9  ;;  %v740_v18 = vmul.f32 %v725_v53, %v655_v61 }
 0x3c4   : > { %694 = vrot.lane.b32.xlu0 %v678_v0, %s3311_s22 }
 0x3c5   : > { %696 = vrot.lane.b32.xlu1 %v679_v63, %s3311_s22  ;;  %v658_v15 = vld [vmem:[#allocation2 + $0x20] sm:$0xff] }
 0x3c6   : > { %v659_v14 = vld [vmem:[#allocation2 + $0x28] sm:$0xff]  ;;  %v682_v17 = vmul.f32 %v672_v56, %v658_v15 }
 0x3c7   : > { %v683_v16 = vmul.f32 %v672_v56, %v659_v14 }
 0x3c8   : > { %698 = vrot.lane.b32.xlu0 %v680_v13, %s3311_s22 }
 0x3c9   : > { %700 = vrot.lane.b32.xlu1 %v681_v12, %s3311_s22  ;;  %v660_v23 = vld [vmem:[#allocation2 + $0x30] sm:$0xff] }
 0x3ca   : > { %v729_v20 = vpop.permute.xlu0 %728  ;;  %v661_v24 = vld [vmem:[#allocation2 + $0x38] sm:$0xff]  ;;  %v684_v26 = vmul.f32 %v676_v55, %v660_v23 }
 0x3cb   : > { %v741_v21 = vmul.f32 %v729_v20, %v656_v10  ;;  %v742_v22 = vmul.f32 %v729_v20, %v657_v9  ;;  %v685_v25 = vmul.f32 %v676_v55, %v661_v24 }
 0x3cc   : > { %702 = vrot.lane.b32.xlu0 %v682_v17, %s3311_s22  ;;  %v789_v17 = vstv %s2789_s24 }
 0x3cd   : > { %704 = vrot.lane.b32.xlu1 %v683_v16, %s3311_s22 }
 0x3ce   : > { %v733_v28 = vpop.permute.xlu0 %732 }
 0x3cf   : > { %v743_v29 = vmul.f32 %v733_v28, %v658_v15  ;;  %v744_v30 = vmul.f32 %v733_v28, %v659_v14 }
 0x3d0   : > { %755 = vrot.lane.b32.xlu0 %v739_v19, %s3312_s23 }
 0x3d1   : > { %757 = vrot.lane.b32.xlu1 %v740_v18, %s3312_s23 }
 0x3d2   : > { %v737_v31 = vpop.permute.xlu1 %736 }
 0x3d3   : > { %v745_v32 = vmul.f32 %v737_v31, %v660_v23  ;;  %v746_v33 = vmul.f32 %v737_v31, %v661_v24  ;;  %v588_v36 = vpop.permute.xlu0 %587 }
 0x3d4   : > { %759 = vrot.lane.b32.xlu0 %v741_v21, %s3312_s23  ;;  %v605_v57 = vmul.f32 %v588_v36, %v3559_v45 }
 0x3d5   : > { %761 = vrot.lane.b32.xlu1 %v742_v22, %s3312_s23 }
 0x3d7   : > { %v593_v34 = vpop.permute.xlu1 %592 }
 0x3d8   : > { %706 = vrot.lane.b32.xlu0 %v684_v26, %s3311_s22  ;;  %v611_v38 = vpop.permute.xlu0 %610  ;;  %v606_v55 = vmul.f32 %v593_v34, %v3561_v46 }
 0x3d9   : > { %708 = vrot.lane.b32.xlu1 %v685_v25, %s3311_s22  ;;  %v625_v63 = vadd.f32 %v611_v38, %v605_v57 }
 0x3db   : > { %v598_v35 = vpop.permute.xlu1 %597 }
 0x3dc   : > { %763 = vrot.lane.b32.xlu0 %v743_v29, %s3312_s23  ;;  %v619_v40 = vpop.permute.xlu0 %618  ;;  %v607_v0 = vmul.f32 %v598_v35, %v3567_v47 }
 0x3dd   : > { %765 = vrot.lane.b32.xlu1 %v744_v30, %s3312_s23 }
 0x3de   : > { %v627_v15 = vadd.f32 %v619_v40, %v607_v0 }
 0x3e0   : > { %767 = vrot.lane.b32.xlu0 %v745_v32, %s3312_s23  ;;  %v615_v37 = vpop.permute.xlu1 %614 }
 0x3e1   : > { %769 = vrot.lane.b32.xlu1 %v746_v33, %s3312_s23  ;;  %v626_v58 = vadd.f32 %v615_v37, %v606_v55 }
 0x3e5   : > { %v603_v39 = vpop.permute.xlu1 %602 }
 0x3e6   : > { %v608_v18 = vmul.f32 %v603_v39, %v3572_v50 }
 0x3ea   : > { %v623_v41 = vpop.permute.xlu1 %622 }
 0x3eb   : > { %v628_v24 = vadd.f32 %v623_v41, %v608_v18 }
 0x436   : > { %v695_v43 = vpop.permute.xlu0 %694 }
 0x437   : > { %v697_v42 = vpop.permute.xlu1 %696 }
 0x438   : > { %v711_v61 = vsel %vm710_vm10, %v695_v43, %v697_v42 }
 0x439   : > { %v719_v10 = vadd.f32 %v711_v61, %v625_v63 }
 0x43a   : > { %v699_v48 = vpop.permute.xlu0 %698 }
 0x43b   : > { %v701_v44 = vpop.permute.xlu1 %700 }
 0x43c   : > { %v712_v56 = vsel %vm710_vm10, %v699_v48, %v701_v44 }
 0x43d   : > { %v720_v9 = vadd.f32 %v712_v56, %v626_v58 }
 0x43e   : > { %v703_v52 = vpop.permute.xlu0 %702 }
 0x43f   : > { %v705_v49 = vpop.permute.xlu1 %704 }
 0x440   : > { %v713_v45 = vsel %vm710_vm10, %v703_v52, %v705_v49 }
 0x441   : > { %v721_v19 = vadd.f32 %v713_v45, %v627_v15 }
 0x442   : > { %v756_v54 = vpop.permute.xlu0 %755 }
 0x443   : > { %v758_v53 = vpop.permute.xlu1 %757 }
 0x444   : > { %v772_v46 = vsel %vm771_vm11, %v756_v54, %v758_v53 }
 0x445   : > { %v780_v16 = vadd.f32 %v772_v46, %v719_v10  ;;  %v3314_v46 = vmov 5  }
 0x446   : > { %v760_v60 = vpop.permute.xlu0 %759 }
 0x447   : > { %v762_v59 = vpop.permute.xlu1 %761  ;;  %v790_v25 = vmul.f32 %v789_v17, %v780_v16  ;;  %vm785_vm13 = vcmp.ge.f32.partialorder %v780_v16, 0.0 }
 0x448   : > { %v773_v62 = vsel %vm771_vm11, %v760_v60, %v762_v59 }
 0x449   : > { %v781_v12 = vadd.f32 %v773_v62, %v720_v9  ;;  %v794_v34 = vsel %vm785_vm13, %v780_v16, %v790_v25  ;;  %v3313_v9 = vmov 4   ;;  %vm1291_vm13 = vcmask 998400  }
 0x44a   : > { %v707_v14 = vpop.permute.xlu0 %706  ;;  %3103 = vset.pattern.permute.xlu1 %v3313_v9  ;;  %3102 = vset.pattern.permute.xlu0 %v3313_v9 }
 0x44b   : > { %v709_v13 = vpop.permute.xlu1 %708  ;;  %v791_v20 = vmul.f32 %v789_v17, %v781_v12  ;;  %vm786_vm12 = vcmp.ge.f32.partialorder %v781_v12, 0.0 }
 0x44c   : > { %v714_v47 = vsel %vm710_vm10, %v707_v14, %v709_v13 }
 0x44d   : > { %v722_v28 = vadd.f32 %v714_v47, %v628_v24  ;;  %v795_v32 = vsel %vm786_vm12, %v781_v12, %v791_v20  ;;  %v896_v20 = vld [vmem:[%s4226_s7 + $0x8] sm:$0xff] }
 0x44e   : > { %v764_v22 = vpop.permute.xlu0 %763  ;;  %v798_v36 = vadd.f32 %v795_v32, %v794_v34 }
 0x44f   : > { %v766_v21 = vpop.permute.xlu1 %765 }
 0x450   : > { %v774_v23 = vsel %vm771_vm11, %v764_v22, %v766_v21  ;;  %v3655_v21 = vld [vmem:[%s4222_s3 + $0x28] sm:$0xff]  ;;  %v3661_v22 = vld [vmem:[%s4222_s3 + $0x30] sm:$0xff] }
 0x451   : > { %v782_v26 = vadd.f32 %v774_v23, %v721_v19  ;;  %v895_v19 = vld [vmem:[%s4226_s7] sm:$0xff] }
 0x452   : > { %v768_v31 = vpop.permute.xlu0 %767 }
 0x453   : > { %v792_v29 = vmul.f32 %v789_v17, %v782_v26  ;;  %v770_v30 = vpop.permute.xlu1 %769  ;;  %vm787_vm14 = vcmp.ge.f32.partialorder %v782_v26, 0.0 }
 0x454   : > { %v775_v50 = vsel %vm771_vm11, %v768_v31, %v770_v30 }
 0x455   : > { %v783_v33 = vadd.f32 %v775_v50, %v722_v28  ;;  %v796_v35 = vsel %vm787_vm14, %v782_v26, %v792_v29  ;;  %vm1352_vm14 = vcmask 965632  }
 0x456   : > { %v799_v38 = vadd.f32 %v798_v36, %v796_v35 }
 0x457   : > { %vm788_vm15 = vcmp.ge.f32.partialorder %v783_v33, 0.0  ;;  %v793_v37 = vmul.f32 %v789_v17, %v783_v33 }
 0x459   : > { %v797_v39 = vsel %vm788_vm15, %v783_v33, %v793_v37 }
 0x45a   : > { %v800_v40 = vadd.f32 %v799_v38, %v797_v39 }
 0x45c   : > { %801 = vadd.xlane.f32.xlu0 %v800_v40 }
 0x472   : > { %852 = vperm.xlu0 %3102, %v3443_v1  }
 0x476   : > { %3107 = vset.pattern.permute.xlu0 %v3314_v46 }
 0x477   : > { %884 = vperm.xlu0 %3107, %v3477_v11  }
 0x47b   : > { %3109 = vset.pattern.permute.xlu0 %v3305_v3 }
 0x4e9   : > { %v802_v41 = vpop.xlane.xlu0 %801 }
 0x4ea   : > { %v803_v42 = vrot.slane %v802_v41, 4 }
 0x4ec   : > { %v804_v43 = vadd.f32 %v803_v42, %v802_v41 }
 0x4ee   : > { %v805_v44 = vrot.slane %v804_v43, 2 }
 0x4f0   : > { %v806_v48 = vadd.f32 %v805_v44, %v804_v43 }
 0x4f1   : > { %v853_v30 = vpop.permute.xlu0 %852 }
 0x4f2   : > { %v807_v49 = vrot.slane %v806_v48, 1 }
 0x4f4   : > { %v808_v52 = vadd.f32 %v807_v49, %v806_v48 }
 0x4f6   : > { %2960 = vpush %v808_v52  ;;  %v885_v40 = vpop.permute.xlu0 %884  ;;  %v3179_v52 = vld [vmem:[%s4225_s6] sm:$0xff]  }
 0x527   : > { %s2961_s26 = spop %2960 }
 0x528   : > { %s810_s10 = smul.f32 0.00024414063, %s2961_s26 }
 0x52a   : > { %v811_v53 = vstv %s810_s10 }
 0x52b   : > { %v3612_v54 = vsub.f32 %v794_v34, %v811_v53  ;;  %v3614_v55 = vsub.f32 %v795_v32, %v811_v53  ;;  %v3616_v56 = vsub.f32 %v796_v35, %v811_v53  ;;  %v3618_v57 = vsub.f32 %v797_v39, %v811_v53  ;;  %v3180_v53 = vld [vmem:[%s4221_s2 + $0x10] sm:$0xff]  }
 0x52c   : > { %2912 = vmatprep.mubr.msk.bf16.mxu0 %vm394_vm0, %v3180_v53 }
 0x52d   : > { %v816_v58 = vmul.f32 %v3612_v54, %v3612_v54  ;;  %v817_v59 = vmul.f32 %v3614_v55, %v3614_v55  ;;  %v818_v60 = vmul.f32 %v3616_v56, %v3616_v56  ;;  %v819_v62 = vmul.f32 %v3618_v57, %v3618_v57 }
 0x52f   : > { %v820_v61 = vadd.f32 %v817_v59, %v816_v58 }
 0x531   : > { %v821_v63 = vadd.f32 %v820_v61, %v818_v60 }
 0x533   : > { %v822_v0 = vadd.f32 %v821_v63, %v819_v62 }
 0x535   : > { %823 = vadd.xlane.f32.xlu1 %v822_v0 }
 0x546   : > { %856 = vperm.xlu1 %3103, %v3455_v4  }
 0x54a   : > { %3104 = vset.pattern.permute.xlu1 %v3314_v46 }
 0x54b   : > { %872 = vperm.xlu1 %3104, %v3443_v1  }
 0x54f   : > { %876 = vperm.xlu1 %3104, %v3455_v4  }
 0x553   : > { %3105 = vset.pattern.permute.xlu1 %v3313_v9 }
 0x554   : > { %860 = vperm.xlu1 %3105, %v3448_v2  }
 0x558   : > { %864 = vperm.xlu1 %3105, %v3477_v11  }
 0x55c   : > { %3106 = vset.pattern.permute.xlu1 %v3314_v46 }
 0x55d   : > { %880 = vperm.xlu1 %3106, %v3448_v2  }
 0x561   : > { %3108 = vset.pattern.permute.xlu1 %v3305_v3 }
 0x562   : > { %899 = vperm.xlu1 %3108, %v895_v19  }
 0x566   : > { %904 = vperm.xlu1 %3108, %v896_v20  }
 0x56a   : > { %977 = vperm.xlu1 %3108, %v3655_v21  }
 0x56e   : > { %982 = vperm.xlu1 %3108, %v3661_v22  }
 0x572   : > { %3111 = vset.pattern.permute.xlu1 %v3306_v7 }
 0x5c2   : > { %v824_v10 = vpop.xlane.xlu1 %823 }
 0x5c3   : > { %v825_v1 = vrot.slane %v824_v10, 4 }
 0x5c5   : > { %v826_v12 = vadd.f32 %v825_v1, %v824_v10 }
 0x5c6   : > { %v857_v24 = vpop.permute.xlu1 %856 }
 0x5c7   : > { %v827_v13 = vrot.slane %v826_v12, 2 }
 0x5c9   : > { %v828_v14 = vadd.f32 %v827_v13, %v826_v12  ;;  %v3181_v12 = vld [vmem:[%s4221_s2 + $0x18] sm:$0xff]  }
 0x5ca   : > { %v873_v25 = vpop.permute.xlu1 %872 }
 0x5cb   : > { %v829_v4 = vrot.slane %v828_v14, 1 }
 0x5cd   : > { %v830_v45 = vadd.f32 %v829_v4, %v828_v14 }
 0x5ce   : > { %v877_v26 = vpop.permute.xlu1 %876 }
 0x5cf   : > { %2962 = vpush %v830_v45 }
 0x5d3   : > { %v861_v28 = vpop.permute.xlu1 %860 }
 0x5d7   : > { %v865_v29 = vpop.permute.xlu1 %864 }
 0x5dc   : > { %v881_v39 = vpop.permute.xlu1 %880 }
 0x600   : > { %s2963_s12 = spop %2962 }
 0x601   : > { %s832_s13 = smul.f32 0.00024420026, %s2963_s12 }
 0x603   : > { %v833_v15 = vstv %s832_s13 }
 0x604   : > { %3193 = vrsqrt.f32 %v833_v15  ;;  %vm836_vm1 = vcmp.eq.f32.partialorder %v833_v15, inf  ;;  %v839_v17 = vand.u32 2147483648, %v833_v15  ;;  %vm838_vm2 = vcmp.eq.f32.partialorder %v833_v15, 0.0 }
 0x60e   : > { %v3194_v16 = vpop.eup %3193 }
 0x60f   : > { %v835_v11 = vmul.f32 %v3194_v16, %v833_v15 }
 0x611   : > { %v837_v18 = vsel %vm836_vm1, %v833_v15, %v835_v11 }
 0x612   : > { %v840_v2 = vsel %vm838_vm2, %v839_v17, %v837_v18 }
 0x613   : > { %2964 = vpush %v840_v2 }
 0x644   : > { %s2965_s26 = spop %2964 }
 0x645   : > { %s842_s10 = sadd.f32 1e-05, %s2965_s26 }
 0x647   : > { %v843_v47 = vstv %s842_s10  ;;  %s2804_s10 = sld [smem:[#allocation3 + $0x2]] }
 0x648   : > { %3195 = vrcp.f32 %v843_v47 }
 0x64d   : > { %v1060_v45 = vstv %s2804_s10  ;;  %s3318_s10 = smov 124  }
 0x652   : > { %v3196_v23 = vpop.eup %3195 }
 0x653   : > { %2966 = vpush %v3196_v23 }
 0x684   : > { %s2967_s12 = spop %2966 }
 0x685   : > { %v846_v31 = vstv %s2967_s12 }
 0x686   : > { %v848_v32 = vmul.f32 %v846_v31, %v3614_v55  ;;  %v849_v50 = vmul.f32 %v846_v31, %v3616_v56  ;;  %v850_v33 = vmul.f32 %v846_v31, %v3618_v57  ;;  %v847_v34 = vmul.f32 %v846_v31, %v3612_v54  ;;  %v3684_v54 = vld [vmem:[%s4222_s3 + $0x20] sm:$0xff]  ;;  %v3690_v55 = vld [vmem:[%s4222_s3 + $0x38] sm:$0xff]  ;;  %v900_v56 = vpop.permute.xlu1 %899 }
 0x687   : > { %972 = vperm.xlu0 %3109, %v3684_v54  }
 0x688   : > { %v870_v35 = vmul.f32 %v865_v29, %v850_v33  ;;  %v867_v36 = vmul.f32 %v853_v30, %v847_v34  ;;  %v869_v37 = vmul.f32 %v861_v28, %v849_v50  ;;  %v868_v38 = vmul.f32 %v857_v24, %v848_v32 }
 0x68a   : > { %v887_v41 = vadd.f32 %v873_v25, %v867_v36  ;;  %v888_v42 = vadd.f32 %v877_v26, %v868_v38  ;;  %v889_v43 = vadd.f32 %v881_v39, %v869_v37  ;;  %v890_v44 = vadd.f32 %v885_v40, %v870_v35  ;;  %v905_v60 = vpop.permute.xlu1 %904 }
 0x68b   : > { %987 = vperm.xlu0 %3109, %v3690_v55  }
 0x68c   : > { %v893_v48 = vpack.c.bf16 %v888_v42, %v887_v41  ;;  %v894_v49 = vpack.c.bf16 %v890_v44, %v889_v43 }
 0x68e   : > { %2903 = vmatpush3.bf16.msra.mxu1 %v893_v48  ;;  %v978_v13 = vpop.permute.xlu1 %977 }
 0x68f   : > { %2904 = vmatprep.subr.bf16.mxu1 %v3308_v27  ;;  %3110 = vset.pattern.permute.xlu0 %v3306_v7 }
 0x692   : > { %2905 = vmatpush3.bf16.msra.mxu1 %v894_v49  ;;  %v983_v4 = vpop.permute.xlu1 %982 }
 0x693   : > { %2916 = vmatprep.subr.bf16.mxu1 %v3308_v27 }
 0x695   : > { %2907 = vmatmul.mubr.msk.bf16.vlgmr.msra.gmra.mrb[0].mxu1 %vm912_vm4, %v3179_v52 }
 0x696   : > { %2920 = vmatprep.mubr.msk.bf16.mxu1 %vm3315_vm3, %v3308_v27 }
 0x706   : > { %v973_v14 = vpop.permute.xlu0 %972 }
 0x768   : > { %v950_v57 = vpop.f32.mrb[0].mxu1 }
 0x769   : > { %v951_v58 = vadd.f32 %v950_v57, %v900_v56  ;;  %v2908_v59 = vpop.f32.mrb[1].mxu1 }
 0x76a   : > { %v953_v61 = vpop.f32.mrb[2].mxu1 }
 0x76b   : > { %v954_v62 = vadd.f32 %v953_v61, %v905_v60  ;;  %v2909_v63 = vpop.f32.mrb[3].mxu1  ;;  %v3695_v0 = vadd.f32 %v951_v58, %v3465_v5 }
 0x76d   : > { %v3698_v10 = vadd.f32 %v954_v62, %v3467_v6  ;;  %v988_v6 = vpop.permute.xlu0 %987 }
 0x76f   : > { %v969_v1 = vpack.c.bf16 %v3698_v10, %v3695_v0 }
 0x771   : > { %2910 = vmatprep.subr.bf16.mxu0 %v969_v1 }
 0x772   : > { %2911 = vmatpush3.bf16.msra.mxu0 %v969_v1 }
 0x775   : > { %2913 = vmatmul.mubr.msk.bf16.vlgmr.msra.gmra.mrb[4].mxu0 %vm394_vm0, %v3181_v12  ;;  %v2805_v12 = vld [vmem:[%s4224_s5 + $0x20] sm:$0xff] }
 0x848   : > { %v2914_v5 = vpop.f32.mrb[4].mxu0 }
 0x849   : > { %v1040_v15 = vpop.f32.mrb[5].mxu0  ;;  %v1049_v16 = vadd.f32 %v2914_v5, %v983_v4 }
 0x84a   : > { %v1041_v11 = vadd.f32 %v1040_v15, %v973_v14  ;;  %v2915_v17 = vpop.f32.mrb[6].mxu0 }
 0x84b   : > { %v1043_v18 = vpop.f32.mrb[7].mxu0  ;;  %v1052_v19 = vadd.f32 %v2915_v17, %v988_v6  ;;  %v1063_v47 = vmul.f32 %v1060_v45, %v1049_v16  ;;  %vm1058_vm8 = vcmp.ge.f32.partialorder %v1049_v16, 0.0 }
 0x84c   : > { %v1061_v2 = vmul.f32 %v1060_v45, %v1041_v11  ;;  %v1044_v20 = vadd.f32 %v1043_v18, %v978_v13  ;;  %vm1056_vm5 = vcmp.ge.f32.partialorder %v1041_v11, 0.0  ;;  %v2807_v13 = vld [vmem:[%s4224_s5 + $0x30] sm:$0xff] }
 0x84d   : > { %v1064_v25 = vmul.f32 %v1060_v45, %v1052_v19  ;;  %vm1059_vm10 = vcmp.ge.f32.partialorder %v1052_v19, 0.0  ;;  %v1067_v29 = vsel %vm1058_vm8, %v1049_v16, %v1063_v47 }
 0x84e   : > { %vm1057_vm6 = vcmp.ge.f32.partialorder %v1044_v20, 0.0  ;;  %v1062_v23 = vmul.f32 %v1060_v45, %v1044_v20  ;;  %v1065_v24 = vsel %vm1056_vm5, %v1041_v11, %v1061_v2 }
 0x84f   : > { %v1068_v31 = vsel %vm1059_vm10, %v1052_v19, %v1064_v25 }
 0x850   : > { %v1066_v26 = vsel %vm1057_vm6, %v1044_v20, %v1062_v23 }
 0x851   : > { %v1069_v28 = vadd.f32 %v1066_v26, %v1065_v24 }
 0x853   : > { %v1070_v30 = vadd.f32 %v1069_v28, %v1067_v29 }
 0x855   : > { %v1071_v32 = vadd.f32 %v1070_v30, %v1068_v31 }
 0x857   : > { %1072 = vadd.xlane.f32.xlu1 %v1071_v32 }
 0x868   : > { %1127 = vperm.xlu1 %3111, %v3655_v21  }
 0x86c   : > { %1131 = vperm.xlu1 %3111, %v3661_v22  }
 0x870   : > { %3112 = vset.pattern.permute.xlu1 %v3307_v8 }
 0x871   : > { %1143 = vperm.xlu1 %3112, %v3684_v54  }
 0x875   : > { %1147 = vperm.xlu1 %3112, %v3655_v21  }
 0x879   : > { %3113 = vset.pattern.permute.xlu1 %v3306_v7 }
 0x87a   : > { %1135 = vperm.xlu1 %3113, %v3690_v55  }
 0x87e   : > { %3114 = vset.pattern.permute.xlu1 %v3307_v8 }
 0x87f   : > { %1151 = vperm.xlu1 %3114, %v3661_v22  }
 0x883   : > { %1155 = vperm.xlu1 %3114, %v3690_v55  }
 0x887   : > { %3115 = vset.pattern.permute.xlu1 %v3305_v3 }
 0x888   : > { %1244 = vperm.xlu1 %3115, %v2805_v12  }
 0x88c   : > { %1252 = vperm.xlu1 %3115, %v2807_v13  }
 0x890   : > { %3118 = vset.pattern.permute.xlu1 %v3307_v8 }
 0x8e4   : > { %v1073_v50 = vpop.xlane.xlu1 %1072 }
 0x8e5   : > { %v1074_v33 = vrot.slane %v1073_v50, 4 }
 0x8e7   : > { %v1075_v34 = vadd.f32 %v1074_v33, %v1073_v50  ;;  %v2808_v33 = vld [vmem:[%s4224_s5 + $0x38] sm:$0xff] }
 0x8e8   : > { %v1128_v17 = vpop.permute.xlu1 %1127 }
 0x8e9   : > { %v1076_v35 = vrot.slane %v1075_v34, 2 }
 0x8eb   : > { %v1077_v36 = vadd.f32 %v1076_v35, %v1075_v34 }
 0x8ec   : > { %v1132_v18 = vpop.permute.xlu1 %1131 }
 0x8ed   : > { %v1078_v37 = vrot.slane %v1077_v36, 1 }
 0x8ef   : > { %v1079_v38 = vadd.f32 %v1078_v37, %v1077_v36 }
 0x8f0   : > { %v1144_v2 = vpop.permute.xlu1 %1143 }
 0x8f1   : > { %2968 = vpush %v1079_v38 }
 0x8f4   : > { %v1148_v19 = vpop.permute.xlu1 %1147 }
 0x8f9   : > { %v1136_v30 = vpop.permute.xlu1 %1135 }
 0x8fe   : > { %v1152_v50 = vpop.permute.xlu1 %1151 }
 0x902   : > { %v1156_v38 = vpop.permute.xlu1 %1155 }
 0x922   : > { %s2969_s12 = spop %2968 }
 0x923   : > { %s1081_s13 = smul.f32 0.00024414063, %s2969_s12  ;;  %s3319_s12 = smov 116  }
 0x925   : > { %v1082_v39 = vstv %s1081_s13  ;;  %s2833_s13 = sld [smem:[#allocation3 + $0x5]] }
 0x926   : > { %v1083_v40 = vsub.f32 %v1065_v24, %v1082_v39  ;;  %v1084_v41 = vsub.f32 %v1066_v26, %v1082_v39  ;;  %v1085_v42 = vsub.f32 %v1067_v29, %v1082_v39  ;;  %v3717_v43 = vsub.f32 %v1068_v31, %v1082_v39  ;;  %v2806_v31 = vld [vmem:[%s4224_s5 + $0x28] sm:$0xff] }
 0x928   : > { %v1087_v44 = vmul.f32 %v1083_v40, %v1083_v40  ;;  %v1088_v48 = vmul.f32 %v1084_v41, %v1084_v41  ;;  %v1089_v49 = vmul.f32 %v1085_v42, %v1085_v42  ;;  %v1090_v53 = vmul.f32 %v3717_v43, %v3717_v43 }
 0x92a   : > { %v1091_v52 = vadd.f32 %v1088_v48, %v1087_v44 }
 0x92c   : > { %v1092_v56 = vadd.f32 %v1091_v52, %v1089_v49 }
 0x92e   : > { %v1093_v57 = vadd.f32 %v1092_v56, %v1090_v53 }
 0x930   : > { %1094 = vadd.xlane.f32.xlu0 %v1093_v57 }
 0x946   : > { %1123 = vperm.xlu0 %3110, %v3684_v54  }
 0x94a   : > { %3116 = vset.pattern.permute.xlu0 %v3307_v8 }
 0x94b   : > { %1305 = vperm.xlu0 %3116, %v2805_v12  }
 0x94f   : > { %3117 = vset.pattern.permute.xlu0 %v3305_v3 }
 0x9bd   : > { %v1095_v58 = vpop.xlane.xlu0 %1094 }
 0x9be   : > { %v1096_v59 = vrot.slane %v1095_v58, 4 }
 0x9c0   : > { %v1097_v60 = vadd.f32 %v1096_v59, %v1095_v58 }
 0x9c2   : > { %v1098_v61 = vrot.slane %v1097_v60, 2 }
 0x9c4   : > { %v1099_v62 = vadd.f32 %v1098_v61, %v1097_v60 }
 0x9c5   : > { %v1124_v47 = vpop.permute.xlu0 %1123 }
 0x9c6   : > { %v1100_v63 = vrot.slane %v1099_v62, 1 }
 0x9c8   : > { %v1101_v1 = vadd.f32 %v1100_v63, %v1099_v62 }
 0x9ca   : > { %2970 = vpush %v1101_v1 }
 0x9fb   : > { %s2971_s20 = spop %2970 }
 0x9fc   : > { %s1103_s22 = smul.f32 0.00024420026, %s2971_s20 }
 0x9fe   : > { %v1104_v14 = vstv %s1103_s22 }
 0x9ff   : > { %3197 = vrsqrt.f32 %v1104_v14  ;;  %vm1107_vm11 = vcmp.eq.f32.partialorder %v1104_v14, inf  ;;  %v1110_v45 = vand.u32 2147483648, %v1104_v14  ;;  %vm1109_vm12 = vcmp.eq.f32.partialorder %v1104_v14, 0.0 }
 0xa09   : > { %v3198_v4 = vpop.eup %3197 }
 0xa0a   : > { %v1106_v5 = vmul.f32 %v3198_v4, %v1104_v14 }
 0xa0c   : > { %v1108_v15 = vsel %vm1107_vm11, %v1104_v14, %v1106_v5 }
 0xa0d   : > { %v1111_v6 = vsel %vm1109_vm12, %v1110_v45, %v1108_v15 }
 0xa0e   : > { %2972 = vpush %v1111_v6 }
 0xa3f   : > { %s2973_s23 = spop %2972 }
 0xa40   : > { %s1113_s24 = sadd.f32 1e-05, %s2973_s23 }
 0xa42   : > { %v1114_v16 = vstv %s1113_s24 }
 0xa43   : > { %3199 = vrcp.f32 %v1114_v16 }
 0xa4d   : > { %v3200_v11 = vpop.eup %3199 }
 0xa4e   : > { %2974 = vpush %v3200_v11 }
 0xa7f   : > { %s2975_s26 = spop %2974 }
 0xa80   : > { %v1117_v20 = vstv %s2975_s26 }
 0xa81   : > { %v1119_v23 = vmul.f32 %v1117_v20, %v1084_v41  ;;  %v1118_v24 = vmul.f32 %v1117_v20, %v1083_v40  ;;  %v1120_v32 = vmul.f32 %v1117_v20, %v1085_v42  ;;  %v1121_v34 = vmul.f32 %v1117_v20, %v3717_v43  ;;  %v1245_v40 = vpop.permute.xlu1 %1244  ;;  %v1306_v41 = vpop.permute.xlu0 %1305 }
 0xa83   : > { %v1138_v25 = vmul.f32 %v1124_v47, %v1118_v24  ;;  %v1139_v26 = vmul.f32 %v1128_v17, %v1119_v23  ;;  %v1140_v35 = vmul.f32 %v1132_v18, %v1120_v32  ;;  %v1141_v37 = vmul.f32 %v1136_v30, %v1121_v34 }
 0xa85   : > { %v3731_v28 = vadd.f32 %v1144_v2, %v1138_v25  ;;  %v3733_v29 = vadd.f32 %v1148_v19, %v1139_v26  ;;  %v3746_v36 = vadd.f32 %v1152_v50, %v1140_v35  ;;  %v3751_v39 = vadd.f32 %v1156_v38, %v1141_v37  ;;  %v1253_v42 = vpop.permute.xlu1 %1252 }
 0xa87   : > { %1215 = vrot.lane.b32.xlu1 %v3731_v28, %s3309_s21  ;;  %1217 = vrot.lane.b32.xlu0 %v3733_v29, %s3309_s21 }
 0xa8b   : > { %1309 = vperm.xlu1 %3118, %v2806_v31   ;;  %1248 = vperm.xlu0 %3117, %v2806_v31  }
 0xa8f   : > { %1313 = vperm.xlu1 %3118, %v2807_v13   ;;  %1256 = vperm.xlu0 %3117, %v2808_v33  }
 0xa93   : > { %3119 = vset.pattern.permute.xlu0 %v3306_v7  ;;  %1219 = vrot.lane.b32.xlu1 %v3746_v36, %s3309_s21 }
 0xa94   : > { %1169 = vperm.xlu0 %3119, %v2805_v12  }
 0xa97   : > { %1221 = vrot.lane.b32.xlu1 %v3751_v39, %s3309_s21 }
 0xa98   : > { %3121 = vset.pattern.permute.xlu0 %v3310_v51 }
 0xa99   : > { %1192 = vperm.xlu0 %3121, %v3684_v54  }
 0xa9b   : > { %1317 = vperm.xlu1 %3118, %v2808_v33  }
 0xa9d   : > { %1200 = vperm.xlu0 %3121, %v3661_v22  }
 0xa9f   : > { %3120 = vset.pattern.permute.xlu1 %v3306_v7 }
 0xaa0   : > { %1174 = vperm.xlu1 %3120, %v2806_v31  }
 0xaa1   : > { %3125 = vset.pattern.permute.xlu0 %v3313_v9 }
 0xaa4   : > { %1179 = vperm.xlu1 %3120, %v2807_v13  }
 0xaa8   : > { %3122 = vset.pattern.permute.xlu1 %v3310_v51 }
 0xaa9   : > { %1196 = vperm.xlu1 %3122, %v3655_v21  }
 0xaad   : > { %3123 = vset.pattern.permute.xlu1 %v3306_v7 }
 0xaae   : > { %1184 = vperm.xlu1 %3123, %v2808_v33  }
 0xab2   : > { %3124 = vset.pattern.permute.xlu1 %v3310_v51 }
 0xab3   : > { %1204 = vperm.xlu1 %3124, %v3690_v55  }
 0xab7   : > { %3126 = vset.pattern.permute.xlu1 %v3313_v9 }
 0xaf9   : > { %v1218_v43 = vpop.permute.xlu0 %1217  ;;  %v1216_v44 = vpop.permute.xlu1 %1215 }
 0xafa   : > { %1229 = vst.msk [vmem:[#allocation2 + $0x10] sm:$0xff] %vm645_vm9, %v1218_v43  ;;  %1227 = vst.msk [vmem:[#allocation2] sm:$0xff] %vm645_vm9, %v1216_v44 }
 0xafb   : > { %1230 = vst.msk [vmem:[#allocation2 + $0x18] sm:$0xff] %vm339_vm7, %v1218_v43  ;;  %1228 = vst.msk [vmem:[#allocation2 + $0x8] sm:$0xff] %vm339_vm7, %v1216_v44 }
 0xb01   : > { %v1235_v49 = vld [vmem:[#allocation2] sm:$0xff]  ;;  %v1237_v56 = vld [vmem:[#allocation2 + $0x10] sm:$0xff] }
 0xb02   : > { %v1236_v48 = vld [vmem:[#allocation2 + $0x8] sm:$0xff]  ;;  %v1259_v53 = vmul.f32 %v1245_v40, %v1235_v49  ;;  %v1238_v57 = vld [vmem:[#allocation2 + $0x18] sm:$0xff]  ;;  %v1320_v45 = vmul.f32 %v1306_v41, %v1235_v49 }
 0xb03   : > { %v1260_v52 = vmul.f32 %v1245_v40, %v1236_v48  ;;  %v1321_v5 = vmul.f32 %v1306_v41, %v1236_v48 }
 0xb04   : > { %1275 = vrot.lane.b32.xlu0 %v1259_v53, %s3316_s17 }
 0xb05   : > { %1277 = vrot.lane.b32.xlu1 %v1260_v52, %s3316_s17 }
 0xb0a   : > { %v1249_v58 = vpop.permute.xlu0 %1248  ;;  %v1310_v59 = vpop.permute.xlu1 %1309 }
 0xb0b   : > { %v1261_v60 = vmul.f32 %v1249_v58, %v1237_v56  ;;  %v1262_v61 = vmul.f32 %v1249_v58, %v1238_v57  ;;  %v1322_v15 = vmul.f32 %v1310_v59, %v1237_v56  ;;  %v1323_v6 = vmul.f32 %v1310_v59, %v1238_v57 }
 0xb0d   : > { %1281 = vrot.lane.b32.xlu1 %v1262_v61, %s3316_s17  ;;  %1279 = vrot.lane.b32.xlu0 %v1261_v60, %s3316_s17 }
 0xb0e   : > { %v1314_v62 = vpop.permute.xlu1 %1313  ;;  %v1257_v17 = vpop.permute.xlu0 %1256 }
 0xb12   : > { %v1220_v63 = vpop.permute.xlu1 %1219 }
 0xb13   : > { %1231 = vst.msk [vmem:[#allocation2 + $0x20] sm:$0xff] %vm645_vm9, %v1220_v63  ;;  %v1170_v31 = vpop.permute.xlu0 %1169 }
 0xb14   : > { %1232 = vst.msk [vmem:[#allocation2 + $0x28] sm:$0xff] %vm339_vm7, %v1220_v63  ;;  %v1187_v52 = vmul.f32 %v1170_v31, %v3731_v28 }
 0xb16   : > { %v1222_v1 = vpop.permute.xlu1 %1221 }
 0xb17   : > { %1233 = vst.msk [vmem:[#allocation2 + $0x30] sm:$0xff] %vm645_vm9, %v1222_v1 }
 0xb18   : > { %1234 = vst.msk [vmem:[#allocation2 + $0x38] sm:$0xff] %vm339_vm7, %v1222_v1  ;;  %v1193_v50 = vpop.permute.xlu0 %1192 }
 0xb19   : > { %v1207_v60 = vadd.f32 %v1193_v50, %v1187_v52 }
 0xb1a   : > { %v1239_v13 = vld [vmem:[#allocation2 + $0x20] sm:$0xff]  ;;  %v1318_v47 = vpop.permute.xlu1 %1317 }
 0xb1b   : > { %v1240_v12 = vld [vmem:[#allocation2 + $0x28] sm:$0xff]  ;;  %v1263_v4 = vmul.f32 %v1253_v42, %v1239_v13  ;;  %v1324_v20 = vmul.f32 %v1314_v62, %v1239_v13 }
 0xb1c   : > { %v1264_v14 = vmul.f32 %v1253_v42, %v1240_v12  ;;  %v1325_v19 = vmul.f32 %v1314_v62, %v1240_v12  ;;  %v1201_v33 = vpop.permute.xlu0 %1200 }
 0xb1d   : > { %1283 = vrot.lane.b32.xlu0 %v1263_v4, %s3316_s17 }
 0xb1e   : > { %1285 = vrot.lane.b32.xlu1 %v1264_v14, %s3316_s17  ;;  %v1241_v16 = vld [vmem:[#allocation2 + $0x30] sm:$0xff] }
 0xb1f   : > { %v1242_v11 = vld [vmem:[#allocation2 + $0x38] sm:$0xff]  ;;  %v1265_v2 = vmul.f32 %v1257_v17, %v1241_v16  ;;  %v1326_v23 = vmul.f32 %v1318_v47, %v1241_v16  ;;  %v1175_v25 = vpop.permute.xlu1 %1174 }
 0xb20   : > { %v1266_v18 = vmul.f32 %v1257_v17, %v1242_v11  ;;  %v1327_v24 = vmul.f32 %v1318_v47, %v1242_v11  ;;  %v1188_v48 = vmul.f32 %v1175_v25, %v3733_v29 }
 0xb21   : > { %1336 = vrot.lane.b32.xlu0 %v1320_v45, %s3317_s18 }
 0xb22   : > { %1338 = vrot.lane.b32.xlu1 %v1321_v5, %s3317_s18  ;;  %v1370_v5 = vstv %s2809_s19 }
 0xb23   : > { %v1180_v26 = vpop.permute.xlu1 %1179 }
 0xb24   : > { %v1189_v61 = vmul.f32 %v1180_v26, %v3746_v36 }
 0xb25   : > { %1340 = vrot.lane.b32.xlu0 %v1322_v15, %s3317_s18 }
 0xb26   : > { %1342 = vrot.lane.b32.xlu1 %v1323_v6, %s3317_s18  ;;  %v1209_v14 = vadd.f32 %v1201_v33, %v1189_v61 }
 0xb28   : > { %v1197_v30 = vpop.permute.xlu1 %1196 }
 0xb29   : > { %1287 = vrot.lane.b32.xlu0 %v1265_v2, %s3316_s17  ;;  %v1208_v53 = vadd.f32 %v1197_v30, %v1188_v48 }
 0xb2a   : > { %1289 = vrot.lane.b32.xlu1 %v1266_v18, %s3316_s17 }
 0xb2d   : > { %1344 = vrot.lane.b32.xlu0 %v1324_v20, %s3317_s18  ;;  %v1185_v32 = vpop.permute.xlu1 %1184 }
 0xb2e   : > { %1346 = vrot.lane.b32.xlu1 %v1325_v19, %s3317_s18  ;;  %v1190_v45 = vmul.f32 %v1185_v32, %v3751_v39 }
 0xb31   : > { %1348 = vrot.lane.b32.xlu0 %v1326_v23, %s3317_s18 }
 0xb32   : > { %1350 = vrot.lane.b32.xlu1 %v1327_v24, %s3317_s18  ;;  %v1205_v34 = vpop.permute.xlu1 %1204 }
 0xb33   : > { %v1210_v18 = vadd.f32 %v1205_v34, %v1190_v45 }
 0xb76   : > { %v1276_v35 = vpop.permute.xlu0 %1275 }
 0xb77   : > { %v1278_v37 = vpop.permute.xlu1 %1277 }
 0xb78   : > { %v1292_v58 = vsel %vm1291_vm13, %v1276_v35, %v1278_v37 }
 0xb79   : > { %v1300_v63 = vadd.f32 %v1292_v58, %v1207_v60 }
 0xb7f   : > { %v1280_v38 = vpop.permute.xlu0 %1279  ;;  %v1282_v40 = vpop.permute.xlu1 %1281 }
 0xb80   : > { %v1293_v49 = vsel %vm1291_vm13, %v1280_v38, %v1282_v40 }
 0xb81   : > { %v1301_v62 = vadd.f32 %v1293_v49, %v1208_v53 }
 0xb8f   : > { %v1284_v41 = vpop.permute.xlu0 %1283 }
 0xb90   : > { %v1286_v42 = vpop.permute.xlu1 %1285 }
 0xb91   : > { %v1294_v28 = vsel %vm1291_vm13, %v1284_v41, %v1286_v42 }
 0xb92   : > { %v1302_v15 = vadd.f32 %v1294_v28, %v1209_v14 }
 0xb93   : > { %v1337_v43 = vpop.permute.xlu0 %1336 }
 0xb94   : > { %v1339_v44 = vpop.permute.xlu1 %1338 }
 0xb95   : > { %v1353_v29 = vsel %vm1352_vm14, %v1337_v43, %v1339_v44 }
 0xb96   : > { %v1361_v4 = vadd.f32 %v1353_v29, %v1300_v63 }
 0xb97   : > { %v1341_v56 = vpop.permute.xlu0 %1340 }
 0xb98   : > { %v1343_v57 = vpop.permute.xlu1 %1342  ;;  %v1371_v2 = vmul.f32 %v1370_v5, %v1361_v4  ;;  %vm1366_vm1 = vcmp.ge.f32.partialorder %v1361_v4, 0.0 }
 0xb99   : > { %v1354_v59 = vsel %vm1352_vm14, %v1341_v56, %v1343_v57 }
 0xb9a   : > { %v1362_v1 = vadd.f32 %v1354_v59, %v1301_v62  ;;  %v1375_v30 = vsel %vm1366_vm1, %v1361_v4, %v1371_v2  ;;  %vm1873_vm1 = vcmask 1014784  }
 0xb9b   : > { %v1288_v12 = vpop.permute.xlu0 %1287 }
 0xb9c   : > { %v1290_v13 = vpop.permute.xlu1 %1289  ;;  %v1372_v6 = vmul.f32 %v1370_v5, %v1362_v1  ;;  %vm1367_vm15 = vcmp.ge.f32.partialorder %v1362_v1, 0.0 }
 0xb9d   : > { %v1295_v36 = vsel %vm1291_vm13, %v1288_v12, %v1290_v13 }
 0xb9e   : > { %v1303_v20 = vadd.f32 %v1295_v36, %v1210_v18  ;;  %v1376_v25 = vsel %vm1367_vm15, %v1362_v1, %v1372_v6  ;;  %v2813_v6 = vld [vmem:[%s4226_s7 + $0x18] sm:$0xff] }
 0xb9f   : > { %v1345_v16 = vpop.permute.xlu0 %1344  ;;  %v1379_v32 = vadd.f32 %v1376_v25, %v1375_v30 }
 0xba0   : > { %v1347_v11 = vpop.permute.xlu1 %1346 }
 0xba1   : > { %v1355_v17 = vsel %vm1352_vm14, %v1345_v16, %v1347_v11  ;;  %v3833_v16 = vld [vmem:[%s4222_s3 + $0x48] sm:$0xff]  ;;  %v3839_v11 = vld [vmem:[%s4222_s3 + $0x50] sm:$0xff] }
 0xba2   : > { %v1363_v19 = vadd.f32 %v1355_v17, %v1302_v15  ;;  %v2812_v15 = vld [vmem:[%s4226_s7 + $0x10] sm:$0xff] }
 0xba3   : > { %v1349_v23 = vpop.permute.xlu0 %1348 }
 0xba4   : > { %v1373_v47 = vmul.f32 %v1370_v5, %v1363_v19  ;;  %v1351_v24 = vpop.permute.xlu1 %1350  ;;  %vm1368_vm2 = vcmp.ge.f32.partialorder %v1363_v19, 0.0 }
 0xba5   : > { %v1356_v39 = vsel %vm1352_vm14, %v1349_v23, %v1351_v24 }
 0xba6   : > { %v1364_v26 = vadd.f32 %v1356_v39, %v1303_v20  ;;  %v1377_v31 = vsel %vm1368_vm2, %v1363_v19, %v1373_v47  ;;  %vm1934_vm2 = vcmask 949248  }
 0xba7   : > { %v1380_v33 = vadd.f32 %v1379_v32, %v1377_v31 }
 0xba8   : > { %vm1369_vm5 = vcmp.ge.f32.partialorder %v1364_v26, 0.0  ;;  %v1374_v50 = vmul.f32 %v1370_v5, %v1364_v26 }
 0xbaa   : > { %v1378_v35 = vsel %vm1369_vm5, %v1364_v26, %v1374_v50 }
 0xbab   : > { %v1381_v34 = vadd.f32 %v1380_v33, %v1378_v35 }
 0xbad   : > { %1382 = vadd.xlane.f32.xlu0 %v1381_v34 }
 0xbc3   : > { %1433 = vperm.xlu0 %3125, %v3684_v54  }
 0xbc7   : > { %3130 = vset.pattern.permute.xlu0 %v3314_v46 }
 0xbc8   : > { %1465 = vperm.xlu0 %3130, %v3690_v55  }
 0xbcc   : > { %3132 = vset.pattern.permute.xlu0 %v3305_v3 }
 0xc3a   : > { %v1383_v37 = vpop.xlane.xlu0 %1382 }
 0xc3b   : > { %v1384_v38 = vrot.slane %v1383_v37, 4 }
 0xc3d   : > { %v1385_v40 = vadd.f32 %v1384_v38, %v1383_v37 }
 0xc3f   : > { %v1386_v41 = vrot.slane %v1385_v40, 2 }
 0xc41   : > { %v1387_v42 = vadd.f32 %v1386_v41, %v1385_v40 }
 0xc42   : > { %v1434_v23 = vpop.permute.xlu0 %1433 }
 0xc43   : > { %v1388_v43 = vrot.slane %v1387_v42, 1 }
 0xc45   : > { %v1389_v44 = vadd.f32 %v1388_v43, %v1387_v42 }
 0xc47   : > { %2976 = vpush %v1389_v44  ;;  %v1466_v34 = vpop.permute.xlu0 %1465  ;;  %v3182_v44 = vld [vmem:[%s4225_s6 + $0x8] sm:$0xff]  }
 0xc78   : > { %s2977_s20 = spop %2976 }
 0xc79   : > { %s1391_s22 = smul.f32 0.00024414063, %s2977_s20 }
 0xc7b   : > { %v1392_v48 = vstv %s1391_s22 }
 0xc7c   : > { %v3798_v49 = vsub.f32 %v1375_v30, %v1392_v48  ;;  %v3800_v52 = vsub.f32 %v1376_v25, %v1392_v48  ;;  %v3802_v53 = vsub.f32 %v1377_v31, %v1392_v48  ;;  %v3804_v56 = vsub.f32 %v1378_v35, %v1392_v48  ;;  %v3183_v48 = vld [vmem:[%s4221_s2 + $0x20] sm:$0xff]  }
 0xc7d   : > { %2926 = vmatprep.mubr.msk.bf16.mxu0 %vm394_vm0, %v3183_v48 }
 0xc7e   : > { %v1397_v57 = vmul.f32 %v3798_v49, %v3798_v49  ;;  %v1398_v58 = vmul.f32 %v3800_v52, %v3800_v52  ;;  %v1399_v59 = vmul.f32 %v3802_v53, %v3802_v53  ;;  %v1400_v61 = vmul.f32 %v3804_v56, %v3804_v56 }
 0xc80   : > { %v1401_v60 = vadd.f32 %v1398_v58, %v1397_v57 }
 0xc82   : > { %v1402_v62 = vadd.f32 %v1401_v60, %v1399_v59 }
 0xc84   : > { %v1403_v29 = vadd.f32 %v1402_v62, %v1400_v61 }
 0xc86   : > { %1404 = vadd.xlane.f32.xlu1 %v1403_v29 }
 0xc97   : > { %1437 = vperm.xlu1 %3126, %v3655_v21  }
 0xc9b   : > { %3127 = vset.pattern.permute.xlu1 %v3314_v46 }
 0xc9c   : > { %1453 = vperm.xlu1 %3127, %v3684_v54  }
 0xca0   : > { %1457 = vperm.xlu1 %3127, %v3655_v21  }
 0xca4   : > { %3128 = vset.pattern.permute.xlu1 %v3313_v9 }
 0xca5   : > { %1441 = vperm.xlu1 %3128, %v3661_v22  }
 0xca9   : > { %1445 = vperm.xlu1 %3128, %v3690_v55  }
 0xcad   : > { %3129 = vset.pattern.permute.xlu1 %v3314_v46 }
 0xcae   : > { %1461 = vperm.xlu1 %3129, %v3661_v22  }
 0xcb2   : > { %3131 = vset.pattern.permute.xlu1 %v3305_v3 }
 0xcb3   : > { %1482 = vperm.xlu1 %3131, %v2812_v15  }
 0xcb7   : > { %1487 = vperm.xlu1 %3131, %v2813_v6  }
 0xcbb   : > { %1559 = vperm.xlu1 %3131, %v3833_v16  }
 0xcbf   : > { %1564 = vperm.xlu1 %3131, %v3839_v11  }
 0xcc3   : > { %3134 = vset.pattern.permute.xlu1 %v3306_v7 }
 0xd13   : > { %v1405_v63 = vpop.xlane.xlu1 %1404 }
 0xd14   : > { %v1406_v1 = vrot.slane %v1405_v63, 4 }
 0xd16   : > { %v1407_v12 = vadd.f32 %v1406_v1, %v1405_v63 }
 0xd17   : > { %v1438_v18 = vpop.permute.xlu1 %1437 }
 0xd18   : > { %v1408_v13 = vrot.slane %v1407_v12, 2 }
 0xd1a   : > { %v1409_v28 = vadd.f32 %v1408_v13, %v1407_v12  ;;  %v3184_v12 = vld [vmem:[%s4221_s2 + $0x28] sm:$0xff]  }
 0xd1b   : > { %v1454_v2 = vpop.permute.xlu1 %1453 }
 0xd1c   : > { %v1410_v54 = vrot.slane %v1409_v28, 1 }
 0xd1e   : > { %v1411_v14 = vadd.f32 %v1410_v54, %v1409_v28 }
 0xd1f   : > { %v1458_v19 = vpop.permute.xlu1 %1457 }
 0xd20   : > { %2978 = vpush %v1411_v14 }
 0xd24   : > { %v1442_v20 = vpop.permute.xlu1 %1441 }
 0xd28   : > { %v1446_v47 = vpop.permute.xlu1 %1445 }
 0xd2d   : > { %v1462_v35 = vpop.permute.xlu1 %1461 }
 0xd51   : > { %s2979_s23 = spop %2978 }
 0xd52   : > { %s1413_s24 = smul.f32 0.00024420026, %s2979_s23 }
 0xd54   : > { %v1414_v21 = vstv %s1413_s24 }
 0xd55   : > { %3201 = vrsqrt.f32 %v1414_v21  ;;  %vm1417_vm6 = vcmp.eq.f32.partialorder %v1414_v21, inf  ;;  %v1420_v5 = vand.u32 2147483648, %v1414_v21  ;;  %vm1419_vm8 = vcmp.eq.f32.partialorder %v1414_v21, 0.0 }
 0xd5f   : > { %v3202_v4 = vpop.eup %3201 }
 0xd60   : > { %v1416_v55 = vmul.f32 %v3202_v4, %v1414_v21 }
 0xd62   : > { %v1418_v45 = vsel %vm1417_vm6, %v1414_v21, %v1416_v55 }
 0xd63   : > { %v1421_v22 = vsel %vm1419_vm8, %v1420_v5, %v1418_v45 }
 0xd64   : > { %2980 = vpush %v1421_v22 }
 0xd95   : > { %s2981_s20 = spop %2980 }
 0xd96   : > { %s1423_s22 = sadd.f32 1e-05, %s2981_s20 }
 0xd98   : > { %v1424_v36 = vstv %s1423_s22  ;;  %s2828_s22 = sld [smem:[#allocation3 + $0x4]] }
 0xd99   : > { %3203 = vrcp.f32 %v1424_v36 }
 0xd9e   : > { %v1642_v14 = vstv %s2828_s22  ;;  %s3320_s22 = smov 112  }
 0xda3   : > { %v3204_v17 = vpop.eup %3203 }
 0xda4   : > { %2982 = vpush %v3204_v17 }
 0xdd5   : > { %s2983_s23 = spop %2982 }
 0xdd6   : > { %v1427_v24 = vstv %s2983_s23 }
 0xdd7   : > { %v1429_v25 = vmul.f32 %v1427_v24, %v3800_v52  ;;  %v1430_v39 = vmul.f32 %v1427_v24, %v3802_v53  ;;  %v1431_v26 = vmul.f32 %v1427_v24, %v3804_v56  ;;  %v1428_v30 = vmul.f32 %v1427_v24, %v3798_v49  ;;  %v3862_v49 = vld [vmem:[%s4222_s3 + $0x40] sm:$0xff]  ;;  %v3868_v52 = vld [vmem:[%s4222_s3 + $0x58] sm:$0xff]  ;;  %v1483_v53 = vpop.permute.xlu1 %1482 }
 0xdd8   : > { %1554 = vperm.xlu0 %3132, %v3862_v49  }
 0xdd9   : > { %v1449_v31 = vmul.f32 %v1438_v18, %v1429_v25  ;;  %v1451_v32 = vmul.f32 %v1446_v47, %v1431_v26  ;;  %v1448_v50 = vmul.f32 %v1434_v23, %v1428_v30  ;;  %v1450_v33 = vmul.f32 %v1442_v20, %v1430_v39 }
 0xddb   : > { %v1469_v37 = vadd.f32 %v1458_v19, %v1449_v31  ;;  %v1468_v38 = vadd.f32 %v1454_v2, %v1448_v50  ;;  %v1470_v41 = vadd.f32 %v1462_v35, %v1450_v33  ;;  %v1471_v42 = vadd.f32 %v1466_v34, %v1451_v32  ;;  %v1488_v59 = vpop.permute.xlu1 %1487 }
 0xddc   : > { %1569 = vperm.xlu0 %3132, %v3868_v52  }
 0xddd   : > { %v1475_v40 = vpack.c.bf16 %v1469_v37, %v1468_v38  ;;  %v1476_v43 = vpack.c.bf16 %v1471_v42, %v1470_v41 }
 0xddf   : > { %2917 = vmatpush3.bf16.msra.mxu1 %v1475_v40  ;;  %v1560_v13 = vpop.permute.xlu1 %1559 }
 0xde0   : > { %2918 = vmatprep.subr.bf16.mxu1 %v3308_v27  ;;  %3133 = vset.pattern.permute.xlu0 %v3306_v7 }
 0xde3   : > { %2919 = vmatpush3.bf16.msra.mxu1 %v1476_v43  ;;  %v1565_v54 = vpop.permute.xlu1 %1564 }
 0xde4   : > { %2930 = vmatprep.subr.bf16.mxu1 %v3308_v27 }
 0xde6   : > { %2921 = vmatmul.mubr.msk.bf16.vlgmr.msra.gmra.mrb[4].mxu1 %vm912_vm4, %v3182_v44 }
 0xde7   : > { %2934 = vmatprep.mubr.msk.bf16.mxu1 %vm3315_vm3, %v3308_v27 }
 0xe57   : > { %v1555_v28 = vpop.permute.xlu0 %1554 }
 0xeb9   : > { %v1532_v56 = vpop.f32.mrb[4].mxu1 }
 0xeba   : > { %v1533_v57 = vadd.f32 %v1532_v56, %v1483_v53  ;;  %v2922_v58 = vpop.f32.mrb[5].mxu1 }
 0xebb   : > { %v1535_v60 = vpop.f32.mrb[6].mxu1 }
 0xebc   : > { %v1536_v61 = vadd.f32 %v1535_v60, %v1488_v59  ;;  %v2923_v62 = vpop.f32.mrb[7].mxu1  ;;  %v3873_v29 = vadd.f32 %v1533_v57, %v3695_v0 }
 0xebe   : > { %v3876_v63 = vadd.f32 %v1536_v61, %v3698_v10  ;;  %v1570_v10 = vpop.permute.xlu0 %1569 }
 0xec0   : > { %v1551_v1 = vpack.c.bf16 %v3876_v63, %v3873_v29 }
 0xec2   : > { %2924 = vmatprep.subr.bf16.mxu0 %v1551_v1 }
 0xec3   : > { %2925 = vmatpush3.bf16.msra.mxu0 %v1551_v1 }
 0xec6   : > { %2927 = vmatmul.mubr.msk.bf16.vlgmr.msra.gmra.mrb[8].mxu0 %vm394_vm0, %v3184_v12  ;;  %v2829_v12 = vld [vmem:[%s4224_s5 + $0x40] sm:$0xff] }
 0xf99   : > { %v2928_v0 = vpop.f32.mrb[8].mxu0 }
 0xf9a   : > { %v1622_v21 = vpop.f32.mrb[9].mxu0  ;;  %v1631_v4 = vadd.f32 %v2928_v0, %v1565_v54 }
 0xf9b   : > { %v1623_v55 = vadd.f32 %v1622_v21, %v1555_v28  ;;  %v2929_v5 = vpop.f32.mrb[10].mxu0 }
 0xf9c   : > { %v1625_v45 = vpop.f32.mrb[11].mxu0  ;;  %v1634_v15 = vadd.f32 %v2929_v5, %v1570_v10  ;;  %v1645_v36 = vmul.f32 %v1642_v14, %v1631_v4  ;;  %vm1640_vm12 = vcmp.ge.f32.partialorder %v1631_v4, 0.0 }
 0xf9d   : > { %v1643_v22 = vmul.f32 %v1642_v14, %v1623_v55  ;;  %v1626_v6 = vadd.f32 %v1625_v45, %v1560_v13  ;;  %vm1638_vm10 = vcmp.ge.f32.partialorder %v1623_v55, 0.0  ;;  %v2831_v13 = vld [vmem:[%s4224_s5 + $0x50] sm:$0xff] }
 0xf9e   : > { %v1646_v2 = vmul.f32 %v1642_v14, %v1634_v15  ;;  %vm1641_vm13 = vcmp.ge.f32.partialorder %v1634_v15, 0.0  ;;  %v1649_v47 = vsel %vm1640_vm12, %v1631_v4, %v1645_v36 }
 0xf9f   : > { %vm1639_vm11 = vcmp.ge.f32.partialorder %v1626_v6, 0.0  ;;  %v1644_v17 = vmul.f32 %v1642_v14, %v1626_v6  ;;  %v1647_v18 = vsel %vm1638_vm10, %v1623_v55, %v1643_v22 }
 0xfa0   : > { %v1650_v24 = vsel %vm1641_vm13, %v1634_v15, %v1646_v2 }
 0xfa1   : > { %v1648_v19 = vsel %vm1639_vm11, %v1626_v6, %v1644_v17 }
 0xfa2   : > { %v1651_v20 = vadd.f32 %v1648_v19, %v1647_v18 }
 0xfa4   : > { %v1652_v23 = vadd.f32 %v1651_v20, %v1649_v47 }
 0xfa6   : > { %v1653_v25 = vadd.f32 %v1652_v23, %v1650_v24 }
 0xfa8   : > { %1654 = vadd.xlane.f32.xlu1 %v1653_v25 }
 0xfb9   : > { %1709 = vperm.xlu1 %3134, %v3833_v16  }
 0xfbd   : > { %1713 = vperm.xlu1 %3134, %v3839_v11  }
 0xfc1   : > { %3135 = vset.pattern.permute.xlu1 %v3307_v8 }
 0xfc2   : > { %1725 = vperm.xlu1 %3135, %v3862_v49  }
 0xfc6   : > { %1729 = vperm.xlu1 %3135, %v3833_v16  }
 0xfca   : > { %3136 = vset.pattern.permute.xlu1 %v3306_v7 }
 0xfcb   : > { %1717 = vperm.xlu1 %3136, %v3868_v52  }
 0xfcf   : > { %3137 = vset.pattern.permute.xlu1 %v3307_v8 }
 0xfd0   : > { %1733 = vperm.xlu1 %3137, %v3839_v11  }
 0xfd4   : > { %1737 = vperm.xlu1 %3137, %v3868_v52  }
 0xfd8   : > { %3138 = vset.pattern.permute.xlu1 %v3305_v3 }
 0xfd9   : > { %1826 = vperm.xlu1 %3138, %v2829_v12  }
 0xfdd   : > { %1834 = vperm.xlu1 %3138, %v2831_v13  }
 0xfe1   : > { %3141 = vset.pattern.permute.xlu1 %v3307_v8 }
0x1035   : > { %v1655_v39 = vpop.xlane.xlu1 %1654 }
0x1036   : > { %v1656_v26 = vrot.slane %v1655_v39, 4 }
0x1038   : > { %v1657_v30 = vadd.f32 %v1656_v26, %v1655_v39  ;;  %v2832_v26 = vld [vmem:[%s4224_s5 + $0x58] sm:$0xff] }
0x1039   : > { %v1710_v5 = vpop.permute.xlu1 %1709 }
0x103a   : > { %v1658_v31 = vrot.slane %v1657_v30, 2 }
0x103c   : > { %v1659_v32 = vadd.f32 %v1658_v31, %v1657_v30 }
0x103d   : > { %v1714_v45 = vpop.permute.xlu1 %1713 }
0x103e   : > { %v1660_v50 = vrot.slane %v1659_v32, 1 }
0x1040   : > { %v1661_v33 = vadd.f32 %v1660_v50, %v1659_v32 }
0x1041   : > { %v1726_v22 = vpop.permute.xlu1 %1725 }
0x1042   : > { %2984 = vpush %v1661_v33 }
0x1045   : > { %v1730_v15 = vpop.permute.xlu1 %1729 }
0x104a   : > { %v1718_v23 = vpop.permute.xlu1 %1717 }
0x104f   : > { %v1734_v39 = vpop.permute.xlu1 %1733 }
0x1053   : > { %v1738_v33 = vpop.permute.xlu1 %1737 }
0x1073   : > { %s2985_s23 = spop %2984 }
0x1074   : > { %s1663_s24 = smul.f32 0.00024414063, %s2985_s23  ;;  %s2857_s23 = sld [smem:[#allocation3 + $0x7]] }
0x1076   : > { %v1664_v35 = vstv %s1663_s24 }
0x1077   : > { %v1665_v34 = vsub.f32 %v1647_v18, %v1664_v35  ;;  %v1666_v37 = vsub.f32 %v1648_v19, %v1664_v35  ;;  %v1667_v38 = vsub.f32 %v1649_v47, %v1664_v35  ;;  %v3895_v40 = vsub.f32 %v1650_v24, %v1664_v35  ;;  %v2830_v24 = vld [vmem:[%s4224_s5 + $0x48] sm:$0xff] }
0x1079   : > { %v1669_v41 = vmul.f32 %v1665_v34, %v1665_v34  ;;  %v1670_v42 = vmul.f32 %v1666_v37, %v1666_v37  ;;  %v1671_v43 = vmul.f32 %v1667_v38, %v1667_v38  ;;  %v1672_v48 = vmul.f32 %v3895_v40, %v3895_v40 }
0x107b   : > { %v1673_v44 = vadd.f32 %v1670_v42, %v1669_v41 }
0x107d   : > { %v1674_v53 = vadd.f32 %v1673_v44, %v1671_v43 }
0x107f   : > { %v1675_v56 = vadd.f32 %v1674_v53, %v1672_v48 }
0x1081   : > { %1676 = vadd.xlane.f32.xlu0 %v1675_v56 }
0x1097   : > { %1705 = vperm.xlu0 %3133, %v3862_v49  }
0x109b   : > { %3139 = vset.pattern.permute.xlu0 %v3307_v8 }
0x109c   : > { %1887 = vperm.xlu0 %3139, %v2829_v12  }
0x10a0   : > { %3140 = vset.pattern.permute.xlu0 %v3305_v3 }
0x110e   : > { %v1677_v57 = vpop.xlane.xlu0 %1676 }
0x110f   : > { %v1678_v58 = vrot.slane %v1677_v57, 4 }
0x1111   : > { %v1679_v59 = vadd.f32 %v1678_v58, %v1677_v57 }
0x1113   : > { %v1680_v60 = vrot.slane %v1679_v59, 2 }
0x1115   : > { %v1681_v61 = vadd.f32 %v1680_v60, %v1679_v59 }
0x1116   : > { %v1706_v36 = vpop.permute.xlu0 %1705 }
0x1117   : > { %v1682_v62 = vrot.slane %v1681_v61, 1 }
0x1119   : > { %v1683_v1 = vadd.f32 %v1682_v62, %v1681_v61 }
0x111b   : > { %2986 = vpush %v1683_v1 }
0x114c   : > { %s2987_s25 = spop %2986 }
0x114d   : > { %s1685_s17 = smul.f32 0.00024420026, %s2987_s25 }
0x114f   : > { %v1686_v28 = vstv %s1685_s17 }
0x1150   : > { %3205 = vrsqrt.f32 %v1686_v28  ;;  %vm1689_vm14 = vcmp.eq.f32.partialorder %v1686_v28, inf  ;;  %v1692_v14 = vand.u32 2147483648, %v1686_v28  ;;  %vm1691_vm15 = vcmp.eq.f32.partialorder %v1686_v28, 0.0 }
0x115a   : > { %v3206_v54 = vpop.eup %3205 }
0x115b   : > { %v1688_v0 = vmul.f32 %v3206_v54, %v1686_v28 }
0x115d   : > { %v1690_v21 = vsel %vm1689_vm14, %v1686_v28, %v1688_v0 }
0x115e   : > { %v1693_v10 = vsel %vm1691_vm15, %v1692_v14, %v1690_v21 }
0x115f   : > { %2988 = vpush %v1693_v10 }
0x1190   : > { %s2989_s18 = spop %2988 }
0x1191   : > { %s1695_s19 = sadd.f32 1e-05, %s2989_s18 }
0x1193   : > { %v1696_v4 = vstv %s1695_s19 }
0x1194   : > { %3207 = vrcp.f32 %v1696_v4 }
0x119e   : > { %v3208_v55 = vpop.eup %3207 }
0x119f   : > { %2990 = vpush %v3208_v55 }
0x11d0   : > { %s2991_s20 = spop %2990 }
0x11d1   : > { %v1699_v6 = vstv %s2991_s20 }
0x11d2   : > { %v1701_v17 = vmul.f32 %v1699_v6, %v1666_v37  ;;  %v1700_v18 = vmul.f32 %v1699_v6, %v1665_v34  ;;  %v1702_v25 = vmul.f32 %v1699_v6, %v1667_v38  ;;  %v1703_v30 = vmul.f32 %v1699_v6, %v3895_v40  ;;  %v1827_v34 = vpop.permute.xlu1 %1826  ;;  %v1888_v37 = vpop.permute.xlu0 %1887 }
0x11d4   : > { %v1721_v2 = vmul.f32 %v1710_v5, %v1701_v17  ;;  %v1720_v19 = vmul.f32 %v1706_v36, %v1700_v18  ;;  %v1722_v31 = vmul.f32 %v1714_v45, %v1702_v25  ;;  %v1723_v50 = vmul.f32 %v1718_v23, %v1703_v30 }
0x11d6   : > { %v3909_v20 = vadd.f32 %v1726_v22, %v1720_v19  ;;  %v3911_v47 = vadd.f32 %v1730_v15, %v1721_v2  ;;  %v3924_v32 = vadd.f32 %v1734_v39, %v1722_v31  ;;  %v3929_v35 = vadd.f32 %v1738_v33, %v1723_v50  ;;  %v1835_v38 = vpop.permute.xlu1 %1834 }
0x11d8   : > { %1797 = vrot.lane.b32.xlu1 %v3909_v20, %s3309_s21  ;;  %1799 = vrot.lane.b32.xlu0 %v3911_v47, %s3309_s21 }
0x11dc   : > { %1891 = vperm.xlu1 %3141, %v2830_v24   ;;  %1830 = vperm.xlu0 %3140, %v2830_v24  }
0x11e0   : > { %1895 = vperm.xlu1 %3141, %v2831_v13   ;;  %1838 = vperm.xlu0 %3140, %v2832_v26  }
0x11e4   : > { %3142 = vset.pattern.permute.xlu0 %v3306_v7  ;;  %1801 = vrot.lane.b32.xlu1 %v3924_v32, %s3309_s21 }
0x11e5   : > { %1751 = vperm.xlu0 %3142, %v2829_v12  }
0x11e8   : > { %1803 = vrot.lane.b32.xlu1 %v3929_v35, %s3309_s21 }
0x11e9   : > { %3144 = vset.pattern.permute.xlu0 %v3310_v51 }
0x11ea   : > { %1774 = vperm.xlu0 %3144, %v3862_v49  }
0x11ec   : > { %1899 = vperm.xlu1 %3141, %v2832_v26  }
0x11ee   : > { %1782 = vperm.xlu0 %3144, %v3839_v11  }
0x11f0   : > { %3143 = vset.pattern.permute.xlu1 %v3306_v7 }
0x11f1   : > { %1756 = vperm.xlu1 %3143, %v2830_v24  }
0x11f2   : > { %3148 = vset.pattern.permute.xlu0 %v3313_v9 }
0x11f5   : > { %1761 = vperm.xlu1 %3143, %v2831_v13  }
0x11f9   : > { %3145 = vset.pattern.permute.xlu1 %v3310_v51 }
0x11fa   : > { %1778 = vperm.xlu1 %3145, %v3833_v16  }
0x11fe   : > { %3146 = vset.pattern.permute.xlu1 %v3306_v7 }
0x11ff   : > { %1766 = vperm.xlu1 %3146, %v2832_v26  }
0x1203   : > { %3147 = vset.pattern.permute.xlu1 %v3310_v51 }
0x1204   : > { %1786 = vperm.xlu1 %3147, %v3868_v52  }
0x1208   : > { %3149 = vset.pattern.permute.xlu1 %v3313_v9 }
0x124a   : > { %v1800_v40 = vpop.permute.xlu0 %1799  ;;  %v1798_v41 = vpop.permute.xlu1 %1797 }
0x124b   : > { %1811 = vst.msk [vmem:[#allocation2 + $0x10] sm:$0xff] %vm645_vm9, %v1800_v40  ;;  %1809 = vst.msk [vmem:[#allocation2] sm:$0xff] %vm645_vm9, %v1798_v41 }
0x124c   : > { %1812 = vst.msk [vmem:[#allocation2 + $0x18] sm:$0xff] %vm339_vm7, %v1800_v40  ;;  %1810 = vst.msk [vmem:[#allocation2 + $0x8] sm:$0xff] %vm339_vm7, %v1798_v41 }
0x1252   : > { %v1817_v43 = vld [vmem:[#allocation2] sm:$0xff]  ;;  %v1819_v53 = vld [vmem:[#allocation2 + $0x10] sm:$0xff] }
0x1253   : > { %v1818_v42 = vld [vmem:[#allocation2 + $0x8] sm:$0xff]  ;;  %v1841_v48 = vmul.f32 %v1827_v34, %v1817_v43  ;;  %v1820_v56 = vld [vmem:[#allocation2 + $0x18] sm:$0xff]  ;;  %v1902_v14 = vmul.f32 %v1888_v37, %v1817_v43 }
0x1254   : > { %v1842_v44 = vmul.f32 %v1827_v34, %v1818_v42  ;;  %v1903_v0 = vmul.f32 %v1888_v37, %v1818_v42 }
0x1255   : > { %1857 = vrot.lane.b32.xlu0 %v1841_v48, %s3318_s10 }
0x1256   : > { %1859 = vrot.lane.b32.xlu1 %v1842_v44, %s3318_s10 }
0x125b   : > { %v1831_v57 = vpop.permute.xlu0 %1830  ;;  %v1892_v58 = vpop.permute.xlu1 %1891 }
0x125c   : > { %v1843_v59 = vmul.f32 %v1831_v57, %v1819_v53  ;;  %v1844_v60 = vmul.f32 %v1831_v57, %v1820_v56  ;;  %v1904_v21 = vmul.f32 %v1892_v58, %v1819_v53  ;;  %v1905_v10 = vmul.f32 %v1892_v58, %v1820_v56 }
0x125e   : > { %1863 = vrot.lane.b32.xlu1 %v1844_v60, %s3318_s10  ;;  %1861 = vrot.lane.b32.xlu0 %v1843_v59, %s3318_s10 }
0x125f   : > { %v1896_v61 = vpop.permute.xlu1 %1895  ;;  %v1839_v5 = vpop.permute.xlu0 %1838 }
0x1263   : > { %v1802_v62 = vpop.permute.xlu1 %1801 }
0x1264   : > { %1813 = vst.msk [vmem:[#allocation2 + $0x20] sm:$0xff] %vm645_vm9, %v1802_v62  ;;  %v1752_v24 = vpop.permute.xlu0 %1751 }
0x1265   : > { %1814 = vst.msk [vmem:[#allocation2 + $0x28] sm:$0xff] %vm339_vm7, %v1802_v62  ;;  %v1769_v44 = vmul.f32 %v1752_v24, %v3909_v20 }
0x1267   : > { %v1804_v1 = vpop.permute.xlu1 %1803 }
0x1268   : > { %1815 = vst.msk [vmem:[#allocation2 + $0x30] sm:$0xff] %vm645_vm9, %v1804_v1 }
0x1269   : > { %1816 = vst.msk [vmem:[#allocation2 + $0x38] sm:$0xff] %vm339_vm7, %v1804_v1  ;;  %v1775_v39 = vpop.permute.xlu0 %1774 }
0x126a   : > { %v1789_v59 = vadd.f32 %v1775_v39, %v1769_v44 }
0x126b   : > { %v1821_v13 = vld [vmem:[#allocation2 + $0x20] sm:$0xff]  ;;  %v1900_v36 = vpop.permute.xlu1 %1899 }
0x126c   : > { %v1822_v12 = vld [vmem:[#allocation2 + $0x28] sm:$0xff]  ;;  %v1845_v54 = vmul.f32 %v1835_v38, %v1821_v13  ;;  %v1906_v6 = vmul.f32 %v1896_v61, %v1821_v13 }
0x126d   : > { %v1846_v28 = vmul.f32 %v1835_v38, %v1822_v12  ;;  %v1907_v15 = vmul.f32 %v1896_v61, %v1822_v12  ;;  %v1783_v26 = vpop.permute.xlu0 %1782 }
0x126e   : > { %1865 = vrot.lane.b32.xlu0 %v1845_v54, %s3318_s10 }
0x126f   : > { %1867 = vrot.lane.b32.xlu1 %v1846_v28, %s3318_s10  ;;  %v1823_v4 = vld [vmem:[#allocation2 + $0x30] sm:$0xff] }
0x1270   : > { %v1824_v55 = vld [vmem:[#allocation2 + $0x38] sm:$0xff]  ;;  %v1847_v22 = vmul.f32 %v1839_v5, %v1823_v4  ;;  %v1908_v17 = vmul.f32 %v1900_v36, %v1823_v4  ;;  %v1757_v2 = vpop.permute.xlu1 %1756 }
0x1271   : > { %v1848_v45 = vmul.f32 %v1839_v5, %v1824_v55  ;;  %v1909_v18 = vmul.f32 %v1900_v36, %v1824_v55  ;;  %v1770_v42 = vmul.f32 %v1757_v2, %v3911_v47 }
0x1272   : > { %1918 = vrot.lane.b32.xlu0 %v1902_v14, %s3319_s12 }
0x1273   : > { %1920 = vrot.lane.b32.xlu1 %v1903_v0, %s3319_s12  ;;  %v1952_v0 = vstv %s2833_s13 }
0x1274   : > { %v1762_v19 = vpop.permute.xlu1 %1761 }
0x1275   : > { %v1771_v60 = vmul.f32 %v1762_v19, %v3924_v32 }
0x1276   : > { %1922 = vrot.lane.b32.xlu0 %v1904_v21, %s3319_s12 }
0x1277   : > { %1924 = vrot.lane.b32.xlu1 %v1905_v10, %s3319_s12  ;;  %v1791_v28 = vadd.f32 %v1783_v26, %v1771_v60 }
0x1279   : > { %v1779_v23 = vpop.permute.xlu1 %1778 }
0x127a   : > { %1869 = vrot.lane.b32.xlu0 %v1847_v22, %s3318_s10  ;;  %v1790_v48 = vadd.f32 %v1779_v23, %v1770_v42 }
0x127b   : > { %1871 = vrot.lane.b32.xlu1 %v1848_v45, %s3318_s10 }
0x127e   : > { %1926 = vrot.lane.b32.xlu0 %v1906_v6, %s3319_s12  ;;  %v1767_v25 = vpop.permute.xlu1 %1766 }
0x127f   : > { %1928 = vrot.lane.b32.xlu1 %v1907_v15, %s3319_s12  ;;  %v1772_v14 = vmul.f32 %v1767_v25, %v3929_v35 }
0x1282   : > { %1930 = vrot.lane.b32.xlu0 %v1908_v17, %s3319_s12 }
0x1283   : > { %1932 = vrot.lane.b32.xlu1 %v1909_v18, %s3319_s12  ;;  %v1787_v30 = vpop.permute.xlu1 %1786 }
0x1284   : > { %v1792_v45 = vadd.f32 %v1787_v30, %v1772_v14 }
0x12c7   : > { %v1858_v31 = vpop.permute.xlu0 %1857 }
0x12c8   : > { %v1860_v50 = vpop.permute.xlu1 %1859 }
0x12c9   : > { %v1874_v57 = vsel %vm1873_vm1, %v1858_v31, %v1860_v50 }
0x12ca   : > { %v1882_v62 = vadd.f32 %v1874_v57, %v1789_v59 }
0x12d0   : > { %v1862_v33 = vpop.permute.xlu0 %1861  ;;  %v1864_v34 = vpop.permute.xlu1 %1863 }
0x12d1   : > { %v1875_v43 = vsel %vm1873_vm1, %v1862_v33, %v1864_v34 }
0x12d2   : > { %v1883_v61 = vadd.f32 %v1875_v43, %v1790_v48 }
0x12e0   : > { %v1866_v37 = vpop.permute.xlu0 %1865 }
0x12e1   : > { %v1868_v38 = vpop.permute.xlu1 %1867 }
0x12e2   : > { %v1876_v20 = vsel %vm1873_vm1, %v1866_v37, %v1868_v38 }
0x12e3   : > { %v1884_v21 = vadd.f32 %v1876_v20, %v1791_v28 }
0x12e4   : > { %v1919_v40 = vpop.permute.xlu0 %1918 }
0x12e5   : > { %v1921_v41 = vpop.permute.xlu1 %1920 }
0x12e6   : > { %v1935_v47 = vsel %vm1934_vm2, %v1919_v40, %v1921_v41 }
0x12e7   : > { %v1943_v54 = vadd.f32 %v1935_v47, %v1882_v62 }
0x12e8   : > { %v1923_v53 = vpop.permute.xlu0 %1922 }
0x12e9   : > { %v1925_v56 = vpop.permute.xlu1 %1924  ;;  %v1953_v22 = vmul.f32 %v1952_v0, %v1943_v54  ;;  %vm1948_vm6 = vcmp.ge.f32.partialorder %v1943_v54, 0.0 }
0x12ea   : > { %v1936_v58 = vsel %vm1934_vm2, %v1923_v53, %v1925_v56 }
0x12eb   : > { %v1944_v1 = vadd.f32 %v1936_v58, %v1883_v61  ;;  %v1957_v19 = vsel %vm1948_vm6, %v1943_v54, %v1953_v22 }
0x12ec   : > { %v1870_v12 = vpop.permute.xlu0 %1869 }
0x12ed   : > { %v1872_v13 = vpop.permute.xlu1 %1871  ;;  %v1954_v10 = vmul.f32 %v1952_v0, %v1944_v1  ;;  %vm1949_vm5 = vcmp.ge.f32.partialorder %v1944_v1, 0.0 }
0x12ee   : > { %v1877_v32 = vsel %vm1873_vm1, %v1870_v12, %v1872_v13 }
0x12ef   : > { %v1958_v6 = vsel %vm1949_vm5, %v1944_v1, %v1954_v10  ;;  %v1885_v36 = vadd.f32 %v1877_v32, %v1792_v45  ;;  %v2837_v10 = vld [vmem:[%s4226_s7 + $0x28] sm:$0xff] }
0x12f0   : > { %v1927_v4 = vpop.permute.xlu0 %1926  ;;  %v1961_v25 = vadd.f32 %v1958_v6, %v1957_v19 }
0x12f1   : > { %v1929_v55 = vpop.permute.xlu1 %1928 }
0x12f2   : > { %v1937_v5 = vsel %vm1934_vm2, %v1927_v4, %v1929_v55  ;;  %v4011_v4 = vld [vmem:[%s4222_s3 + $0x68] sm:$0xff]  ;;  %v4017_v55 = vld [vmem:[%s4222_s3 + $0x70] sm:$0xff] }
0x12f3   : > { %v1945_v15 = vadd.f32 %v1937_v5, %v1884_v21  ;;  %v2836_v21 = vld [vmem:[%s4226_s7 + $0x20] sm:$0xff] }
0x12f4   : > { %v1931_v18 = vpop.permute.xlu0 %1930 }
0x12f5   : > { %vm1950_vm8 = vcmp.ge.f32.partialorder %v1945_v15, 0.0  ;;  %v1955_v17 = vmul.f32 %v1952_v0, %v1945_v15  ;;  %v1933_v2 = vpop.permute.xlu1 %1932 }
0x12f6   : > { %v1938_v35 = vsel %vm1934_vm2, %v1931_v18, %v1933_v2 }
0x12f7   : > { %v1946_v23 = vadd.f32 %v1938_v35, %v1885_v36  ;;  %v1959_v24 = vsel %vm1950_vm8, %v1945_v15, %v1955_v17 }
0x12f8   : > { %v1962_v26 = vadd.f32 %v1961_v25, %v1959_v24 }
0x12f9   : > { %v1956_v39 = vmul.f32 %v1952_v0, %v1946_v23  ;;  %vm1951_vm10 = vcmp.ge.f32.partialorder %v1946_v23, 0.0 }
0x12fb   : > { %v1960_v31 = vsel %vm1951_vm10, %v1946_v23, %v1956_v39 }
0x12fc   : > { %v1963_v30 = vadd.f32 %v1962_v26, %v1960_v31 }
0x12fe   : > { %1964 = vadd.xlane.f32.xlu0 %v1963_v30 }
0x1314   : > { %2015 = vperm.xlu0 %3148, %v3862_v49  }
0x1318   : > { %3153 = vset.pattern.permute.xlu0 %v3314_v46 }
0x1319   : > { %2047 = vperm.xlu0 %3153, %v3868_v52  }
0x131d   : > { %3155 = vset.pattern.permute.xlu0 %v3305_v3 }
0x138b   : > { %v1965_v50 = vpop.xlane.xlu0 %1964 }
0x138c   : > { %v1966_v33 = vrot.slane %v1965_v50, 4 }
0x138e   : > { %v1967_v34 = vadd.f32 %v1966_v33, %v1965_v50 }
0x1390   : > { %v1968_v37 = vrot.slane %v1967_v34, 2 }
0x1392   : > { %v1969_v38 = vadd.f32 %v1968_v37, %v1967_v34 }
0x1393   : > { %v2016_v17 = vpop.permute.xlu0 %2015 }
0x1394   : > { %v1970_v40 = vrot.slane %v1969_v38, 1 }
0x1396   : > { %v1971_v41 = vadd.f32 %v1970_v40, %v1969_v38 }
0x1398   : > { %2992 = vpush %v1971_v41  ;;  %v2048_v30 = vpop.permute.xlu0 %2047  ;;  %v3185_v41 = vld [vmem:[%s4225_s6 + $0x10] sm:$0xff]  }
0x13c9   : > { %s2993_s25 = spop %2992 }
0x13ca   : > { %s1973_s17 = smul.f32 0.00024414063, %s2993_s25 }
0x13cc   : > { %v1974_v42 = vstv %s1973_s17 }
0x13cd   : > { %v3976_v43 = vsub.f32 %v1957_v19, %v1974_v42  ;;  %v3978_v44 = vsub.f32 %v1958_v6, %v1974_v42  ;;  %v3980_v48 = vsub.f32 %v1959_v24, %v1974_v42  ;;  %v3982_v53 = vsub.f32 %v1960_v31, %v1974_v42  ;;  %v3186_v42 = vld [vmem:[%s4221_s2 + $0x30] sm:$0xff]  }
0x13ce   : > { %2940 = vmatprep.mubr.msk.bf16.mxu0 %vm394_vm0, %v3186_v42 }
0x13cf   : > { %v1979_v56 = vmul.f32 %v3976_v43, %v3976_v43  ;;  %v1980_v57 = vmul.f32 %v3978_v44, %v3978_v44  ;;  %v1981_v58 = vmul.f32 %v3980_v48, %v3980_v48  ;;  %v1982_v60 = vmul.f32 %v3982_v53, %v3982_v53 }
0x13d1   : > { %v1983_v59 = vadd.f32 %v1980_v57, %v1979_v56 }
0x13d3   : > { %v1984_v61 = vadd.f32 %v1983_v59, %v1981_v58 }
0x13d5   : > { %v1985_v47 = vadd.f32 %v1984_v61, %v1982_v60 }
0x13d7   : > { %1986 = vadd.xlane.f32.xlu1 %v1985_v47 }
0x13e8   : > { %2019 = vperm.xlu1 %3149, %v3833_v16  }
0x13ec   : > { %3150 = vset.pattern.permute.xlu1 %v3314_v46 }
0x13ed   : > { %2035 = vperm.xlu1 %3150, %v3862_v49  }
0x13f1   : > { %2039 = vperm.xlu1 %3150, %v3833_v16  }
0x13f5   : > { %3151 = vset.pattern.permute.xlu1 %v3313_v9 }
0x13f6   : > { %2023 = vperm.xlu1 %3151, %v3839_v11  }
0x13fa   : > { %2027 = vperm.xlu1 %3151, %v3868_v52  }
0x13fe   : > { %3152 = vset.pattern.permute.xlu1 %v3314_v46 }
0x13ff   : > { %2043 = vperm.xlu1 %3152, %v3839_v11  }
0x1403   : > { %3154 = vset.pattern.permute.xlu1 %v3305_v3 }
0x1404   : > { %2064 = vperm.xlu1 %3154, %v2836_v21  }
0x1408   : > { %2069 = vperm.xlu1 %3154, %v2837_v10  }
0x140c   : > { %2141 = vperm.xlu1 %3154, %v4011_v4  }
0x1410   : > { %2146 = vperm.xlu1 %3154, %v4017_v55  }
0x1414   : > { %3157 = vset.pattern.permute.xlu1 %v3306_v7 }
0x1464   : > { %v1987_v62 = vpop.xlane.xlu1 %1986 }
0x1465   : > { %v1988_v1 = vrot.slane %v1987_v62, 4 }
0x1467   : > { %v1989_v12 = vadd.f32 %v1988_v1, %v1987_v62 }
0x1468   : > { %v2020_v45 = vpop.permute.xlu1 %2019 }
0x1469   : > { %v1990_v13 = vrot.slane %v1989_v12, 2 }
0x146b   : > { %v1991_v20 = vadd.f32 %v1990_v13, %v1989_v12  ;;  %v3187_v12 = vld [vmem:[%s4221_s2 + $0x38] sm:$0xff]  }
0x146c   : > { %v2036_v22 = vpop.permute.xlu1 %2035 }
0x146d   : > { %v1992_v49 = vrot.slane %v1991_v20, 1 }
0x146f   : > { %v1993_v28 = vadd.f32 %v1992_v49, %v1991_v20 }
0x1470   : > { %v2040_v15 = vpop.permute.xlu1 %2039 }
0x1471   : > { %2994 = vpush %v1993_v28 }
0x1475   : > { %v2024_v6 = vpop.permute.xlu1 %2023 }
0x1479   : > { %v2028_v36 = vpop.permute.xlu1 %2027 }
0x147e   : > { %v2044_v31 = vpop.permute.xlu1 %2043 }
0x14a2   : > { %s2995_s18 = spop %2994 }
0x14a3   : > { %s1995_s19 = smul.f32 0.00024420026, %s2995_s18 }
0x14a5   : > { %v1996_v16 = vstv %s1995_s19 }
0x14a6   : > { %3209 = vrsqrt.f32 %v1996_v16  ;;  %vm1999_vm11 = vcmp.eq.f32.partialorder %v1996_v16, inf  ;;  %v2002_v0 = vand.u32 2147483648, %v1996_v16  ;;  %vm2001_vm12 = vcmp.eq.f32.partialorder %v1996_v16, 0.0 }
0x14b0   : > { %v3210_v54 = vpop.eup %3209 }
0x14b1   : > { %v1998_v52 = vmul.f32 %v3210_v54, %v1996_v16 }
0x14b3   : > { %v2000_v14 = vsel %vm1999_vm11, %v1996_v16, %v1998_v52 }
0x14b4   : > { %v2003_v11 = vsel %vm2001_vm12, %v2002_v0, %v2000_v14 }
0x14b5   : > { %2996 = vpush %v2003_v11 }
0x14e6   : > { %s2997_s25 = spop %2996 }
0x14e7   : > { %s2005_s17 = sadd.f32 1e-05, %s2997_s25 }
0x14e9   : > { %v2006_v32 = vstv %s2005_s17  ;;  %s2852_s17 = sld [smem:[#allocation3 + $0x6]] }
0x14ea   : > { %3211 = vrcp.f32 %v2006_v32 }
0x14ef   : > { %v2224_v28 = vstv %s2852_s17 }
0x14f4   : > { %v3212_v5 = vpop.eup %3211 }
0x14f5   : > { %2998 = vpush %v3212_v5 }
0x1526   : > { %s2999_s18 = spop %2998 }
0x1527   : > { %v2009_v18 = vstv %s2999_s18 }
0x1528   : > { %v2011_v2 = vmul.f32 %v2009_v18, %v3978_v44  ;;  %v2013_v35 = vmul.f32 %v2009_v18, %v3982_v53  ;;  %v2010_v19 = vmul.f32 %v2009_v18, %v3976_v43  ;;  %v2012_v23 = vmul.f32 %v2009_v18, %v3980_v48  ;;  %v4040_v43 = vld [vmem:[%s4222_s3 + $0x60] sm:$0xff]  ;;  %v4046_v44 = vld [vmem:[%s4222_s3 + $0x78] sm:$0xff]  ;;  %v2065_v48 = vpop.permute.xlu1 %2064 }
0x1529   : > { %2136 = vperm.xlu0 %3155, %v4040_v43  }
0x152a   : > { %v2031_v24 = vmul.f32 %v2020_v45, %v2011_v2  ;;  %v2033_v25 = vmul.f32 %v2028_v36, %v2013_v35  ;;  %v2030_v39 = vmul.f32 %v2016_v17, %v2010_v19  ;;  %v2032_v26 = vmul.f32 %v2024_v6, %v2012_v23 }
0x152c   : > { %v2051_v50 = vadd.f32 %v2040_v15, %v2031_v24  ;;  %v2050_v33 = vadd.f32 %v2036_v22, %v2030_v39  ;;  %v2052_v37 = vadd.f32 %v2044_v31, %v2032_v26  ;;  %v2053_v38 = vadd.f32 %v2048_v30, %v2033_v25  ;;  %v2070_v58 = vpop.permute.xlu1 %2069 }
0x152d   : > { %2151 = vperm.xlu0 %3155, %v4046_v44  }
0x152e   : > { %v2057_v34 = vpack.c.bf16 %v2051_v50, %v2050_v33  ;;  %v2058_v40 = vpack.c.bf16 %v2053_v38, %v2052_v37 }
0x1530   : > { %2931 = vmatpush3.bf16.msra.mxu1 %v2057_v34  ;;  %v2142_v13 = vpop.permute.xlu1 %2141 }
0x1531   : > { %2932 = vmatprep.subr.bf16.mxu1 %v3308_v27  ;;  %3156 = vset.pattern.permute.xlu0 %v3306_v7 }
0x1534   : > { %2933 = vmatpush3.bf16.msra.mxu1 %v2058_v40  ;;  %v2147_v49 = vpop.permute.xlu1 %2146 }
0x1535   : > { %2944 = vmatprep.subr.bf16.mxu1 %v3308_v27 }
0x1537   : > { %2935 = vmatmul.mubr.msk.bf16.vlgmr.msra.gmra.mrb[8].mxu1 %vm912_vm4, %v3185_v41 }
0x1538   : > { %2948 = vmatprep.mubr.msk.bf16.mxu1 %vm3315_vm3, %v3308_v27 }
0x15a8   : > { %v2137_v20 = vpop.permute.xlu0 %2136 }
0x160a   : > { %v2114_v53 = vpop.f32.mrb[8].mxu1 }
0x160b   : > { %v2115_v56 = vadd.f32 %v2114_v53, %v2065_v48  ;;  %v2936_v57 = vpop.f32.mrb[9].mxu1 }
0x160c   : > { %v2117_v59 = vpop.f32.mrb[10].mxu1  ;;  %v4083_v57 = vld [vmem:[%s4224_s5 + $0x70] sm:$0xff] }
0x160d   : > { %v2118_v60 = vadd.f32 %v2117_v59, %v2070_v58  ;;  %v2937_v61 = vpop.f32.mrb[11].mxu1  ;;  %v4051_v47 = vadd.f32 %v2115_v56, %v3873_v29  ;;  %v4077_v56 = vld [vmem:[%s4224_s5 + $0x60] sm:$0xff] }
0x160f   : > { %v4054_v62 = vadd.f32 %v2118_v60, %v3876_v63  ;;  %v2152_v63 = vpop.permute.xlu0 %2151 }
0x1611   : > { %v2133_v1 = vpack.c.bf16 %v4054_v62, %v4051_v47 }
0x1613   : > { %2938 = vmatprep.subr.bf16.mxu0 %v2133_v1 }
0x1614   : > { %2939 = vmatpush3.bf16.msra.mxu0 %v2133_v1 }
0x1617   : > { %2941 = vmatmul.mubr.msk.bf16.vlgmr.msra.gmra.mrb[12].mxu0 %vm394_vm0, %v3187_v12 }
0x16ea   : > { %v2942_v29 = vpop.f32.mrb[12].mxu0 }
0x16eb   : > { %v2204_v16 = vpop.f32.mrb[13].mxu0  ;;  %v2213_v54 = vadd.f32 %v2942_v29, %v2147_v49 }
0x16ec   : > { %v2205_v52 = vadd.f32 %v2204_v16, %v2137_v20  ;;  %v2943_v0 = vpop.f32.mrb[14].mxu0 }
0x16ed   : > { %v2207_v14 = vpop.f32.mrb[15].mxu0  ;;  %v2216_v21 = vadd.f32 %v2943_v0, %v2152_v63  ;;  %v2227_v32 = vmul.f32 %v2224_v28, %v2213_v54  ;;  %vm2222_vm0 = vcmp.ge.f32.partialorder %v2213_v54, 0.0 }
0x16ee   : > { %v2225_v11 = vmul.f32 %v2224_v28, %v2205_v52  ;;  %v2208_v10 = vadd.f32 %v2207_v14, %v2142_v13  ;;  %vm2220_vm3 = vcmp.ge.f32.partialorder %v2205_v52, 0.0  ;;  %v2854_v13 = vld [vmem:[%s4224_s5 + $0x68] sm:$0xff] }
0x16ef   : > { %v2228_v22 = vmul.f32 %v2224_v28, %v2216_v21  ;;  %vm2223_vm14 = vcmp.ge.f32.partialorder %v2216_v21, 0.0  ;;  %v2231_v36 = vsel %vm2222_vm0, %v2213_v54, %v2227_v32 }
0x16f0   : > { %vm2221_vm13 = vcmp.ge.f32.partialorder %v2208_v10, 0.0  ;;  %v2226_v5 = vmul.f32 %v2224_v28, %v2208_v10  ;;  %v2229_v45 = vsel %vm2220_vm3, %v2205_v52, %v2225_v11 }
0x16f1   : > { %v2232_v18 = vsel %vm2223_vm14, %v2216_v21, %v2228_v22 }
0x16f2   : > { %v2230_v15 = vsel %vm2221_vm13, %v2208_v10, %v2226_v5 }
0x16f3   : > { %v2233_v6 = vadd.f32 %v2230_v15, %v2229_v45 }
0x16f5   : > { %v2234_v17 = vadd.f32 %v2233_v6, %v2231_v36 }
0x16f7   : > { %v2235_v2 = vadd.f32 %v2234_v17, %v2232_v18 }
0x16f9   : > { %2236 = vadd.xlane.f32.xlu1 %v2235_v2 }
0x170a   : > { %2291 = vperm.xlu1 %3157, %v4011_v4  }
0x170e   : > { %2295 = vperm.xlu1 %3157, %v4017_v55  }
0x1712   : > { %3158 = vset.pattern.permute.xlu1 %v3307_v8 }
0x1713   : > { %2307 = vperm.xlu1 %3158, %v4040_v43  }
0x1717   : > { %2311 = vperm.xlu1 %3158, %v4011_v4  }
0x171b   : > { %3159 = vset.pattern.permute.xlu1 %v3306_v7 }
0x171c   : > { %2299 = vperm.xlu1 %3159, %v4046_v44  }
0x1720   : > { %3160 = vset.pattern.permute.xlu1 %v3307_v8 }
0x1721   : > { %2315 = vperm.xlu1 %3160, %v4017_v55  }
0x1725   : > { %2319 = vperm.xlu1 %3160, %v4046_v44  }
0x1729   : > { %2436 = vperm.xlu1 %3160, %v4077_v56  }
0x172d   : > { %2444 = vperm.xlu1 %3160, %v4083_v57  }
0x1786   : > { %v2237_v35 = vpop.xlane.xlu1 %2236 }
0x1787   : > { %v2238_v19 = vrot.slane %v2237_v35, 4 }
0x1789   : > { %v2239_v23 = vadd.f32 %v2238_v19, %v2237_v35 }
0x178a   : > { %v2292_v0 = vpop.permute.xlu1 %2291 }
0x178b   : > { %v2240_v24 = vrot.slane %v2239_v23, 2 }
0x178d   : > { %v2241_v25 = vadd.f32 %v2240_v24, %v2239_v23 }
0x178e   : > { %v2296_v14 = vpop.permute.xlu1 %2295 }
0x178f   : > { %v2242_v39 = vrot.slane %v2241_v25, 1 }
0x1791   : > { %v2243_v26 = vadd.f32 %v2242_v39, %v2241_v25 }
0x1792   : > { %v2308_v11 = vpop.permute.xlu1 %2307 }
0x1793   : > { %3000 = vpush %v2243_v26  ;;  %v2856_v26 = vld [vmem:[%s4224_s5 + $0x78] sm:$0xff] }
0x1796   : > { %v2312_v21 = vpop.permute.xlu1 %2311 }
0x179b   : > { %v2300_v10 = vpop.permute.xlu1 %2299 }
0x17c4   : > { %s3001_s18 = spop %3000 }
0x17c5   : > { %s2245_s19 = smul.f32 0.00024414063, %s3001_s18 }
0x17c7   : > { %v2246_v31 = vstv %s2245_s19 }
0x17c8   : > { %v2247_v30 = vsub.f32 %v2229_v45, %v2246_v31  ;;  %v2248_v50 = vsub.f32 %v2230_v15, %v2246_v31  ;;  %v2249_v33 = vsub.f32 %v2231_v36, %v2246_v31  ;;  %v2250_v34 = vsub.f32 %v2232_v18, %v2246_v31  ;;  %v2316_v36 = vpop.permute.xlu1 %2315 }
0x17ca   : > { %v2251_v37 = vmul.f32 %v2247_v30, %v2247_v30  ;;  %v2252_v38 = vmul.f32 %v2248_v50, %v2248_v50  ;;  %v2253_v40 = vmul.f32 %v2249_v33, %v2249_v33  ;;  %v2254_v42 = vmul.f32 %v2250_v34, %v2250_v34 }
0x17cc   : > { %v2255_v41 = vadd.f32 %v2252_v38, %v2251_v37  ;;  %v2320_v24 = vpop.permute.xlu1 %2319 }
0x17ce   : > { %v2256_v48 = vadd.f32 %v2255_v41, %v2253_v40 }
0x17d0   : > { %v2257_v53 = vadd.f32 %v2256_v48, %v2254_v42  ;;  %v2437_v31 = vpop.permute.xlu1 %2436 }
0x17d2   : > { %2258 = vadd.xlane.f32.xlu0 %v2257_v53 }
0x17e8   : > { %2287 = vperm.xlu0 %3156, %v4040_v43  }
0x17ec   : > { %3161 = vset.pattern.permute.xlu0 %v3307_v8 }
0x17ed   : > { %2440 = vperm.xlu0 %3161, %v2854_v13  }
0x17f1   : > { %3162 = vset.pattern.permute.xlu0 %v3306_v7 }
0x185f   : > { %v2259_v58 = vpop.xlane.xlu0 %2258 }
0x1860   : > { %v2260_v59 = vrot.slane %v2259_v58, 4 }
0x1862   : > { %v2261_v60 = vadd.f32 %v2260_v59, %v2259_v58 }
0x1864   : > { %v2262_v61 = vrot.slane %v2261_v60, 2 }
0x1866   : > { %v2263_v1 = vadd.f32 %v2262_v61, %v2261_v60 }
0x1867   : > { %v2288_v5 = vpop.permute.xlu0 %2287 }
0x1868   : > { %v2264_v8 = vrot.slane %v2263_v1, 1 }
0x186a   : > { %v2265_v12 = vadd.f32 %v2264_v8, %v2263_v1 }
0x186c   : > { %3002 = vpush %v2265_v12 }
0x189d   : > { %s3003_s12 = spop %3002 }
0x189e   : > { %s2267_s13 = smul.f32 0.00024420026, %s3003_s12 }
0x18a0   : > { %v2268_v20 = vstv %s2267_s13 }
0x18a1   : > { %3213 = vrsqrt.f32 %v2268_v20  ;;  %vm2271_vm15 = vcmp.eq.f32.partialorder %v2268_v20, inf  ;;  %v2274_v28 = vand.u32 2147483648, %v2268_v20  ;;  %vm2273_vm1 = vcmp.eq.f32.partialorder %v2268_v20, 0.0 }
0x18ab   : > { %v3214_v49 = vpop.eup %3213 }
0x18ac   : > { %v2270_v29 = vmul.f32 %v3214_v49, %v2268_v20 }
0x18ae   : > { %v2272_v16 = vsel %vm2271_vm15, %v2268_v20, %v2270_v29 }
0x18af   : > { %v2275_v63 = vsel %vm2273_vm1, %v2274_v28, %v2272_v16 }
0x18b0   : > { %3004 = vpush %v2275_v63 }
0x18e1   : > { %s3005_s25 = spop %3004 }
0x18e2   : > { %s2277_s17 = sadd.f32 1e-05, %s3005_s25  ;;  %s2871_s25 = sshll.u32 %s3389_s9, 8 }
0x18e4   : > { %v2278_v54 = vstv %s2277_s17 }
0x18e5   : > { %3215 = vrcp.f32 %v2278_v54 }
0x18ef   : > { %v3216_v52 = vpop.eup %3215 }
0x18f0   : > { %3006 = vpush %v3216_v52 }
0x1921   : > { %s3007_s18 = spop %3006 }
0x1922   : > { %v2281_v32 = vstv %s3007_s18 }
0x1923   : > { %v2283_v45 = vmul.f32 %v2281_v32, %v2248_v50  ;;  %v2284_v22 = vmul.f32 %v2281_v32, %v2249_v33  ;;  %v2282_v15 = vmul.f32 %v2281_v32, %v2247_v30  ;;  %v2285_v6 = vmul.f32 %v2281_v32, %v2250_v34  ;;  %v2441_v30 = vpop.permute.xlu0 %2440  ;;  %v2445_v50 = vpop.permute.xlu1 %2444 }
0x1925   : > { %v2303_v17 = vmul.f32 %v2292_v0, %v2283_v45  ;;  %v2302_v18 = vmul.f32 %v2288_v5, %v2282_v15  ;;  %v2304_v2 = vmul.f32 %v2296_v14, %v2284_v22  ;;  %v2305_v19 = vmul.f32 %v2300_v10, %v2285_v6 }
0x1927   : > { %v4090_v35 = vadd.f32 %v2308_v11, %v2302_v18  ;;  %v4092_v23 = vadd.f32 %v2312_v21, %v2303_v17  ;;  %v4098_v25 = vadd.f32 %v2316_v36, %v2304_v2  ;;  %v4100_v39 = vadd.f32 %v2320_v24, %v2305_v19 }
0x1929   : > { %2379 = vrot.lane.b32.xlu1 %v4090_v35, %s3309_s21  ;;  %2381 = vrot.lane.b32.xlu0 %v4092_v23, %s3309_s21 }
0x192d   : > { %2383 = vrot.lane.b32.xlu1 %v4098_v25, %s3309_s21  ;;  %2385 = vrot.lane.b32.xlu0 %v4100_v39, %s3309_s21 }
0x1931   : > { %2448 = vperm.xlu1 %3160, %v2856_v26   ;;  %2333 = vperm.xlu0 %3162, %v4077_v56  }
0x1935   : > { %3163 = vset.pattern.permute.xlu1 %v3306_v7  ;;  %3164 = vset.pattern.permute.xlu0 %v3310_v51 }
0x1936   : > { %2338 = vperm.xlu1 %3163, %v2854_v13   ;;  %2356 = vperm.xlu0 %3164, %v4040_v43  }
0x193a   : > { %2343 = vperm.xlu1 %3163, %v4083_v57   ;;  %3167 = vset.pattern.permute.xlu0 %v3305_v3 }
0x193b   : > { %2408 = vperm.xlu0 %3167, %v2854_v13  }
0x193e   : > { %3165 = vset.pattern.permute.xlu1 %v3310_v51 }
0x193f   : > { %2360 = vperm.xlu1 %3165, %v4011_v4   ;;  %2412 = vperm.xlu0 %3167, %v4083_v57  }
0x1943   : > { %3166 = vset.pattern.permute.xlu1 %v3305_v3  ;;  %2416 = vperm.xlu0 %3167, %v2856_v26  }
0x1944   : > { %2404 = vperm.xlu1 %3166, %v4077_v56  }
0x1947   : > { %3170 = vset.pattern.permute.xlu0 %v3313_v9 }
0x1948   : > { %3168 = vset.pattern.permute.xlu1 %v3306_v7 }
0x1949   : > { %2348 = vperm.xlu1 %3168, %v2856_v26  }
0x194d   : > { %3169 = vset.pattern.permute.xlu1 %v3310_v51 }
0x194e   : > { %2364 = vperm.xlu1 %3169, %v4017_v55  }
0x1952   : > { %2368 = vperm.xlu1 %3169, %v4046_v44  }
0x1956   : > { %3171 = vset.pattern.permute.xlu1 %v3313_v9 }
0x199b   : > { %v2382_v33 = vpop.permute.xlu0 %2381  ;;  %v2380_v34 = vpop.permute.xlu1 %2379 }
0x199c   : > { %2393 = vst.msk [vmem:[#allocation2 + $0x10] sm:$0xff] %vm645_vm9, %v2382_v33  ;;  %2391 = vst.msk [vmem:[#allocation2] sm:$0xff] %vm645_vm9, %v2380_v34 }
0x199d   : > { %2394 = vst.msk [vmem:[#allocation2 + $0x18] sm:$0xff] %vm339_vm7, %v2382_v33  ;;  %2392 = vst.msk [vmem:[#allocation2 + $0x8] sm:$0xff] %vm339_vm7, %v2380_v34 }
0x199f   : > { %v2386_v7 = vpop.permute.xlu0 %2385  ;;  %v2384_v51 = vpop.permute.xlu1 %2383 }
0x19a0   : > { %2397 = vst.msk [vmem:[#allocation2 + $0x30] sm:$0xff] %vm645_vm9, %v2386_v7  ;;  %2395 = vst.msk [vmem:[#allocation2 + $0x20] sm:$0xff] %vm645_vm9, %v2384_v51 }
0x19a1   : > { %2398 = vst.msk [vmem:[#allocation2 + $0x38] sm:$0xff] %vm339_vm7, %v2386_v7  ;;  %2396 = vst.msk [vmem:[#allocation2 + $0x28] sm:$0xff] %vm339_vm7, %v2384_v51  ;;  %vm2483_vm7 = vcmask 916480   ;;  %v2501_v7 = vstv %s2857_s23 }
0x19a3   : > { %v2427_v38 = vld [vmem:[#allocation2] sm:$0xff]  ;;  %v2429_v48 = vld [vmem:[#allocation2 + $0x10] sm:$0xff] }
0x19a4   : > { %v2428_v37 = vld [vmem:[#allocation2 + $0x8] sm:$0xff]  ;;  %v2451_v41 = vmul.f32 %v2437_v31, %v2427_v38  ;;  %v2430_v42 = vld [vmem:[#allocation2 + $0x18] sm:$0xff]  ;;  %v2453_v56 = vmul.f32 %v2441_v30, %v2429_v48 }
0x19a5   : > { %v2452_v40 = vmul.f32 %v2437_v31, %v2428_v37  ;;  %v2454_v53 = vmul.f32 %v2441_v30, %v2430_v42 }
0x19a6   : > { %2467 = vrot.lane.b32.xlu1 %v2451_v41, %s3320_s22 }
0x19a7   : > { %2469 = vrot.lane.b32.xlu0 %v2452_v40, %s3320_s22  ;;  %v2431_v58 = vld [vmem:[#allocation2 + $0x20] sm:$0xff]  ;;  %v2433_v61 = vld [vmem:[#allocation2 + $0x30] sm:$0xff] }
0x19a8   : > { %v2432_v57 = vld [vmem:[#allocation2 + $0x28] sm:$0xff]  ;;  %v2455_v60 = vmul.f32 %v2445_v50, %v2431_v58  ;;  %v2434_v1 = vld [vmem:[#allocation2 + $0x38] sm:$0xff] }
0x19a9   : > { %v2456_v59 = vmul.f32 %v2445_v50, %v2432_v57 }
0x19aa   : > { %2471 = vrot.lane.b32.xlu1 %v2453_v56, %s3320_s22 }
0x19ab   : > { %2473 = vrot.lane.b32.xlu0 %v2454_v53, %s3320_s22 }
0x19ae   : > { %2475 = vrot.lane.b32.xlu1 %v2455_v60, %s3320_s22 }
0x19af   : > { %2477 = vrot.lane.b32.xlu0 %v2456_v59, %s3320_s22 }
0x19b0   : > { %v2449_v8 = vpop.permute.xlu1 %2448  ;;  %v2334_v29 = vpop.permute.xlu0 %2333 }
0x19b1   : > { %v2457_v12 = vmul.f32 %v2449_v8, %v2433_v61  ;;  %v2458_v13 = vmul.f32 %v2449_v8, %v2434_v1  ;;  %v2351_v22 = vmul.f32 %v2334_v29, %v4090_v35 }
0x19b3   : > { %2481 = vrot.lane.b32.xlu0 %v2458_v13, %s3320_s22  ;;  %2479 = vrot.lane.b32.xlu1 %v2457_v12, %s3320_s22 }
0x19b5   : > { %v2339_v20 = vpop.permute.xlu1 %2338  ;;  %v2357_v16 = vpop.permute.xlu0 %2356 }
0x19b6   : > { %v2352_v10 = vmul.f32 %v2339_v20, %v4092_v23  ;;  %v2371_v17 = vadd.f32 %v2357_v16, %v2351_v22 }
0x19b9   : > { %v2344_v49 = vpop.permute.xlu1 %2343 }
0x19ba   : > { %v2409_v54 = vpop.permute.xlu0 %2408  ;;  %v2353_v6 = vmul.f32 %v2344_v49, %v4098_v25 }
0x19bb   : > { %v2420_v36 = vmul.f32 %v2429_v48, %v2409_v54 }
0x19be   : > { %v2361_v28 = vpop.permute.xlu1 %2360  ;;  %v2413_v0 = vpop.permute.xlu0 %2412 }
0x19bf   : > { %v2372_v32 = vadd.f32 %v2361_v28, %v2352_v10  ;;  %v2421_v30 = vmul.f32 %v2431_v58, %v2413_v0 }
0x19c1   : > { %v2424_v18 = vadd.f32 %v2420_v36, %v2372_v32 }
0x19c2   : > { %v2417_v11 = vpop.permute.xlu0 %2416 }
0x19c3   : > { %v2405_v63 = vpop.permute.xlu1 %2404  ;;  %v2422_v42 = vmul.f32 %v2433_v61, %v2417_v11 }
0x19c4   : > { %v2419_v15 = vmul.f32 %v2427_v38, %v2405_v63 }
0x19c6   : > { %v2423_v31 = vadd.f32 %v2419_v15, %v2371_v17 }
0x19c8   : > { %v2349_v52 = vpop.permute.xlu1 %2348 }
0x19c9   : > { %v2354_v33 = vmul.f32 %v2349_v52, %v4100_v39 }
0x19cd   : > { %v2365_v14 = vpop.permute.xlu1 %2364 }
0x19ce   : > { %v2373_v2 = vadd.f32 %v2365_v14, %v2353_v6 }
0x19d0   : > { %v2425_v34 = vadd.f32 %v2421_v30, %v2373_v2  ;;  %v2861_v30 = vld [vmem:[%s4226_s7 + $0x38] sm:$0xff] }
0x19d1   : > { %v2369_v21 = vpop.permute.xlu1 %2368 }
0x19d2   : > { %v2374_v37 = vadd.f32 %v2369_v21, %v2354_v33 }
0x19d4   : > { %v2426_v56 = vadd.f32 %v2422_v42, %v2374_v37 }
0x1a18   : > { %v2468_v45 = vpop.permute.xlu1 %2467 }
0x1a19   : > { %v2470_v5 = vpop.permute.xlu0 %2469 }
0x1a1a   : > { %v2484_v19 = vsel %vm2483_vm7, %v2468_v45, %v2470_v5 }
0x1a1b   : > { %v2492_v35 = vadd.f32 %v2484_v19, %v2423_v31 }
0x1a1c   : > { %v2472_v26 = vpop.permute.xlu1 %2471 }
0x1a1d   : > { %v2474_v24 = vpop.permute.xlu0 %2473  ;;  %v2502_v48 = vmul.f32 %v2501_v7, %v2492_v35  ;;  %vm2497_vm2 = vcmp.ge.f32.partialorder %v2492_v35, 0.0 }
0x1a1e   : > { %v2485_v23 = vsel %vm2483_vm7, %v2472_v26, %v2474_v24 }
0x1a1f   : > { %v2493_v50 = vadd.f32 %v2485_v23, %v2424_v18  ;;  %v2506_v60 = vsel %vm2497_vm2, %v2492_v35, %v2502_v48 }
0x1a20   : > { %v2476_v25 = vpop.permute.xlu1 %2475 }
0x1a21   : > { %v2478_v51 = vpop.permute.xlu0 %2477  ;;  %v2503_v38 = vmul.f32 %v2501_v7, %v2493_v50  ;;  %vm2498_vm9 = vcmp.ge.f32.partialorder %v2493_v50, 0.0 }
0x1a22   : > { %v2486_v40 = vsel %vm2483_vm7, %v2476_v25, %v2478_v51 }
0x1a23   : > { %v2494_v41 = vadd.f32 %v2486_v40, %v2425_v34  ;;  %v2507_v57 = vsel %vm2498_vm9, %v2493_v50, %v2503_v38 }
0x1a24   : > { %v2510_v12 = vadd.f32 %v2507_v57, %v2506_v60 }
0x1a25   : > { %vm2499_vm5 = vcmp.ge.f32.partialorder %v2494_v41, 0.0  ;;  %v2504_v53 = vmul.f32 %v2501_v7, %v2494_v41  ;;  %v2482_v58 = vpop.permute.xlu0 %2481  ;;  %v2480_v39 = vpop.permute.xlu1 %2479 }
0x1a26   : > { %v2487_v59 = vsel %vm2483_vm7, %v2480_v39, %v2482_v58 }
0x1a27   : > { %v2495_v1 = vadd.f32 %v2487_v59, %v2426_v56  ;;  %v2508_v8 = vsel %vm2499_vm5, %v2494_v41, %v2504_v53 }
0x1a28   : > { %v2511_v20 = vadd.f32 %v2510_v12, %v2508_v8 }
0x1a29   : > { %v2505_v13 = vmul.f32 %v2501_v7, %v2495_v1  ;;  %vm2500_vm6 = vcmp.ge.f32.partialorder %v2495_v1, 0.0 }
0x1a2b   : > { %v2509_v49 = vsel %vm2500_vm6, %v2495_v1, %v2505_v13 }
0x1a2c   : > { %v2512_v29 = vadd.f32 %v2511_v20, %v2509_v49 }
0x1a2e   : > { %2513 = vadd.xlane.f32.xlu1 %v2512_v29 }
0x1a3f   : > { %2568 = vperm.xlu1 %3171, %v4011_v4  }
0x1a43   : > { %3172 = vset.pattern.permute.xlu1 %v3314_v46 }
0x1a44   : > { %2584 = vperm.xlu1 %3172, %v4040_v43  }
0x1a48   : > { %2588 = vperm.xlu1 %3172, %v4011_v4  }
0x1a4c   : > { %3173 = vset.pattern.permute.xlu1 %v3313_v9 }
0x1a4d   : > { %2572 = vperm.xlu1 %3173, %v4017_v55  }
0x1a51   : > { %2576 = vperm.xlu1 %3173, %v4046_v44  }
0x1a55   : > { %3174 = vset.pattern.permute.xlu1 %v3314_v46 }
0x1a56   : > { %2592 = vperm.xlu1 %3174, %v4017_v55  }
0x1a5a   : > { %2596 = vperm.xlu1 %3174, %v4046_v44  }
0x1a5e   : > { %3176 = vset.pattern.permute.xlu1 %v3305_v3 }
0x1a5f   : > { %2618 = vperm.xlu1 %3176, %v2861_v30  }
0x1abb   : > { %v2514_v61 = vpop.xlane.xlu1 %2513 }
0x1abc   : > { %v2515_v28 = vrot.slane %v2514_v61, 4 }
0x1abe   : > { %v2516_v16 = vadd.f32 %v2515_v28, %v2514_v61 }
0x1abf   : > { %v2569_v35 = vpop.permute.xlu1 %2568 }
0x1ac0   : > { %v2517_v63 = vrot.slane %v2516_v16, 2 }
0x1ac2   : > { %v2518_v54 = vadd.f32 %v2517_v63, %v2516_v16 }
0x1ac3   : > { %v2585_v34 = vpop.permute.xlu1 %2584 }
0x1ac4   : > { %v2519_v4 = vrot.slane %v2518_v54, 1 }
0x1ac6   : > { %v2520_v52 = vadd.f32 %v2519_v4, %v2518_v54 }
0x1ac7   : > { %v2589_v7 = vpop.permute.xlu1 %2588 }
0x1ac8   : > { %3008 = vpush %v2520_v52 }
0x1acc   : > { %v2573_v51 = vpop.permute.xlu1 %2572 }
0x1ad0   : > { %v2577_v25 = vpop.permute.xlu1 %2576 }
0x1ad5   : > { %v2593_v37 = vpop.permute.xlu1 %2592 }
0x1ad9   : > { %v2597_v59 = vpop.permute.xlu1 %2596 }
0x1ade   : > { %v2619_v28 = vpop.permute.xlu1 %2618 }
0x1af9   : > { %s3009_s24 = spop %3008 }
0x1afa   : > { %s2522_s26 = smul.f32 0.00024414063, %s3009_s24 }
0x1afc   : > { %v2523_v9 = vstv %s2522_s26  ;;  %s325_s26 = sand.u32 1, %s3294_s28  }
0x1afd   : > { %v2524_v0 = vsub.f32 %v2506_v60, %v2523_v9  ;;  %v2525_v14 = vsub.f32 %v2507_v57, %v2523_v9  ;;  %v2526_v46 = vsub.f32 %v2508_v8, %v2523_v9  ;;  %v2527_v11 = vsub.f32 %v2509_v49, %v2523_v9  ;;  %v3188_v49 = vld [vmem:[%s4225_s6 + $0x18] sm:$0xff]  }
0x1aff   : > { %v2528_v55 = vmul.f32 %v2524_v0, %v2524_v0  ;;  %v2529_v21 = vmul.f32 %v2525_v14, %v2525_v14  ;;  %v2530_v44 = vmul.f32 %v2526_v46, %v2526_v46  ;;  %v2531_v32 = vmul.f32 %v2527_v11, %v2527_v11 }
0x1b01   : > { %v2532_v10 = vadd.f32 %v2529_v21, %v2528_v55 }
0x1b03   : > { %v2533_v5 = vadd.f32 %v2532_v10, %v2530_v44 }
0x1b05   : > { %v2534_v45 = vadd.f32 %v2533_v5, %v2531_v32 }
0x1b07   : > { %2535 = vadd.xlane.f32.xlu0 %v2534_v45 }
0x1b1d   : > { %2564 = vperm.xlu0 %3170, %v4040_v43  }
0x1b21   : > { %3175 = vset.pattern.permute.xlu0 %v3305_v3  ;;  %v2860_v3 = vld [vmem:[%s4226_s7 + $0x30] sm:$0xff] }
0x1b22   : > { %2613 = vperm.xlu0 %3175, %v2860_v3  }
0x1b94   : > { %v2536_v22 = vpop.xlane.xlu0 %2535 }
0x1b95   : > { %v2537_v15 = vrot.slane %v2536_v22, 4 }
0x1b97   : > { %v2538_v6 = vadd.f32 %v2537_v15, %v2536_v22 }
0x1b99   : > { %v2539_v36 = vrot.slane %v2538_v6, 2 }
0x1b9b   : > { %v2540_v17 = vadd.f32 %v2539_v36, %v2538_v6 }
0x1b9c   : > { %v2565_v40 = vpop.permute.xlu0 %2564 }
0x1b9d   : > { %v2541_v18 = vrot.slane %v2540_v17, 1 }
0x1b9f   : > { %v2542_v2 = vadd.f32 %v2541_v18, %v2540_v17 }
0x1ba1   : > { %3010 = vpush %v2542_v2  ;;  %v2614_v29 = vpop.permute.xlu0 %2613 }
0x1bd2   : > { %s3011_s10 = spop %3010 }
0x1bd3   : > { %s2544_s12 = smul.f32 0.00024420026, %s3011_s10  ;;  %s2780_s10 = sshll.u32 %s325_s26, 4 }
0x1bd5   : > { %v2545_v19 = vstv %s2544_s12  ;;  %s327_s12 = scalar_lea.vmem [#allocation6], %s2780_s10 }
0x1bd6   : > { %3217 = vrsqrt.f32 %v2545_v19  ;;  %vm2548_vm8 = vcmp.eq.f32.partialorder %v2545_v19, inf  ;;  %v2551_v31 = vand.u32 2147483648, %v2545_v19  ;;  %vm2550_vm10 = vcmp.eq.f32.partialorder %v2545_v19, 0.0  ;;  %s2688_s13 = sshll.u32 %s327_s12, 4  ;;  %s4169_s13 = int_to_ptr.vmem [resolvable:$true] %s2688_s13 }
0x1bd7   : > { %s3236_s9 = scalar_lea.vmem %s4169_s13, 256 }
0x1bd8   : > { %p3237_p9 = scmp.ne.s32.totalorder %s4169_s13, %s3236_s9 }
0x1bda   : > { %p3238_p10 = pnand %p3237_p9, %p3406_p5 }
0x1bdc   : > { %p3239_p12 = pneg %p3238_p10 }
0x1be0   : > { %v3218_v24 = vpop.eup %3217 }
0x1be1   : > { %v2547_v26 = vmul.f32 %v3218_v24, %v2545_v19 }
0x1be3   : > { %v2549_v23 = vsel %vm2548_vm8, %v2545_v19, %v2547_v26 }
0x1be4   : > { %v2552_v43 = vsel %vm2550_vm10, %v2551_v31, %v2549_v23 }
0x1be5   : > { %3012 = vpush %v2552_v43 }
0x1c16   : > { %s3013_s19 = spop %3012 }
0x1c17   : > { %s2554_s20 = sadd.f32 1e-05, %s3013_s19  ;;  %s4175_s19 = scalar_lea.hbm %s4227_s8, %s2871_s25 }
0x1c19   : > { %v2555_v50 = vstv %s2554_s20  ;;  %s4177_s20 = scalar_lea.sflag [#allocation4], %s325_s26 }
0x1c1a   : > { %3219 = vrcp.f32 %v2555_v50 }
0x1c24   : > { %v3220_v33 = vpop.eup %3219 }
0x1c25   : > { %3014 = vpush %v3220_v33 }
0x1c56   : > { %s3015_s22 = spop %3014 }
0x1c57   : > { %v2558_v38 = vstv %s3015_s22  ;;  %s3321_s22 = smov [#allocation6]  }
0x1c58   : > { %v2560_v41 = vmul.f32 %v2558_v38, %v2525_v14  ;;  %v2561_v42 = vmul.f32 %v2558_v38, %v2526_v46  ;;  %v2562_v48 = vmul.f32 %v2558_v38, %v2527_v11  ;;  %v2559_v53 = vmul.f32 %v2558_v38, %v2524_v0  ;;  %s3240_s23 = sshll.u32 %s3321_s22, 4  ;;  %s3241_s23 = int_to_ptr.vmem [resolvable:$false] %s3240_s23 }
0x1c59   : > { %s3242_s24 = scalar_lea.vmem %s3241_s23, 512  ;;  %p3243_p13 = scmp.lt.s32.totalorder %s4169_s13, %s3241_s23 }
0x1c5a   : > { %v2580_v56 = vmul.f32 %v2569_v35, %v2560_v41  ;;  %v2581_v57 = vmul.f32 %v2573_v51, %v2561_v42  ;;  %v2579_v58 = vmul.f32 %v2565_v40, %v2559_v53  ;;  %v2582_v39 = vmul.f32 %v2577_v25, %v2562_v48  ;;  %p3244_p0 = scmp.lt.s32.totalorder %s3242_s24, %s3236_s9 }
0x1c5c   : > { %v2599_v60 = vadd.f32 %v2585_v34, %v2579_v58  ;;  %v2600_v1 = vadd.f32 %v2589_v7, %v2580_v56  ;;  %v2601_v8 = vadd.f32 %v2593_v37, %v2581_v57  ;;  %v2602_v13 = vadd.f32 %v2597_v59, %v2582_v39  ;;  %p3245_p1 = por %p3244_p0, %p3243_p13 }
0x1c5e   : > { %v2606_v12 = vpack.c.bf16 %v2600_v1, %v2599_v60  ;;  %v2607_v20 = vpack.c.bf16 %v2602_v13, %v2601_v8  ;;  %p3246_p2 = pnand %p3245_p1, %p3239_p12 }
0x1c60   : > { %2945 = vmatpush3.bf16.msra.mxu1 %v2606_v12 }
0x1c61   : > { %2946 = vmatprep.subr.bf16.mxu1 %v3308_v27 }
0x1c64   : > { %2947 = vmatpush3.bf16.msra.mxu1 %v2607_v20 }
0x1c67   : > { %2949 = vmatmul.mubr.msk.bf16.vlgmr.msra.gmra.mrb[12].mxu1 %vm912_vm4, %v3188_v49 }
0x1d3a   : > { %v2663_v61 = vpop.f32.mrb[12].mxu1 }
0x1d3b   : > { %v2664_v16 = vadd.f32 %v2663_v61, %v2614_v29  ;;  %v2950_v63 = vpop.f32.mrb[13].mxu1 }
0x1d3c   : > { %v2666_v54 = vpop.f32.mrb[14].mxu1 }
0x1d3d   : > { %v2670_v27 = vadd.f32 %v2664_v16, %v4051_v47  ;;  %v2667_v4 = vadd.f32 %v2666_v54, %v2619_v28  ;;  %v2951_v52 = vpop.f32.mrb[15].mxu1 }
0x1d3f   : > { %2672 = vst [vmem:[%s327_s12] sm:$0xff] %v2670_v27  ;;  %v2671_v9 = vadd.f32 %v2667_v4, %v4054_v62 }
0x1d41   : > { %2673 = vst [vmem:[%s327_s12 + $0x8] sm:$0xff] %v2671_v9 }
0x1d42   : > { %3249 = shalt.err (!%p3246_p2)
}
0x1d43   : > { %s3250_s26 = scalar_lea.hbm %s4175_s19, 256  ;;  %s3254_s25 = scalar_lea.hbm %s4227_s8, 512 }
0x1d44   : > { %p3251_p3 = scmp.ne.s32.totalorder %s4175_s19, %s3250_s26  ;;  %p3255_p8 = scmp.lt.u32.totalorder %s4175_s19, %s4227_s8 }
0x1d45   : > { %p3256_p11 = scmp.lt.u32.totalorder %s3254_s25, %s3250_s26  ;;  %p3258_p10 = scmp.lt.u32.totalorder %s3250_s26, %s4175_s19 }
0x1d46   : > { %p3252_p4 = pnand %p3251_p3, %p3406_p5 }
0x1d47   : > { %p3257_p9 = por %p3256_p11, %p3255_p8 }
0x1d48   : > { %p3253_p7 = pneg %p3252_p4 }
0x1d49   : > { %p3259_p12 = por %p3258_p10, %p3257_p9 }
0x1d4b   : > { %p3260_p13 = pnand %p3259_p12, %p3253_p7 }
0x1d4d   : > { %3263 = shalt.err (!%p3260_p13)
}
0x1d4e   : > { %s3322_s9 = smov 128  }
0x1d4f   : > { %3020 = dma.vmem_to_hbm [thread:$0]  (%p3406_p5), %s4169_s13, 256, %s4175_s19, %s4177_s20, %s3322_s9, %s3322_s9, %s3309_s21  }
0x1d50 PF: > { %p3032_p0 = scmp.ge.s32.totalorder %s3302_s30, 2  ;;  %s2703_s22 = sand.u32 1, %s3290_s27  }
0x1d51   : > { %s2704_s23 = scalar_lea.sflag [#allocation4], %s2703_s22 }
0x1d52   : > { %p3027_p1 = pnand %p3032_p0, %p3410_p6 }
0x1d54   : > { %3285 = dma.done.wait (!%p3027_p1), %s2704_s23, 256  }
0x1d55   : > { %3287 = vsyncadd (!%p3027_p1), %s2704_s23, 4294967040  ;;  %p19_p2 = scmp.ge.s32.totalorder %s3393_s11, 4   ;;  %s4231_s27 = smov %s3294_s28 }
0x1d56   : > { %s4232_s28 = smov %s3298_s29  ;;  %s4233_s29 = smov %s3404_s14 }
0x1d57   : > { %s4234_s30 = smov %s3393_s11  ;;  %21 = sbr.rel (!%p19_p2) target bundleno = 4 (0x4), region = 110 }
0x1d5e   :  { %2709 = vsyncpa [#allocation4], 1 }
0x1d5f   :  { %2711 = vsyncpa [#allocation4 + $0x1], 1 }
0x1d60   :  { %2712 = vsyncpa [#allocation5], 1 }
0x1d61   :  { %2714 = vsyncpa [#allocation5 + $0x1], 1 }

</bundles_post_ra>
